<compile_context>
chip_gen: v7x
topology: tpu7x:2x2x1
jax: 0.10.0
libtpu: 0.0.40
codegen_flags: <defaults>
</compile_context>

<pallas_src>
import functools

import jax
import jax.numpy as jnp
from jax.experimental import pallas as pl
from jax.experimental.pallas import tpu as pltpu

EPS = 1e-5


# --------------------------------------------------------------------------
# Kernel A: per-point MLP + global max pool -> g (B, 1, 1024)
# --------------------------------------------------------------------------
def point_mlp_kernel(x_ref, w1, s1, w2, s2, w3, s3, g_ref, *,
                     tile_n, n_valid, needs_mask):
    n_idx = pl.program_id(1)

    @pl.when(n_idx == 0)
    def _init():
        g_ref[...] = jnp.zeros_like(g_ref)

    xb = x_ref[0]                                           # (TN, 3) f32

    # Layer 1 (3 -> 64, K=3): three VPU broadcast FMAs; BN scale folded into w1.
    w1f = w1[...]                                           # (3, 64) f32
    h = (xb[:, 0:1] * w1f[0:1, :]
         + xb[:, 1:2] * w1f[1:2, :]
         + xb[:, 2:3] * w1f[2:3, :]) + s1[...]
    h = jnp.maximum(h, 0.0)                                 # (TN, 64)

    # Layer 2 (64 -> 128) and layer 3 (128 -> 1024) on the MXU in bf16.
    h = jnp.dot(h.astype(jnp.bfloat16), w2[...],
                preferred_element_type=jnp.float32) + s2[...]
    h = jnp.maximum(h, 0.0)                                 # (TN, 128)
    h = jnp.dot(h.astype(jnp.bfloat16), w3[...],
                preferred_element_type=jnp.float32) + s3[...]
    h = jnp.maximum(h, 0.0)                                 # (TN, 1024)

    if needs_mask:
        # Zero-padded point rows must not win the max (post-ReLU values >= 0,
        # so masking them to 0 is exact).
        row = jax.lax.broadcasted_iota(jnp.int32, (tile_n, 1), 0) + n_idx * tile_n
        h = jnp.where(row < n_valid, h, 0.0)

    # Max over points: pairwise fold on the VPU down to 8 sublanes,
    # then one small sublane reduce, then fold into the running max.
    m = h
    rows = tile_n
    while rows > 8 and rows % 16 == 0:
        half = rows // 2
        m = jnp.maximum(m[:half, :], m[half:, :])
        rows = half
    tile_max = jnp.max(m, axis=0, keepdims=True)            # (1, 1024)
    g_ref[0] = jnp.maximum(g_ref[0], tile_max)


# --------------------------------------------------------------------------
# Kernel B: fc head for all batches at once -> t9 (B, 9)
# --------------------------------------------------------------------------
def fc_head_kernel(g_ref, w4, s4, w5, s5, w6, b6, t_ref):
    f = jnp.dot(g_ref[...].astype(jnp.bfloat16), w4[...],
                preferred_element_type=jnp.float32) + s4[...]
    f = jnp.maximum(f, 0.0)                                 # (B, 512)
    f = jnp.dot(f.astype(jnp.bfloat16), w5[...],
                preferred_element_type=jnp.float32) + s5[...]   # (B, 256), no ReLU
    t_ref[...] = jnp.dot(f, w6[...],
                         preferred_element_type=jnp.float32) + b6[...]  # (B, 9)


# --------------------------------------------------------------------------
# Kernel C: y = trans^T @ x per batch, lane-dense (B, 3, N) output
# --------------------------------------------------------------------------
def bmm_kernel(tT_ref, x_ref, y_ref):
    y_ref[0] = jnp.dot(tT_ref[0], x_ref[0],
                       preferred_element_type=jnp.float32)  # (3, TN)


# --------------------------------------------------------------------------
# Wrapper
# --------------------------------------------------------------------------
def stn3d_forward(x, params, tile_n=256):
    """x: (B, 3, N) (PyTorch layout). Returns (x_out (B,3,N), trans (B,3,3))."""
    B, C, N = x.shape
    assert C == 3
    (w1, s1, w2, s2, w3, s3, w4, s4, w5, s5, w6, b6) = params

    x = x.astype(jnp.float32)
    TN = N if N <= tile_n else tile_n
    n_tiles = pl.cdiv(N, TN)
    N_pad = n_tiles * TN
    x_p = jnp.pad(x, ((0, 0), (0, 0), (0, N_pad - N))) if N_pad != N else x
    xt = jnp.transpose(x_p, (0, 2, 1))                      # (B, N_pad, 3)

    # ---- kernel A: per-point MLP + global max pool ------------------------
    kernel_a = functools.partial(point_mlp_kernel, tile_n=TN, n_valid=N,
                                 needs_mask=(N_pad != N))
    g = pl.pallas_call(
        kernel_a,
        grid=(B, n_tiles),
        in_specs=[
            pl.BlockSpec((1, TN, 3), lambda b, n: (b, n, 0)),
            pl.BlockSpec((3, 64), lambda b, n: (0, 0)),
            pl.BlockSpec((1, 64), lambda b, n: (0, 0)),
            pl.BlockSpec((64, 128), lambda b, n: (0, 0)),
            pl.BlockSpec((1, 128), lambda b, n: (0, 0)),
            pl.BlockSpec((128, 1024), lambda b, n: (0, 0)),
            pl.BlockSpec((1, 1024), lambda b, n: (0, 0)),
        ],
        out_specs=pl.BlockSpec((1, 1, 1024), lambda b, n: (b, 0, 0)),
        out_shape=jax.ShapeDtypeStruct((B, 1, 1024), jnp.float32),
        compiler_params=pltpu.CompilerParams(
            dimension_semantics=("parallel", "arbitrary"),
            vmem_limit_bytes=32 * 1024 * 1024),
    )(xt, w1, s1, w2, s2, w3, s3)
    g = g.reshape(B, 1024)

    # ---- kernel B: fc head, all batches in one matmul chain ---------------
    t9 = pl.pallas_call(
        fc_head_kernel,
        out_shape=jax.ShapeDtypeStruct((B, 9), jnp.float32),
    )(g, w4, s4, w5, s5, w6, b6)

    trans = t9.reshape(B, 3, 3)
    transT = jnp.transpose(trans, (0, 2, 1))                # tiny (B,3,3)

    # ---- kernel C: y[b] = trans[b]^T @ x[b], lane-dense stores ------------
    y = pl.pallas_call(
        bmm_kernel,
        grid=(B, n_tiles),
        in_specs=[
            pl.BlockSpec((1, 3, 3), lambda b, n: (b, 0, 0)),
            pl.BlockSpec((1, 3, TN), lambda b, n: (b, 0, n)),
        ],
        out_specs=pl.BlockSpec((1, 3, TN), lambda b, n: (b, 0, n)),
        out_shape=jax.ShapeDtypeStruct((B, 3, N_pad), jnp.float32),
        compiler_params=pltpu.CompilerParams(
            dimension_semantics=("parallel", "parallel")),
    )(transT, x_p)

    if N_pad != N:
        y = y[:, :, :N]
    return y, trans


# --------------------------------------------------------------------------
# Parameters: raw (PyTorch-like) params + folding into kernel params
# --------------------------------------------------------------------------
def init_raw_params(seed=0):
    key = jax.random.PRNGKey(seed)
    raw = {"conv": [], "fc_bn": [], "fc3": None}

    def layer(key, cin, cout):
        key, kw, kb, kg, kbe, km, kv = jax.random.split(key, 7)
        bound = 1.0 / (cin ** 0.5)
        w = jax.random.uniform(kw, (cout, cin), jnp.float32, -bound, bound)
        b = jax.random.uniform(kb, (cout,), jnp.float32, -bound, bound)
        gamma = jax.random.uniform(kg, (cout,), jnp.float32, 0.5, 1.5)
        beta = jax.random.uniform(kbe, (cout,), jnp.float32, -0.1, 0.1)
        mean = jax.random.uniform(km, (cout,), jnp.float32, -0.1, 0.1)
        var = jax.random.uniform(kv, (cout,), jnp.float32, 0.5, 1.5)
        return key, (w, b, gamma, beta, mean, var)

    for cin, cout in [(3, 64), (64, 128), (128, 1024)]:
        key, p = layer(key, cin, cout)
        raw["conv"].append(p)
    for cin, cout in [(1024, 512), (512, 256)]:
        key, p = layer(key, cin, cout)
        raw["fc_bn"].append(p)
    key, kw, kb = jax.random.split(key, 3)
    bound = 1.0 / (256 ** 0.5)
    w6 = jax.random.uniform(kw, (9, 256), jnp.float32, -bound, bound)
    b6 = jax.random.uniform(kb, (9,), jnp.float32, -bound, bound)
    raw["fc3"] = (w6, b6)
    return raw


def prepare_params(raw):
    """Fold eval-mode BN scale into weights (exact), keep only a shift;
    fold the flattened identity into the final bias; cast MXU weights to bf16."""
    def fold(w, b, gamma, beta, mean, var):
        scale = gamma * jax.lax.rsqrt(var + EPS)             # (cout,)
        w_eff = w.T * scale[None, :]                         # (cin, cout)
        shift = ((b - mean) * scale + beta)[None, :]         # (1, cout)
        return w_eff, shift

    w1, s1 = fold(*raw["conv"][0])
    w2, s2 = fold(*raw["conv"][1])
    w3, s3 = fold(*raw["conv"][2])
    w4, s4 = fold(*raw["fc_bn"][0])
    w5, s5 = fold(*raw["fc_bn"][1])
    w6_raw, b6_raw = raw["fc3"]
    iden = jnp.array([1., 0., 0., 0., 1., 0., 0., 0., 1.], jnp.float32)
    w6 = w6_raw.T                                            # (256, 9) f32
    b6 = (b6_raw + iden)[None, :]                            # (1, 9), identity folded
    return (w1, s1,
            w2.astype(jnp.bfloat16), s2,
            w3.astype(jnp.bfloat16), s3,
            w4.astype(jnp.bfloat16), s4,
            w5.astype(jnp.bfloat16), s5,
            w6, b6)


# --------------------------------------------------------------------------
# Pure-JAX f32 reference of the original PyTorch module (for sanity check)
# --------------------------------------------------------------------------
def stn3d_reference(x, raw):
    hp = jax.lax.Precision.HIGHEST
    h = x.astype(jnp.float32)                                # (B, 3, N)
    for (w, b, g_, be, mu, var) in raw["conv"]:
        h = jnp.einsum('oi,bin->bon', w, h, precision=hp) + b[None, :, None]
        h = (h - mu[None, :, None]) * (g_ * jax.lax.rsqrt(var + EPS))[None, :, None] \
            + be[None, :, None]
        h = jnp.maximum(h, 0.0)
    f = jnp.max(h, axis=2)                                   # (B, 1024)
    for li, (w, b, g_, be, mu, var) in enumerate(raw["fc_bn"]):
        f = jnp.dot(f, w.T, precision=hp) + b[None, :]
        f = (f - mu[None, :]) * (g_ * jax.lax.rsqrt(var + EPS))[None, :] + be[None, :]
        if li == 0:
            f = jnp.maximum(f, 0.0)
    w6, b6 = raw["fc3"]
    t = jnp.dot(f, w6.T, precision=hp) + b6[None, :]
    iden = jnp.array([1., 0., 0., 0., 1., 0., 0., 0., 1.], jnp.float32)
    t = t + iden[None, :]
    trans = t.reshape(-1, 3, 3)
    y = jnp.einsum('bcn,bcd->bdn', x.astype(jnp.float32), trans, precision=hp)
    return y, trans


if __name__ == "__main__":
    raw = init_raw_params(0)
    params = prepare_params(raw)

    def max_rel_err(a, b):
        return float(jnp.max(jnp.abs(a - b) / (1.0 + jnp.abs(b))))

    # Case 1: N divisible by the tile (exercises multi-tile running max).
    B, N = 2, 512
    x = jax.random.normal(jax.random.PRNGKey(0), (B, 3, N), dtype=jnp.float32)
    y, trans = stn3d_forward(x, params)
    jax.block_until_ready((y, trans))
    assert y.shape == (B, 3, N) and trans.shape == (B, 3, 3)
    y_ref, t_ref = stn3d_reference(x, raw)
    err_y, err_t = max_rel_err(y, y_ref), max_rel_err(trans, t_ref)
    assert err_y < 5e-2 and err_t < 5e-2, (err_y, err_t)

    # Case 2: ragged N (exercises zero-padding + in-kernel mask before the max).
    B2, N2 = 2, 384
    x2 = jax.random.normal(jax.random.PRNGKey(1), (B2, 3, N2), dtype=jnp.float32)
    y2, t2 = stn3d_forward(x2, params)
    jax.block_until_ready((y2, t2))
    y2_ref, t2_ref = stn3d_reference(x2, raw)
    err_y2, err_t2 = max_rel_err(y2, y2_ref), max_rel_err(t2, t2_ref)
    assert err_y2 < 5e-2 and err_t2 < 5e-2, (err_y2, err_t2)

    print("KERNEL_OK")
</pallas_src>

<mosaic_0001>
module attributes {stable_mosaic.version = 11 : i64} {
  func.func @point_mlp_kernel(%arg0: i32, %arg1: i32, %arg2: memref<1x256x3xf32, #tpu.memory_space<vmem>>, %arg3: memref<3x64xf32, #tpu.memory_space<vmem>>, %arg4: memref<1x64xf32, #tpu.memory_space<vmem>>, %arg5: memref<64x128xbf16, #tpu.memory_space<vmem>>, %arg6: memref<1x128xf32, #tpu.memory_space<vmem>>, %arg7: memref<128x1024xbf16, #tpu.memory_space<vmem>>, %arg8: memref<1x1024xf32, #tpu.memory_space<vmem>>, %arg9: memref<1x1x1024xf32, #tpu.memory_space<vmem>>) attributes {dimension_semantics = [#tpu.dimension_semantics<parallel>, #tpu.dimension_semantics<arbitrary>], iteration_bounds = array<i64: 2, 2>, scalar_prefetch = 0 : i64, scratch_operands = 0 : i64, tpu.core_type = #tpu.core_type<tc>, window_params = [{transform_indices = @transform_0, window_bounds = array<i64: 1, 256, 3>}, {pipeline_mode = #tpu.pipeline_mode<synchronous>, transform_indices = @transform_1, window_bounds = array<i64: 3, 64>}, {pipeline_mode = #tpu.pipeline_mode<synchronous>, transform_indices = @transform_2, window_bounds = array<i64: 1, 64>}, {pipeline_mode = #tpu.pipeline_mode<synchronous>, transform_indices = @transform_3, window_bounds = array<i64: 64, 128>}, {pipeline_mode = #tpu.pipeline_mode<synchronous>, transform_indices = @transform_4, window_bounds = array<i64: 1, 128>}, {pipeline_mode = #tpu.pipeline_mode<synchronous>, transform_indices = @transform_5, window_bounds = array<i64: 128, 1024>}, {pipeline_mode = #tpu.pipeline_mode<synchronous>, transform_indices = @transform_6, window_bounds = array<i64: 1, 1024>}, {transform_indices = @transform_7, window_bounds = array<i64: 1, 1, 1024>}]} {
    %c0_i32 = arith.constant 0 : i32
    %0 = arith.cmpi eq, %arg1, %c0_i32 : i32
    %1 = arith.extui %0 : i1 to i32
    %c0_i32_0 = arith.constant 0 : i32
    %2 = arith.cmpi ne, %1, %c0_i32_0 : i32
    scf.if %2 {
      %cst_26 = arith.constant 0.000000e+00 : f32
      %67 = vector.broadcast %cst_26 : f32 to vector<1x1x1024xf32>
      %c0_27 = arith.constant 0 : index
      %c0_28 = arith.constant 0 : index
      %c0_29 = arith.constant 0 : index
      %68 = vector.load %arg9[%c0_27, %c0_28, %c0_29] : memref<1x1x1024xf32, #tpu.memory_space<vmem>>, vector<1x1x1024xf32>
      tpu.vector_store %arg9[%c0_27, %c0_28, %c0_29], %67 {strides = array<i32>} : memref<1x1x1024xf32, #tpu.memory_space<vmem>>, vector<1x1x1024xf32>,
    } else {
    }
    %c0 = arith.constant 0 : index
    %c0_1 = arith.constant 0 : index
    %c0_2 = arith.constant 0 : index
    %3 = vector.load %arg2[%c0, %c0_1, %c0_2] : memref<1x256x3xf32, #tpu.memory_space<vmem>>, vector<1x256x3xf32>
    %4 = vector.shape_cast %3 : vector<1x256x3xf32> to vector<256x3xf32>
    %c0_3 = arith.constant 0 : index
    %c0_4 = arith.constant 0 : index
    %5 = vector.load %arg3[%c0_3, %c0_4] : memref<3x64xf32, #tpu.memory_space<vmem>>, vector<3x64xf32>
    %6 = vector.extract_strided_slice %4 {offsets = [0, 0], sizes = [256, 1], strides = [1, 1]} : vector<256x3xf32> to vector<256x1xf32>
    %7 = vector.extract_strided_slice %5 {offsets = [0, 0], sizes = [1, 64], strides = [1, 1]} : vector<3x64xf32> to vector<1x64xf32>
    %8 = vector.broadcast %6 : vector<256x1xf32> to vector<256x64xf32>
    %9 = vector.broadcast %7 : vector<1x64xf32> to vector<256x64xf32>
    %10 = arith.mulf %8, %9 : vector<256x64xf32>
    %11 = vector.extract_strided_slice %4 {offsets = [0, 1], sizes = [256, 1], strides = [1, 1]} : vector<256x3xf32> to vector<256x1xf32>
    %12 = vector.extract_strided_slice %5 {offsets = [1, 0], sizes = [1, 64], strides = [1, 1]} : vector<3x64xf32> to vector<1x64xf32>
    %13 = vector.broadcast %11 : vector<256x1xf32> to vector<256x64xf32>
    %14 = vector.broadcast %12 : vector<1x64xf32> to vector<256x64xf32>
    %15 = arith.mulf %13, %14 : vector<256x64xf32>
    %16 = arith.addf %10, %15 : vector<256x64xf32>
    %17 = vector.extract_strided_slice %4 {offsets = [0, 2], sizes = [256, 1], strides = [1, 1]} : vector<256x3xf32> to vector<256x1xf32>
    %18 = vector.extract_strided_slice %5 {offsets = [2, 0], sizes = [1, 64], strides = [1, 1]} : vector<3x64xf32> to vector<1x64xf32>
    %19 = vector.broadcast %17 : vector<256x1xf32> to vector<256x64xf32>
    %20 = vector.broadcast %18 : vector<1x64xf32> to vector<256x64xf32>
    %21 = arith.mulf %19, %20 : vector<256x64xf32>
    %22 = arith.addf %16, %21 : vector<256x64xf32>
    %c0_5 = arith.constant 0 : index
    %c0_6 = arith.constant 0 : index
    %23 = vector.load %arg4[%c0_5, %c0_6] : memref<1x64xf32, #tpu.memory_space<vmem>>, vector<1x64xf32>
    %24 = vector.broadcast %23 : vector<1x64xf32> to vector<256x64xf32>
    %25 = arith.addf %22, %24 : vector<256x64xf32>
    %cst = arith.constant 0.000000e+00 : f32
    %26 = vector.broadcast %cst : f32 to vector<256x64xf32>
    %27 = arith.maximumf %25, %26 : vector<256x64xf32>
    %28 = arith.truncf %27 : vector<256x64xf32> to vector<256x64xbf16>
    %c0_7 = arith.constant 0 : index
    %c0_8 = arith.constant 0 : index
    %29 = vector.load %arg5[%c0_7, %c0_8] : memref<64x128xbf16, #tpu.memory_space<vmem>>, vector<64x128xbf16>
    %cst_9 = arith.constant dense<0.000000e+00> : vector<256x128xf32>
    %30 = tpu.matmul %28, %29, %cst_9 {dimension_numbers = #tpu.dot_dimension_numbers<[1], [0], [0], [1], [0, 0, 1, 1], [], []>} : vector<256x64xbf16>, vector<64x128xbf16>, vector<256x128xf32> -> vector<256x128xf32>
    %c0_10 = arith.constant 0 : index
    %c0_11 = arith.constant 0 : index
    %31 = vector.load %arg6[%c0_10, %c0_11] : memref<1x128xf32, #tpu.memory_space<vmem>>, vector<1x128xf32>
    %32 = vector.broadcast %31 : vector<1x128xf32> to vector<256x128xf32>
    %33 = arith.addf %30, %32 : vector<256x128xf32>
    %cst_12 = arith.constant 0.000000e+00 : f32
    %34 = vector.broadcast %cst_12 : f32 to vector<256x128xf32>
    %35 = arith.maximumf %33, %34 : vector<256x128xf32>
    %36 = arith.truncf %35 : vector<256x128xf32> to vector<256x128xbf16>
    %c0_13 = arith.constant 0 : index
    %c0_14 = arith.constant 0 : index
    %37 = vector.load %arg7[%c0_13, %c0_14] : memref<128x1024xbf16, #tpu.memory_space<vmem>>, vector<128x1024xbf16>
    %cst_15 = arith.constant dense<0.000000e+00> : vector<256x1024xf32>
    %38 = tpu.matmul %36, %37, %cst_15 {dimension_numbers = #tpu.dot_dimension_numbers<[1], [0], [0], [1], [0, 0, 1, 1], [], []>} : vector<256x128xbf16>, vector<128x1024xbf16>, vector<256x1024xf32> -> vector<256x1024xf32>
    %c0_16 = arith.constant 0 : index
    %c0_17 = arith.constant 0 : index
    %39 = vector.load %arg8[%c0_16, %c0_17] : memref<1x1024xf32, #tpu.memory_space<vmem>>, vector<1x1024xf32>
    %40 = vector.broadcast %39 : vector<1x1024xf32> to vector<256x1024xf32>
    %41 = arith.addf %38, %40 : vector<256x1024xf32>
    %cst_18 = arith.constant 0.000000e+00 : f32
    %42 = vector.broadcast %cst_18 : f32 to vector<256x1024xf32>
    %43 = arith.maximumf %41, %42 : vector<256x1024xf32>
    %44 = vector.extract_strided_slice %43 {offsets = [0, 0], sizes = [128, 1024], strides = [1, 1]} : vector<256x1024xf32> to vector<128x1024xf32>
    %45 = vector.extract_strided_slice %43 {offsets = [128, 0], sizes = [128, 1024], strides = [1, 1]} : vector<256x1024xf32> to vector<128x1024xf32>
    %46 = arith.maximumf %44, %45 : vector<128x1024xf32>
    %47 = vector.extract_strided_slice %46 {offsets = [0, 0], sizes = [64, 1024], strides = [1, 1]} : vector<128x1024xf32> to vector<64x1024xf32>
    %48 = vector.extract_strided_slice %46 {offsets = [64, 0], sizes = [64, 1024], strides = [1, 1]} : vector<128x1024xf32> to vector<64x1024xf32>
    %49 = arith.maximumf %47, %48 : vector<64x1024xf32>
    %50 = vector.extract_strided_slice %49 {offsets = [0, 0], sizes = [32, 1024], strides = [1, 1]} : vector<64x1024xf32> to vector<32x1024xf32>
    %51 = vector.extract_strided_slice %49 {offsets = [32, 0], sizes = [32, 1024], strides = [1, 1]} : vector<64x1024xf32> to vector<32x1024xf32>
    %52 = arith.maximumf %50, %51 : vector<32x1024xf32>
    %53 = vector.extract_strided_slice %52 {offsets = [0, 0], sizes = [16, 1024], strides = [1, 1]} : vector<32x1024xf32> to vector<16x1024xf32>
    %54 = vector.extract_strided_slice %52 {offsets = [16, 0], sizes = [16, 1024], strides = [1, 1]} : vector<32x1024xf32> to vector<16x1024xf32>
    %55 = arith.maximumf %53, %54 : vector<16x1024xf32>
    %56 = vector.extract_strided_slice %55 {offsets = [0, 0], sizes = [8, 1024], strides = [1, 1]} : vector<16x1024xf32> to vector<8x1024xf32>
    %57 = vector.extract_strided_slice %55 {offsets = [8, 0], sizes = [8, 1024], strides = [1, 1]} : vector<16x1024xf32> to vector<8x1024xf32>
    %58 = arith.maximumf %56, %57 : vector<8x1024xf32>
    %cst_19 = arith.constant dense<0xFF800000> : vector<1024xf32>
    %59 = vector.multi_reduction <maximumf>, %58, %cst_19 [0] : vector<8x1024xf32> to vector<1024xf32>
    %60 = vector.shape_cast %59 : vector<1024xf32> to vector<1x1024xf32>
    %c0_20 = arith.constant 0 : index
    %c0_21 = arith.constant 0 : index
    %c0_22 = arith.constant 0 : index
    %61 = vector.load %arg9[%c0_20, %c0_21, %c0_22] : memref<1x1x1024xf32, #tpu.memory_space<vmem>>, vector<1x1x1024xf32>
    %62 = vector.shape_cast %61 : vector<1x1x1024xf32> to vector<1x1024xf32>
    %63 = arith.maximumf %62, %60 : vector<1x1024xf32>
    %c0_23 = arith.constant 0 : index
    %c0_24 = arith.constant 0 : index
    %c0_25 = arith.constant 0 : index
    %64 = vector.load %arg9[%c0_23, %c0_24, %c0_25] : memref<1x1x1024xf32, #tpu.memory_space<vmem>>, vector<1x1x1024xf32>
    %65 = vector.shape_cast %64 : vector<1x1x1024xf32> to vector<1x1024xf32>
    %66 = vector.shape_cast %63 : vector<1x1024xf32> to vector<1x1x1024xf32>
    tpu.vector_store %arg9[%c0_23, %c0_24, %c0_25], %66 {strides = array<i32>} : memref<1x1x1024xf32, #tpu.memory_space<vmem>>, vector<1x1x1024xf32>,
    return
  }
  func.func @transform_0(%arg0: i32, %arg1: i32) -> (i32, i32, i32) {
    %c0_i32 = arith.constant 0 : i32
    %c0_i32_0 = arith.constant 0 : i32
    return %arg0, %arg1, %c0_i32 : i32, i32, i32
  }
  func.func @transform_1(%arg0: i32, %arg1: i32) -> (i32, i32) {
    %c0_i32 = arith.constant 0 : i32
    %c0_i32_0 = arith.constant 0 : i32
    %c0_i32_1 = arith.constant 0 : i32
    return %c0_i32, %c0_i32_0 : i32, i32
  }
  func.func @transform_2(%arg0: i32, %arg1: i32) -> (i32, i32) {
    %c0_i32 = arith.constant 0 : i32
    %c0_i32_0 = arith.constant 0 : i32
    %c0_i32_1 = arith.constant 0 : i32
    return %c0_i32, %c0_i32_0 : i32, i32
  }
  func.func @transform_3(%arg0: i32, %arg1: i32) -> (i32, i32) {
    %c0_i32 = arith.constant 0 : i32
    %c0_i32_0 = arith.constant 0 : i32
    %c0_i32_1 = arith.constant 0 : i32
    return %c0_i32, %c0_i32_0 : i32, i32
  }
  func.func @transform_4(%arg0: i32, %arg1: i32) -> (i32, i32) {
    %c0_i32 = arith.constant 0 : i32
    %c0_i32_0 = arith.constant 0 : i32
    %c0_i32_1 = arith.constant 0 : i32
    return %c0_i32, %c0_i32_0 : i32, i32
  }
  func.func @transform_5(%arg0: i32, %arg1: i32) -> (i32, i32) {
    %c0_i32 = arith.constant 0 : i32
    %c0_i32_0 = arith.constant 0 : i32
    %c0_i32_1 = arith.constant 0 : i32
    return %c0_i32, %c0_i32_0 : i32, i32
  }
  func.func @transform_6(%arg0: i32, %arg1: i32) -> (i32, i32) {
    %c0_i32 = arith.constant 0 : i32
    %c0_i32_0 = arith.constant 0 : i32
    %c0_i32_1 = arith.constant 0 : i32
    return %c0_i32, %c0_i32_0 : i32, i32
  }
  func.func @transform_7(%arg0: i32, %arg1: i32) -> (i32, i32, i32) {
    %c0_i32 = arith.constant 0 : i32
    %c0_i32_0 = arith.constant 0 : i32
    %c0_i32_1 = arith.constant 0 : i32
    return %arg0, %c0_i32, %c0_i32_0 : i32, i32, i32
  }
}

</mosaic_0001>

<bundles_post_ra>
// kernel: tpu_custom_call.1
= control target key start
LH: loop header
LB: loop body
LE: loop exit
PB: predicated region body
PF: predicated region fallthrough
CT: control target
= control target key end

     0   :  { %12 = vsyncpa [#allocation3], 0  ;;  %s4901_s0 = inlined_call_operand.vmem [shape: f32[2,512,3], index: 0, kind: input, shape index: {}]   ;;  %s4902_s1 = inlined_call_operand.vmem [shape: f32[3,64], index: 1, kind: input, shape index: {}]   ;;  %s4903_s2 = inlined_call_operand.vmem [shape: f32[1,64], index: 2, kind: input, shape index: {}]   ;;  %s4904_s3 = inlined_call_operand.vmem [shape: bf16[64,128], index: 3, kind: input, shape index: {}]   ;;  %s4905_s4 = inlined_call_operand.vmem [shape: f32[1,128], index: 4, kind: input, shape index: {}]   ;;  %s4906_s5 = inlined_call_operand.vmem [shape: bf16[128,1024], index: 5, kind: input, shape index: {}]   ;;  %s4907_s6 = inlined_call_operand.vmem [shape: f32[1,1024], index: 6, kind: input, shape index: {}]   ;;  %s4908_s7 = inlined_call_operand.hbm [shape: f32[2,1,1024], index: 7, kind: output, shape index: {}]  }
   0x1   :  { %14 = vsyncpa [#allocation3 + $0x1], 0  ;;  %s3658_s24 = smov 0   ;;  %s3660_s25 = smov 0  }
   0x2   :  { %s3662_s26 = smov 0   ;;  %s3664_s27 = smov 0  }
   0x3   :  { %s3666_s28 = smov 0   ;;  %s3668_s29 = smov 0  }
   0x4   :  { %s3670_s30 = smov 0   ;;  %s3672_s8 = smov 0  }
   0x5 LB: > { %s3218_s9 = sadd.s32 4294967295, %s3610_s8   ;;  %s3219_s10 = sadd.s32 4294967294, %s3610_s8   ;;  %s3610_s8 = sphi %s3672_s8, %s20_s8   ;;  %s3606_s30 = sphi %s3670_s30, %s4920_s30   ;;  %s3602_s29 = sphi %s3668_s29, %s4919_s29   ;;  %s3598_s28 = sphi %s3666_s28, %s4918_s28   ;;  %s3594_s27 = sphi %s3664_s27, %s4917_s27   ;;  %s3590_s26 = sphi %s3662_s26, %s4916_s26   ;;  %s3586_s25 = sphi %s3660_s25, %s4915_s25   ;;  %s3582_s24 = sphi %s3658_s24, %s4914_s24  }
   0x6   : > { %s29_s11 = sadd.s32 1, %s3602_s29  ;;  %s32_s12 = sadd.s32 1, %s3606_s30 }
   0x7   : > { %p30_p0 = scmp.ge.s32.totalorder %s29_s11, 2  ;;  %p203_p1 = scmp.ne.s32.totalorder %s3590_s26, %s3586_s25 }
   0x8   : > { %p204_p2 = scmp.eq.s32.totalorder %s3218_s9, 3  ;;  %p209_p4 = scmp.ne.s32.totalorder %s3586_s25, %s3582_s24 }
   0x9   : > { %s4922_s11 = smov (%p30_p0, %s29_s11), 0  ;;  %s4924_s12 = smov (!%p30_p0, %s32_s12), %s3606_s30 }
   0xa   : > { %p3707_p3 = por %p204_p2, %p203_p1  ;;  %p34_p5 = scmp.ge.s32.totalorder %s4924_s12, 2 }
   0xb   : > { %p210_p6 = scmp.eq.s32.totalorder %s3219_s10, 3  ;;  %p3222_p7 = scmp.ge.s32.totalorder %s3610_s8, 1 }
   0xc   : > { %p259_p8 = scmp.lt.s32.totalorder %s3610_s8, 5  ;;  %s4926_s12 = smov (%p34_p5, %s4924_s12), 0 }
   0xd   : > { %4911 = sst [smem:[#allocation5_spill]] %s4926_s12  ;;  %p3717_p9 = por %p210_p6, %p209_p4 }
   0xe   : > { %p260_p10 = pnand %p3222_p7, %p259_p8  ;;  %s190_s15 = ssub.s32 %s3606_s30, %s4926_s12 }
   0xf   : > { %s193_s16 = sadd.s32 1, %s3590_s26  ;;  %p191_p11 = scmp.eq.s32.totalorder %s190_s15, 0 }
  0x10   : > { %263 = sbr.rel (%p260_p10) target bundleno = 1057 (0x421), region = 48  ;;  %s292_s18 = sand.u32 (!%p260_p10), 1, %s3586_s25  }
  0x11   : > { %s3725_s17 = scalar_select %p191_p11, %s3590_s26, %s193_s16  }
  0x12   : > { %s3224_s19 = sshll.u32 (!%p260_p10), %s3594_s27, 5  ;;  %s3223_s20 = sshll.u32 (!%p260_p10), %s292_s18, 3 }
  0x13   : > { %p296_p12 = scmp.lt.s32.totalorder (!%p260_p10), %s3598_s28, 1  ;;  %p298_p13 = scmp.lt.s32.totalorder (!%p260_p10), %s3224_s19, 63 }
  0x14   : > { %s3738_s12 = scalar_lea.vmem (!%p260_p10), [#allocation2], %s3223_s20  ;;  %p3227_p0 = scmp.ne.s32.totalorder (!%p260_p10), %s3594_s27, 0 }
  0x17   : > { %s297_s21 = scalar_select %p296_p12, %s3598_s28, 1 }
  0x18   : > { %s4928_s19 = smov (!%p298_p13, %s3224_s19), 63  ;;  %309 = sbr.rel (%p3227_p0) target bundleno = 31 (0x1f), region = 52 }
  0x19   : > { %s3225_s22 = sshll.u32 %s297_s21, 6  ;;  %v3612_v0 = vmov (!%p3227_p0), 0.0  }
  0x1a   : > { %s301_s23 = sadd.s32 %s3225_s22, %s4928_s19  ;;  %310 = vst [vmem:[%s3738_s12] sm:$0xff] (!%p3227_p0), %v3612_v0 }
  0x1b   : > { %s3226_s9 = sshll.u32 %s301_s23, 3 }
  0x1c   : > { %s3736_s16 = scalar_lea.vmem %s4901_s0, %s3226_s9 }
  0x1f PF: > { %v313_v1 = vld [vmem:[%s3736_s16 + $0x10] sm:$0xff]  ;;  %v311_v2 = vld [vmem:[%s3736_s16] sm:$0xff]  ;;  %v3613_v3 = vmov 1   ;;  %v312_v4 = vld [vmem:[%s3736_s16 + $0x8] sm:$0xff]  ;;  %v3614_v5 = vmov 2   ;;  %v3615_v8 = vmov 0   ;;  %v504_v38 = vlaneseq }
  0x20   : > { %3466 = vset.pattern.permute.xlu0 %v3613_v3  ;;  %3464 = vset.pattern.permute.xlu1 %v3613_v3  ;;  %v315_v6 = vld [vmem:[%s3736_s16 + $0x20] sm:$0xff]  ;;  %v314_v7 = vld [vmem:[%s3736_s16 + $0x18] sm:$0xff]  ;;  %v3754_v10 = vld [vmem:[%s3736_s16 + $0x48] sm:$0xff]  ;;  %vm1058_vm0 = vcmask 523264   ;;  %s3319_s9 = sshll.u32 %s3598_s28, 7  ;;  %s3142_s10 = sshll.u32 %s3738_s12, 4  ;;  %s4847_s10 = int_to_ptr.vmem [resolvable:$true] %s3142_s10 }
  0x21   : > { %549 = vperm.xlu0 %3466, %v313_v1   ;;  %541 = vperm.xlu1 %3464, %v311_v2   ;;  %v318_v9 = vld [vmem:[%s3736_s16 + $0x38] sm:$0xff]  ;;  %v3511_v11 = vld [vmem:[%s4904_s3] sm:$0xff]   ;;  %v3512_v12 = vld [vmem:[%s4904_s3 + $0x8] sm:$0xff]   ;;  %v3849_v42 = vshrl.u32 %v504_v38, 7  ;;  %s4845_s19 = scalar_lea.hbm %s4908_s7, %s3319_s9  ;;  %s3128_s20 = scalar_lea.sflag [#allocation3], %s292_s18 }
  0x22   : > { %3340 = vmatprep.subr.bf16.mxu0 %v3511_v11  ;;  %3380 = vmatprep.subr.bf16.mxu1 %v3511_v11  ;;  %v316_v13 = vld [vmem:[%s3736_s16 + $0x28] sm:$0xff]  ;;  %v3513_v14 = vld [vmem:[%s4904_s3 + $0x10] sm:$0xff]   ;;  %v3514_v15 = vld [vmem:[%s4904_s3 + $0x18] sm:$0xff]   ;;  %s3617_s28 = smov [#allocation2]  }
  0x23   : > { %3341 = vmatpush3.bf16.msra.mxu0 %v3511_v11  ;;  %3384 = vmatpush3.bf16.msra.mxu1 %v3511_v11  ;;  %v321_v16 = vld [vmem:[%s3736_s16 + $0x50] sm:$0xff]  ;;  %v323_v18 = vld [vmem:[%s3736_s16 + $0x60] sm:$0xff]  ;;  %v3780_v19 = vld [vmem:[%s3736_s16 + $0x88] sm:$0xff]  ;;  %v670_v46 = vsub.s32 1, %v3849_v42  ;;  %v866_v48 = vsub.s32 2, %v3849_v42  ;;  %v506_v49 = vsub.s32 0, %v3849_v42 }
  0x24   : > { %3342 = vmatprep.subr.bf16.mxu0 %v3512_v12  ;;  %3381 = vmatprep.subr.bf16.mxu1 %v3512_v12  ;;  %v317_v17 = vld [vmem:[%s3736_s16 + $0x30] sm:$0xff]  ;;  %v319_v21 = vld [vmem:[%s3736_s16 + $0x40] sm:$0xff]  ;;  %v324_v22 = vld [vmem:[%s3736_s16 + $0x68] sm:$0xff]  ;;  %s3520_s21 = sshll.u32 %s3617_s28, 4  ;;  %s3521_s21 = int_to_ptr.vmem [resolvable:$false] %s3520_s21 }
  0x25   : > { %3469 = vset.pattern.permute.xlu0 %v3614_v5  ;;  %545 = vperm.xlu1 %3464, %v312_v4   ;;  %v3785_v20 = vld [vmem:[%s3736_s16 + $0x90] sm:$0xff]  ;;  %v322_v24 = vld [vmem:[%s3736_s16 + $0x58] sm:$0xff]  ;;  %v3800_v25 = vld [vmem:[%s3736_s16 + $0xa8] sm:$0xff]  ;;  %s3522_s22 = scalar_lea.vmem %s3521_s21, 256  ;;  %p3523_p5 = scmp.lt.s32.totalorder %s4847_s10, %s3521_s21 }
  0x26   : > { %741 = vperm.xlu0 %3469, %v312_v4   ;;  %v325_v23 = vld [vmem:[%s3736_s16 + $0x70] sm:$0xff]  ;;  %v326_v27 = vld [vmem:[%s3736_s16 + $0x78] sm:$0xff]  ;;  %v3814_v28 = vld [vmem:[%s3736_s16 + $0xa0] sm:$0xff] }
  0x27   : > { %3343 = vmatpush3.bf16.msra.mxu0 %v3512_v12  ;;  %3385 = vmatpush3.bf16.msra.mxu1 %v3512_v12  ;;  %v3805_v26 = vld [vmem:[%s3736_s16 + $0xb0] sm:$0xff]  ;;  %v3818_v29 = vld [vmem:[%s3736_s16 + $0xb8] sm:$0xff]  ;;  %v3823_v30 = vld [vmem:[%s3736_s16 + $0xc8] sm:$0xff] }
  0x28   : > { %3344 = vmatprep.subr.bf16.mxu0 %v3513_v14  ;;  %3382 = vmatprep.subr.bf16.mxu1 %v3513_v14  ;;  %v3832_v31 = vld [vmem:[%s3736_s16 + $0xd0] sm:$0xff]  ;;  %v3837_v32 = vld [vmem:[%s3736_s16 + $0xe0] sm:$0xff]  ;;  %v3845_v39 = vld [vmem:[%s3736_s16 + $0xe8] sm:$0xff] }
  0x29   : > { %3465 = vset.pattern.permute.xlu1 %v3615_v8  ;;  %v327_v37 = vld [vmem:[%s3736_s16 + $0x80] sm:$0xff]  ;;  %v3854_v43 = vld [vmem:[%s3736_s16 + $0xf0] sm:$0xff]  ;;  %v330_v53 = vld [vmem:[%s3736_s16 + $0x98] sm:$0xff] }
  0x2a   : > { %753 = vperm.xlu0 %3469, %v315_v6   ;;  %361 = vperm.xlu1 %3465, %v314_v7   ;;  %v343_v47 = vld [vmem:[%s4902_s1] sm:$0x7]  ;;  %v3887_v60 = vld [vmem:[%s3736_s16 + $0xf8] sm:$0xff] }
  0x2b   : > { %3345 = vmatpush3.bf16.msra.mxu0 %v3513_v14  ;;  %3386 = vmatpush3.bf16.msra.mxu1 %v3513_v14  ;;  %v3870_v51 = vrot.slane %v343_v47, %v670_v46  ;;  %v3877_v54 = vrot.slane %v343_v47, %v866_v48  ;;  %v3881_v55 = vrot.slane %v343_v47, %v506_v49 }
  0x2c   : > { %3346 = vmatprep.subr.bf16.mxu0 %v3514_v15  ;;  %3383 = vmatprep.subr.bf16.mxu1 %v3514_v15 }
  0x2e   : > { %765 = vperm.xlu0 %3469, %v318_v9   ;;  %3467 = vset.pattern.permute.xlu1 %v3613_v3 }
  0x2f   : > { %553 = vperm.xlu1 %3467, %v314_v7   ;;  %3347 = vmatpush3.bf16.msra.mxu0 %v3514_v15 }
  0x30   : > { %3387 = vmatpush3.bf16.msra.mxu1 %v3514_v15 }
  0x32   : > { %773 = vperm.xlu0 %3469, %v3754_v10  }
  0x33   : > { %3468 = vset.pattern.permute.xlu1 %v3614_v5 }
  0x34   : > { %737 = vperm.xlu1 %3468, %v311_v2  }
  0x36   : > { %3480 = vset.pattern.permute.xlu0 %v3615_v8 }
  0x37   : > { %346 = vperm.xlu0 %3480, %v311_v2  }
  0x38   : > { %745 = vperm.xlu1 %3468, %v313_v1  }
  0x3b   : > { %351 = vperm.xlu0 %3480, %v312_v4  }
  0x3c   : > { %749 = vperm.xlu1 %3468, %v314_v7  }
  0x3f   : > { %356 = vperm.xlu0 %3480, %v313_v1  }
  0x40   : > { %3470 = vset.pattern.permute.xlu1 %v3615_v8 }
  0x41   : > { %371 = vperm.xlu1 %3470, %v316_v13  }
  0x43   : > { %366 = vperm.xlu0 %3480, %v315_v6  }
  0x45   : > { %3471 = vset.pattern.permute.xlu1 %v3613_v3 }
  0x46   : > { %557 = vperm.xlu1 %3471, %v315_v6  }
  0x47   : > { %391 = vperm.xlu0 %3480, %v3754_v10  }
  0x4a   : > { %3472 = vset.pattern.permute.xlu1 %v3615_v8 }
  0x4b   : > { %396 = vperm.xlu0 %3480, %v321_v16   ;;  %376 = vperm.xlu1 %3472, %v317_v17  }
  0x4f   : > { %406 = vperm.xlu0 %3480, %v323_v18   ;;  %381 = vperm.xlu1 %3472, %v318_v9  }
  0x53   : > { %431 = vperm.xlu0 %3480, %v3780_v19   ;;  %3473 = vset.pattern.permute.xlu1 %v3613_v3 }
  0x54   : > { %569 = vperm.xlu1 %3473, %v318_v9  }
  0x57   : > { %436 = vperm.xlu0 %3480, %v3785_v20  }
  0x58   : > { %3474 = vset.pattern.permute.xlu1 %v3614_v5 }
  0x59   : > { %757 = vperm.xlu1 %3474, %v316_v13  }
  0x5b   : > { %3488 = vset.pattern.permute.xlu0 %v3613_v3 }
  0x5c   : > { %561 = vperm.xlu0 %3488, %v316_v13  }
  0x5d   : > { %761 = vperm.xlu1 %3474, %v317_v17  }
  0x60   : > { %565 = vperm.xlu0 %3488, %v317_v17  }
  0x61   : > { %3475 = vset.pattern.permute.xlu1 %v3615_v8 }
  0x62   : > { %386 = vperm.xlu1 %3475, %v319_v21  }
  0x64   : > { %581 = vperm.xlu0 %3488, %v321_v16  }
  0x66   : > { %3476 = vset.pattern.permute.xlu1 %v3613_v3 }
  0x67   : > { %573 = vperm.xlu1 %3476, %v319_v21  }
  0x68   : > { %593 = vperm.xlu0 %3488, %v324_v22  }
  0x6b   : > { %577 = vperm.xlu1 %3476, %v3754_v10   ;;  %v3900_v10 = vld [vmem:[%s4903_s2] ss:$0 sm:$0xff] }
  0x6c   : > { %597 = vperm.xlu0 %3488, %v325_v23  }
  0x6f   : > { %3477 = vset.pattern.permute.xlu1 %v3615_v8 }
  0x70   : > { %401 = vperm.xlu1 %3477, %v322_v24   ;;  %613 = vperm.xlu0 %3488, %v3785_v20  }
  0x74   : > { %3478 = vset.pattern.permute.xlu1 %v3613_v3  ;;  %625 = vperm.xlu0 %3488, %v3800_v25  }
  0x75   : > { %585 = vperm.xlu1 %3478, %v322_v24  }
  0x78   : > { %629 = vperm.xlu0 %3488, %v3805_v26  }
  0x79   : > { %3479 = vset.pattern.permute.xlu1 %v3614_v5 }
  0x7a   : > { %769 = vperm.xlu1 %3479, %v319_v21  }
  0x7c   : > { %3495 = vset.pattern.permute.xlu0 %v3614_v5 }
  0x7d   : > { %785 = vperm.xlu0 %3495, %v323_v18  }
  0x7e   : > { %777 = vperm.xlu1 %3479, %v321_v16  }
  0x81   : > { %797 = vperm.xlu0 %3495, %v326_v27  }
  0x82   : > { %781 = vperm.xlu1 %3479, %v322_v24  }
  0x85   : > { %805 = vperm.xlu0 %3495, %v3780_v19  }
  0x86   : > { %3481 = vset.pattern.permute.xlu1 %v3615_v8 }
  0x87   : > { %411 = vperm.xlu1 %3481, %v324_v22  }
  0x89   : > { %817 = vperm.xlu0 %3495, %v3814_v28  }
  0x8b   : > { %3482 = vset.pattern.permute.xlu1 %v3613_v3 }
  0x8c   : > { %589 = vperm.xlu1 %3482, %v323_v18  }
  0x8d   : > { %829 = vperm.xlu0 %3495, %v3818_v29  }
  0x90   : > { %3483 = vset.pattern.permute.xlu1 %v3615_v8 }
  0x91   : > { %416 = vperm.xlu1 %3483, %v325_v23   ;;  %837 = vperm.xlu0 %3495, %v3823_v30  }
  0x95   : > { %421 = vperm.xlu1 %3483, %v326_v27   ;;  %3503 = vset.pattern.permute.xlu0 %v3615_v8 }
  0x96   : > { %446 = vperm.xlu0 %3503, %v3814_v28  }
  0x99   : > { %3484 = vset.pattern.permute.xlu1 %v3613_v3 }
  0x9a   : > { %601 = vperm.xlu1 %3484, %v326_v27   ;;  %471 = vperm.xlu0 %3503, %v3823_v30  }
  0x9e   : > { %3485 = vset.pattern.permute.xlu1 %v3614_v5  ;;  %476 = vperm.xlu0 %3503, %v3832_v31  }
  0x9f   : > { %789 = vperm.xlu1 %3485, %v324_v22  }
  0xa0   : > { %v542_v33 = vpop.permute.xlu1 %541  ;;  %v550_v34 = vpop.permute.xlu0 %549 }
  0xa1   : > { %v672_v57 = vmul.f32 %v3870_v51, %v542_v33  ;;  %v674_v12 = vmul.f32 %v3870_v51, %v550_v34 }
  0xa2   : > { %486 = vperm.xlu0 %3503, %v3837_v32  }
  0xa3   : > { %793 = vperm.xlu1 %3485, %v325_v23  }
  0xa4   : > { %v546_v35 = vpop.permute.xlu1 %545 }
  0xa5   : > { %v742_v36 = vpop.permute.xlu0 %741  ;;  %v673_v0 = vmul.f32 %v3870_v51, %v546_v35 }
  0xa6   : > { %3504 = vset.pattern.permute.xlu0 %v3613_v3  ;;  %v869_v2 = vmul.f32 %v3877_v54, %v742_v36 }
  0xa7   : > { %3486 = vset.pattern.permute.xlu1 %v3615_v8  ;;  %645 = vperm.xlu0 %3504, %v3832_v31  }
  0xa8   : > { %426 = vperm.xlu1 %3486, %v327_v37  }
  0xa9   : > { %v362_v40 = vpop.permute.xlu1 %361  ;;  %v3847_v41 = vpop.permute.xlu0 %753 }
  0xaa   : > { %v511_v4 = vmul.f32 %v3881_v55, %v362_v40 }
  0xab   : > { %657 = vperm.xlu0 %3504, %v3845_v39  }
  0xac   : > { %3487 = vset.pattern.permute.xlu1 %v3613_v3 }
  0xad   : > { %605 = vperm.xlu1 %3487, %v327_v37   ;;  %v3856_v44 = vpop.permute.xlu0 %765 }
  0xae   : > { %v554_v45 = vpop.permute.xlu1 %553 }
  0xaf   : > { %661 = vperm.xlu0 %3504, %v3854_v43   ;;  %v675_v61 = vmul.f32 %v3870_v51, %v554_v45 }
  0xb1   : > { %609 = vperm.xlu1 %3487, %v3780_v19   ;;  %v3866_v50 = vpop.permute.xlu0 %773  ;;  %v707_v13 = vadd.f32 %v675_v61, %v511_v4 }
  0xb3   : > { %v738_v52 = vpop.permute.xlu1 %737  ;;  %3509 = vset.pattern.permute.xlu0 %v3614_v5 }
  0xb4   : > { %849 = vperm.xlu0 %3509, %v3837_v32   ;;  %v868_v62 = vmul.f32 %v3877_v54, %v738_v52 }
  0xb5   : > { %3489 = vset.pattern.permute.xlu1 %v3615_v8 }
  0xb6   : > { %v347_v56 = vpop.permute.xlu0 %346  ;;  %441 = vperm.xlu1 %3489, %v330_v53  }
  0xb7   : > { %v508_v58 = vmul.f32 %v3881_v55, %v347_v56  ;;  %v746_v59 = vpop.permute.xlu1 %745 }
  0xb8   : > { %861 = vperm.xlu0 %3509, %v3887_v60   ;;  %v870_v22 = vmul.f32 %v3877_v54, %v746_v59 }
  0xb9   : > { %v704_v63 = vadd.f32 %v672_v57, %v508_v58 }
  0xba   : > { %v352_v1 = vpop.permute.xlu0 %351  ;;  %3490 = vset.pattern.permute.xlu1 %v3613_v3 }
  0xbb   : > { %v900_v6 = vadd.f32 %v868_v62, %v704_v63  ;;  %v509_v7 = vmul.f32 %v3881_v55, %v352_v1  ;;  %617 = vperm.xlu1 %3490, %v330_v53   ;;  %v750_v9 = vpop.permute.xlu1 %749  ;;  %v872_v1 = vmul.f32 %v3877_v54, %v3847_v41 }
  0xbc   : > { %v871_v11 = vmul.f32 %v3877_v54, %v750_v9 }
  0xbd   : > { %v705_v14 = vadd.f32 %v673_v0, %v509_v7  ;;  %v939_v19 = vadd.f32 %v3900_v10, %v900_v6  ;;  %v875_v7 = vmul.f32 %v3877_v54, %v3856_v44 }
  0xbe   : > { %v357_v15 = vpop.permute.xlu0 %356  ;;  %v903_v17 = vadd.f32 %v871_v11, %v707_v13 }
  0xbf   : > { %v901_v16 = vadd.f32 %v869_v2, %v705_v14  ;;  %v510_v18 = vmul.f32 %v3881_v55, %v357_v15  ;;  %3491 = vset.pattern.permute.xlu1 %v3614_v5  ;;  %v971_v35 = vmax.f32 %v939_v19, 0.0 }
  0xc0   : > { %801 = vperm.xlu1 %3491, %v327_v37   ;;  %v372_v21 = vpop.permute.xlu1 %371  ;;  %v942_v33 = vadd.f32 %v3900_v10, %v903_v17 }
  0xc1   : > { %v706_v23 = vadd.f32 %v674_v12, %v510_v18  ;;  %v940_v24 = vadd.f32 %v3900_v10, %v901_v16  ;;  %v513_v11 = vmul.f32 %v3881_v55, %v372_v21 }
  0xc2   : > { %v367_v27 = vpop.permute.xlu0 %366  ;;  %v974_v47 = vmax.f32 %v942_v33, 0.0 }
  0xc3   : > { %v902_v34 = vadd.f32 %v870_v22, %v706_v23  ;;  %v972_v36 = vmax.f32 %v940_v24, 0.0  ;;  %v512_v62 = vmul.f32 %v3881_v55, %v367_v27 }
  0xc4   : > { %809 = vperm.xlu1 %3491, %v3785_v20  }
  0xc5   : > { %v941_v38 = vadd.f32 %v3900_v10, %v902_v34  ;;  %v558_v40 = vpop.permute.xlu1 %557  ;;  %v1003_v45 = vpack.c.bf16 %v972_v36, %v971_v35 }
  0xc6   : > { %v3912_v37 = vpop.permute.xlu0 %391  ;;  %v676_v63 = vmul.f32 %v3870_v51, %v558_v40 }
  0xc7   : > { %v973_v52 = vmax.f32 %v941_v38, 0.0  ;;  %3348 = vmatprep.mubr.msk.bf16.mxu0 %vm1058_vm0, %v1003_v45 }
  0xc8   : > { %813 = vperm.xlu1 %3491, %v330_v53   ;;  %v708_v2 = vadd.f32 %v676_v63, %v512_v62 }
  0xc9   : > { %v1004_v56 = vpack.c.bf16 %v974_v47, %v973_v52 }
  0xca   : > { %v377_v57 = vpop.permute.xlu1 %376  ;;  %v3915_v58 = vpop.permute.xlu0 %396  ;;  %v904_v12 = vadd.f32 %v872_v1, %v708_v2 }
  0xcb   : > { %3349 = vmatmul.mubr.msk.bf16.vlgmr.msra.gmra.mrb[0].mxu0 %vm1058_vm0, %v1004_v56  ;;  %v514_v17 = vmul.f32 %v3881_v55, %v377_v57 }
  0xcc   : > { %3492 = vset.pattern.permute.xlu1 %v3615_v8  ;;  %v943_v44 = vadd.f32 %v3900_v10, %v904_v12  ;;  %v338_v12 = vld [vmem:[%s3736_s16 + $0xd8] sm:$0xff] }
  0xcd   : > { %451 = vperm.xlu1 %3492, %v3800_v25  }
  0xce   : > { %v382_v20 = vpop.permute.xlu1 %381  ;;  %v3920_v59 = vpop.permute.xlu0 %406  ;;  %v975_v34 = vmax.f32 %v943_v44, 0.0 }
  0xcf   : > { %v515_v6 = vmul.f32 %v3881_v55, %v382_v20  ;;  %v335_v20 = vld [vmem:[%s3736_s16 + $0xc0] sm:$0xff]  ;;  %s3516_s16 = scalar_lea.vmem %s4847_s10, 128 }
  0xd0   : > { %p3517_p1 = scmp.ne.s32.totalorder %s4847_s10, %s3516_s16  ;;  %p3524_p6 = scmp.lt.s32.totalorder %s3522_s22, %s3516_s16 }
  0xd1   : > { %3493 = vset.pattern.permute.xlu1 %v3613_v3 }
  0xd2   : > { %621 = vperm.xlu1 %3493, %v3814_v28   ;;  %v3924_v61 = vpop.permute.xlu0 %431  ;;  %p3518_p2 = pnand %p3517_p1, %p3707_p3  ;;  %p3525_p7 = por %p3524_p6, %p3523_p5 }
  0xd3   : > { %v570_v53 = vpop.permute.xlu1 %569 }
  0xd4   : > { %v679_v4 = vmul.f32 %v3870_v51, %v570_v53  ;;  %p3519_p4 = pneg %p3518_p2 }
  0xd6   : > { %3494 = vset.pattern.permute.xlu1 %v3615_v8  ;;  %v3929_v0 = vpop.permute.xlu0 %436  ;;  %v711_v13 = vadd.f32 %v679_v4, %v515_v6  ;;  %p3526_p8 = pnand %p3525_p7, %p3519_p4 }
  0xd7   : > { %456 = vperm.xlu1 %3494, %v3805_v26  }
  0xd8   : > { %v758_v28 = vpop.permute.xlu1 %757  ;;  %v907_v19 = vadd.f32 %v875_v7, %v711_v13 }
  0xd9   : > { %v873_v41 = vmul.f32 %v3877_v54, %v758_v28  ;;  %v518_v28 = vmul.f32 %v3881_v55, %v3915_v58 }
  0xda   : > { %v946_v35 = vadd.f32 %v3900_v10, %v907_v19 }
  0xdb   : > { %v562_v9 = vpop.permute.xlu0 %561  ;;  %461 = vperm.xlu1 %3494, %v3818_v29  }
  0xdc   : > { %v677_v14 = vmul.f32 %v3870_v51, %v562_v9  ;;  %v762_v15 = vpop.permute.xlu1 %761  ;;  %v978_v47 = vmax.f32 %v946_v35, 0.0 }
  0xdd   : > { %v874_v27 = vmul.f32 %v3877_v54, %v762_v15 }
  0xde   : > { %v709_v16 = vadd.f32 %v677_v14, %v513_v11 }
  0xdf   : > { %v566_v18 = vpop.permute.xlu0 %565  ;;  %3496 = vset.pattern.permute.xlu1 %v3613_v3 }
  0xe0   : > { %v905_v22 = vadd.f32 %v873_v41, %v709_v16  ;;  %v678_v23 = vmul.f32 %v3870_v51, %v566_v18  ;;  %633 = vperm.xlu1 %3496, %v3818_v29  }
  0xe1   : > { %v387_v21 = vpop.permute.xlu1 %386 }
  0xe2   : > { %v944_v24 = vadd.f32 %v3900_v10, %v905_v22  ;;  %v710_v33 = vadd.f32 %v678_v23, %v514_v17 }
  0xe3   : > { %v582_v63 = vpop.permute.xlu0 %581 }
  0xe4   : > { %v976_v36 = vmax.f32 %v944_v24, 0.0  ;;  %v906_v38 = vadd.f32 %v874_v27, %v710_v33  ;;  %3497 = vset.pattern.permute.xlu1 %v3614_v5  ;;  %v682_v7 = vmul.f32 %v3870_v51, %v582_v63 }
  0xe5   : > { %821 = vperm.xlu1 %3497, %v3800_v25   ;;  %v517_v25 = vmul.f32 %v3881_v55, %v3912_v37  ;;  %v516_v37 = vmul.f32 %v3881_v55, %v387_v21 }
  0xe6   : > { %v945_v40 = vadd.f32 %v3900_v10, %v906_v38  ;;  %v574_v45 = vpop.permute.xlu1 %573  ;;  %v1005_v29 = vpack.c.bf16 %v976_v36, %v975_v34  ;;  %v1317_v38 = vld [vmem:[%s4906_s5 + $0x8] sm:$0xff] }
  0xe7   : > { %v680_v4 = vmul.f32 %v3870_v51, %v574_v45  ;;  %v3970_v9 = vpop.permute.xlu0 %593 }
  0xe8   : > { %v977_v52 = vmax.f32 %v945_v40, 0.0  ;;  %3352 = vmatprep.mubr.msk.bf16.mxu0 %vm1058_vm0, %v1005_v29  ;;  %v1321_v40 = vld [vmem:[%s4906_s5 + $0x28] sm:$0xff] }
  0xe9   : > { %825 = vperm.xlu1 %3497, %v3805_v26   ;;  %v877_v26 = vmul.f32 %v3877_v54, %v3866_v50  ;;  %v712_v13 = vadd.f32 %v680_v4, %v516_v37  ;;  %v1337_v4 = vld [vmem:[%s4906_s5 + $0xa8] sm:$0xff] }
  0xea   : > { %v578_v56 = vpop.permute.xlu1 %577  ;;  %v1006_v57 = vpack.c.bf16 %v978_v47, %v977_v52  ;;  %v3253_v47 = vcombine.high %v1317_v38, %v1321_v40  ;;  %v3252_v52 = vcombine.low %v1317_v38, %v1321_v40 }
  0xeb   : > { %v681_v62 = vmul.f32 %v3870_v51, %v578_v56  ;;  %v3978_v17 = vpop.permute.xlu0 %597 }
  0xec   : > { %3353 = vmatmul.mubr.msk.bf16.gmra.mrb[4].mxu0 %vm1058_vm0, %v1006_v57  ;;  %1935 = vmatprep.subr.bf16.mxu0 %v3253_v47  ;;  %v686_v47 = vmul.f32 %v3870_v51, %v3978_v17 }
  0xed   : > { %3498 = vset.pattern.permute.xlu1 %v3615_v8  ;;  %v713_v1 = vadd.f32 %v681_v62, %v517_v25  ;;  %1936 = vmatpush1.bf16.msra.mxu0 %v3252_v52  ;;  %v1329_v25 = vld [vmem:[%s4906_s5 + $0x68] sm:$0xff] }
  0xee   : > { %466 = vperm.xlu1 %3498, %v335_v20  }
  0xef   : > { %v402_v53 = vpop.permute.xlu1 %401  ;;  %v909_v6 = vadd.f32 %v877_v26, %v713_v1  ;;  %v3985_v35 = vpop.permute.xlu0 %613 }
  0xf0   : > { %v519_v19 = vmul.f32 %v3881_v55, %v402_v53  ;;  %v1325_v53 = vld [vmem:[%s4906_s5 + $0x48] sm:$0xff] }
  0xf1   : > { %v948_v14 = vadd.f32 %v3900_v10, %v909_v6  ;;  %v3260_v1 = vcombine.low %v1325_v53, %v1329_v25 }
  0xf2   : > { %3499 = vset.pattern.permute.xlu1 %v3613_v3 }
  0xf3   : > { %637 = vperm.xlu1 %3499, %v335_v20   ;;  %v980_v44 = vmax.f32 %v948_v14, 0.0  ;;  %v4002_v63 = vpop.permute.xlu0 %625  ;;  %v520_v14 = vmul.f32 %v3881_v55, %v3920_v59 }
  0xf4   : > { %v586_v2 = vpop.permute.xlu1 %585 }
  0xf5   : > { %v683_v41 = vmul.f32 %v3870_v51, %v586_v2  ;;  %v1333_v2 = vld [vmem:[%s4906_s5 + $0x88] sm:$0xff] }
  0xf6   : > { %v3268_v37 = vcombine.low %v1333_v2, %v1337_v4 }
  0xf7   : > { %641 = vperm.xlu1 %3499, %v3823_v30   ;;  %v714_v30 = vadd.f32 %v682_v7, %v518_v28  ;;  %v715_v24 = vadd.f32 %v683_v41, %v519_v19  ;;  %v3269_v28 = vcombine.high %v1333_v2, %v1337_v4  ;;  %v4012_v6 = vpop.permute.xlu0 %629  ;;  %v1341_v7 = vld [vmem:[%s4906_s5 + $0xc8] sm:$0xff] }
  0xf9   : > { %v770_v11 = vpop.permute.xlu1 %769 }
  0xfa   : > { %v876_v50 = vmul.f32 %v3877_v54, %v770_v11  ;;  %v1345_v11 = vld [vmem:[%s4906_s5 + $0xe8] sm:$0xff] }
  0xfb   : > { %3500 = vset.pattern.permute.xlu1 %v3615_v8 }
  0xfc   : > { %v908_v15 = vadd.f32 %v876_v50, %v712_v13  ;;  %481 = vperm.xlu1 %3500, %v338_v12   ;;  %v3277_v13 = vcombine.high %v1341_v7, %v1345_v11  ;;  %v786_v41 = vpop.permute.xlu0 %785 }
  0xfd   : > { %v778_v58 = vpop.permute.xlu1 %777 }
  0xfe   : > { %v947_v16 = vadd.f32 %v3900_v10, %v908_v15  ;;  %v878_v18 = vmul.f32 %v3877_v54, %v778_v58  ;;  %v1349_v15 = vld [vmem:[%s4906_s5 + $0x108] sm:$0xff] }
  0xff   : > { %v1353_v58 = vld [vmem:[%s4906_s5 + $0x128] sm:$0xff] }
 0x100   : > { %v979_v22 = vmax.f32 %v947_v16, 0.0  ;;  %v910_v23 = vadd.f32 %v878_v18, %v714_v30  ;;  %3501 = vset.pattern.permute.xlu1 %v3613_v3  ;;  %v3285_v16 = vcombine.high %v1349_v15, %v1353_v58  ;;  %v3284_v18 = vcombine.low %v1349_v15, %v1353_v58 }
 0x101   : > { %649 = vperm.xlu1 %3501, %v338_v12   ;;  %v782_v21 = vpop.permute.xlu1 %781 }
 0x102   : > { %v1007_v27 = vpack.c.bf16 %v980_v44, %v979_v22  ;;  %v879_v33 = vmul.f32 %v3877_v54, %v782_v21  ;;  %v949_v34 = vadd.f32 %v3900_v10, %v910_v23  ;;  %v880_v44 = vmul.f32 %v3877_v54, %v786_v41  ;;  %v1357_v22 = vld [vmem:[%s4906_s5 + $0x148] sm:$0xff] }
 0x103   : > { %v1361_v23 = vld [vmem:[%s4906_s5 + $0x168] sm:$0xff]  ;;  %v685_v21 = vmul.f32 %v3870_v51, %v3970_v9 }
 0x104   : > { %v911_v36 = vadd.f32 %v879_v33, %v715_v24  ;;  %3356 = vmatprep.mubr.msk.bf16.mxu0 %vm1058_vm0, %v1007_v27  ;;  %v981_v56 = vmax.f32 %v949_v34, 0.0  ;;  %v798_v27 = vpop.permute.xlu0 %797  ;;  %v3293_v33 = vcombine.high %v1357_v22, %v1361_v23  ;;  %v1365_v9 = vld [vmem:[%s4906_s5 + $0x188] sm:$0xff] }
 0x105   : > { %3502 = vset.pattern.permute.xlu1 %v3614_v5 }
 0x106   : > { %v950_v45 = vadd.f32 %v3900_v10, %v911_v36  ;;  %833 = vperm.xlu1 %3502, %v335_v20   ;;  %v412_v29 = vpop.permute.xlu1 %411  ;;  %v3261_v20 = vcombine.high %v1325_v53, %v1329_v25  ;;  %v3292_v36 = vcombine.low %v1357_v22, %v1361_v23  ;;  %v4059_v53 = vld [vmem:[%s4906_s5] sm:$0xff] }
 0x107   : > { %v521_v24 = vmul.f32 %v3881_v55, %v412_v29  ;;  %v1369_v29 = vld [vmem:[%s4906_s5 + $0x1a8] sm:$0xff]  ;;  %v4064_v25 = vld [vmem:[%s4906_s5 + $0x20] sm:$0xff] }
 0x108   : > { %v982_v57 = vmax.f32 %v950_v45, 0.0  ;;  %1937 = vmatprep.subr.bf16.mxu0 %v3261_v20  ;;  %v883_v45 = vmul.f32 %v3877_v54, %v798_v27  ;;  %v3251_v17 = vcombine.high %v4059_v53, %v4064_v25 }
 0x109   : > { %1938 = vmatpush1.bf16.msra.mxu0 %v3260_v1  ;;  %v717_v52 = vadd.f32 %v685_v21, %v521_v24  ;;  %v806_v21 = vpop.permute.xlu0 %805  ;;  %v525_v24 = vmul.f32 %v3881_v55, %v3924_v61 }
 0x10a   : > { %v1008_v62 = vpack.c.bf16 %v982_v57, %v981_v56  ;;  %841 = vperm.xlu1 %3502, %v3832_v31   ;;  %1939 = vmatprep.subr.bf16.mxu0 %v3269_v28  ;;  %v3301_v57 = vcombine.high %v1365_v9, %v1369_v29  ;;  %v1373_v28 = vld [vmem:[%s4906_s5 + $0x1c8] sm:$0xff] }
 0x10b   : > { %v590_v26 = vpop.permute.xlu1 %589  ;;  %1742 = vmatprep.subr.bf16.mxu1 %v3251_v17 }
 0x10c   : > { %3357 = vmatmul.mubr.msk.bf16.gmra.mrb[8].mxu0 %vm1058_vm0, %v1008_v62  ;;  %v684_v30 = vmul.f32 %v3870_v51, %v590_v26  ;;  %v3300_v26 = vcombine.low %v1365_v9, %v1369_v29 }
 0x10d   : > { %1940 = vmatpush1.bf16.msra.mxu0 %v3268_v37  ;;  %v1377_v37 = vld [vmem:[%s4906_s5 + $0x1e8] sm:$0xff] }
 0x10e   : > { %845 = vperm.xlu1 %3502, %v338_v12   ;;  %v3276_v12 = vcombine.low %v1341_v7, %v1345_v11  ;;  %1941 = vmatprep.subr.bf16.mxu0 %v3277_v13  ;;  %v716_v59 = vadd.f32 %v684_v30, %v520_v14  ;;  %v3309_v7 = vcombine.high %v1373_v28, %v1377_v37 }
 0x110   : > { %v417_v31 = vpop.permute.xlu1 %416  ;;  %v912_v38 = vadd.f32 %v880_v44, %v716_v59 }
 0x111   : > { %1942 = vmatpush1.bf16.msra.mxu0 %v3276_v12  ;;  %v522_v62 = vmul.f32 %v3881_v55, %v417_v31 }
 0x112   : > { %3505 = vset.pattern.permute.xlu1 %v3615_v8  ;;  %1943 = vmatprep.subr.bf16.mxu0 %v3285_v16  ;;  %v951_v1 = vadd.f32 %v3900_v10, %v912_v38  ;;  %v690_v38 = vmul.f32 %v3870_v51, %v3985_v35 }
 0x113   : > { %491 = vperm.xlu1 %3505, %v3845_v39   ;;  %v718_v11 = vadd.f32 %v686_v47, %v522_v62 }
 0x114   : > { %v422_v50 = vpop.permute.xlu1 %421  ;;  %v983_v14 = vmax.f32 %v951_v1, 0.0 }
 0x115   : > { %1944 = vmatpush1.bf16.msra.mxu0 %v3284_v18  ;;  %v523_v34 = vmul.f32 %v3881_v55, %v422_v50  ;;  %v3308_v50 = vcombine.low %v1373_v28, %v1377_v37 }
 0x116   : > { %1945 = vmatprep.subr.bf16.mxu0 %v3293_v33 }
 0x117   : > { %3506 = vset.pattern.permute.xlu1 %v3613_v3 }
 0x118   : > { %653 = vperm.xlu1 %3506, %v3837_v32  }
 0x119   : > { %v602_v19 = vpop.permute.xlu1 %601  ;;  %1946 = vmatpush1.bf16.msra.mxu0 %v3292_v36 }
 0x11a   : > { %v687_v32 = vmul.f32 %v3870_v51, %v602_v19  ;;  %1947 = vmatprep.subr.bf16.mxu0 %v3301_v57 }
 0x11c   : > { %3507 = vset.pattern.permute.xlu1 %v3615_v8  ;;  %v719_v40 = vadd.f32 %v687_v32, %v523_v34 }
 0x11d   : > { %496 = vperm.xlu1 %3507, %v3854_v43   ;;  %1948 = vmatpush1.bf16.msra.mxu0 %v3300_v26 }
 0x11e   : > { %v790_v56 = vpop.permute.xlu1 %789  ;;  %v915_v2 = vadd.f32 %v883_v45, %v719_v40  ;;  %1949 = vmatprep.subr.bf16.mxu0 %v3309_v7 }
 0x11f   : > { %v881_v20 = vmul.f32 %v3877_v54, %v790_v56 }
 0x120   : > { %v954_v30 = vadd.f32 %v3900_v10, %v915_v2 }
 0x121   : > { %v913_v4 = vadd.f32 %v881_v20, %v717_v52  ;;  %501 = vperm.xlu1 %3507, %v3887_v60   ;;  %1950 = vmatpush1.bf16.msra.mxu0 %v3308_v50  ;;  %v818_v20 = vpop.permute.xlu0 %817 }
 0x122   : > { %v794_v31 = vpop.permute.xlu1 %793  ;;  %v986_v59 = vmax.f32 %v954_v30, 0.0  ;;  %v3250_v30 = vcombine.low %v4059_v53, %v4064_v25  ;;  %v1340_v53 = vld [vmem:[%s4906_s5 + $0xc0] sm:$0xff] }
 0x123   : > { %v952_v13 = vadd.f32 %v3900_v10, %v913_v4  ;;  %v882_v12 = vmul.f32 %v3877_v54, %v794_v31  ;;  %v1344_v25 = vld [vmem:[%s4906_s5 + $0xe0] sm:$0xff] }
 0x125   : > { %v984_v15 = vmax.f32 %v952_v13, 0.0  ;;  %v914_v58 = vadd.f32 %v882_v12, %v718_v11  ;;  %3508 = vset.pattern.permute.xlu1 %v3613_v3  ;;  %v830_v7 = vpop.permute.xlu0 %829  ;;  %v1324_v13 = vld [vmem:[%s4906_s5 + $0x40] sm:$0xff] }
 0x126   : > { %665 = vperm.xlu1 %3508, %v3887_v60   ;;  %v1328_v12 = vld [vmem:[%s4906_s5 + $0x60] sm:$0xff] }
 0x127   : > { %v1009_v41 = vpack.c.bf16 %v984_v15, %v983_v14  ;;  %v953_v16 = vadd.f32 %v3900_v10, %v914_v58  ;;  %v427_v18 = vpop.permute.xlu1 %426  ;;  %v3259_v58 = vcombine.high %v1324_v13, %v1328_v12 }
 0x128   : > { %v524_v33 = vmul.f32 %v3881_v55, %v427_v18  ;;  %v1336_v18 = vld [vmem:[%s4906_s5 + $0xa0] sm:$0xff] }
 0x129   : > { %v985_v44 = vmax.f32 %v953_v16, 0.0  ;;  %3360 = vmatprep.mubr.msk.bf16.mxu0 %vm1058_vm0, %v1009_v41  ;;  %v1332_v16 = vld [vmem:[%s4906_s5 + $0x80] sm:$0xff] }
 0x12a   : > { %3510 = vset.pattern.permute.xlu1 %v3614_v5  ;;  %v885_v5 = vmul.f32 %v3877_v54, %v806_v21  ;;  %v1348_v21 = vld [vmem:[%s4906_s5 + $0x100] sm:$0xff] }
 0x12b   : > { %v1010_v19 = vpack.c.bf16 %v986_v59, %v985_v44  ;;  %853 = vperm.xlu1 %3510, %v3845_v39   ;;  %v4124_v59 = vpop.permute.xlu0 %837  ;;  %v3258_v44 = vcombine.low %v1324_v13, %v1328_v12 }
 0x12c   : > { %v606_v22 = vpop.permute.xlu1 %605 }
 0x12d   : > { %3361 = vmatmul.mubr.msk.bf16.gmra.mrb[12].mxu0 %vm1058_vm0, %v1010_v19  ;;  %v688_v39 = vmul.f32 %v3870_v51, %v606_v22  ;;  %v3267_v19 = vcombine.high %v1332_v16, %v1336_v18 }
 0x12e   : > { %1967 = vmatprep.mubr.bf16.mxu0 %v3615_v8 }
 0x12f   : > { %857 = vperm.xlu1 %3510, %v3854_v43   ;;  %v526_v43 = vmul.f32 %v3881_v55, %v3929_v0  ;;  %v720_v40 = vadd.f32 %v688_v39, %v524_v33  ;;  %v3274_v39 = vcombine.low %v1340_v53, %v1344_v25 }
 0x130   : > { %v610_v3 = vpop.permute.xlu1 %609 }
 0x131   : > { %v689_v23 = vmul.f32 %v3870_v51, %v610_v3  ;;  %v722_v47 = vadd.f32 %v690_v38, %v526_v43  ;;  %v3266_v3 = vcombine.low %v1332_v16, %v1336_v18  ;;  %v888_v43 = vmul.f32 %v3877_v54, %v818_v20 }
 0x133   : > { %v721_v32 = vadd.f32 %v689_v23, %v525_v24  ;;  %v3275_v23 = vcombine.high %v1340_v53, %v1344_v25  ;;  %v1352_v24 = vld [vmem:[%s4906_s5 + $0x120] sm:$0xff] }
 0x134   : > { %v3283_v33 = vcombine.high %v1348_v21, %v1352_v24 }
 0x135   : > { %v442_v60 = vpop.permute.xlu1 %441  ;;  %v917_v34 = vadd.f32 %v885_v5, %v721_v32 }
 0x136   : > { %v527_v62 = vmul.f32 %v3881_v55, %v442_v60  ;;  %v447_v60 = vpop.permute.xlu0 %446 }
 0x137   : > { %v956_v9 = vadd.f32 %v3900_v10, %v917_v34  ;;  %v528_v5 = vmul.f32 %v3881_v55, %v447_v60  ;;  %v1356_v34 = vld [vmem:[%s4906_s5 + $0x140] sm:$0xff] }
 0x139   : > { %v988_v35 = vmax.f32 %v956_v9, 0.0 }
 0x13a   : > { %v618_v27 = vpop.permute.xlu1 %617  ;;  %v472_v60 = vpop.permute.xlu0 %471 }
 0x13b   : > { %v691_v52 = vmul.f32 %v3870_v51, %v618_v27 }
 0x13d   : > { %v723_v1 = vadd.f32 %v691_v52, %v527_v62  ;;  %v1364_v52 = vld [vmem:[%s4906_s5 + $0x180] sm:$0xff]  ;;  %v891_v62 = vmul.f32 %v3877_v54, %v830_v7 }
 0x13f   : > { %v802_v36 = vpop.permute.xlu1 %801 }
 0x140   : > { %v884_v45 = vmul.f32 %v3877_v54, %v802_v36  ;;  %v1360_v36 = vld [vmem:[%s4906_s5 + $0x160] sm:$0xff] }
 0x141   : > { %v3291_v9 = vcombine.high %v1356_v34, %v1360_v36 }
 0x142   : > { %v916_v61 = vadd.f32 %v884_v45, %v720_v40  ;;  %v3282_v45 = vcombine.low %v1348_v21, %v1352_v24  ;;  %v477_v21 = vpop.permute.xlu0 %476 }
 0x143   : > { %v810_v29 = vpop.permute.xlu1 %809 }
 0x144   : > { %v886_v56 = vmul.f32 %v3877_v54, %v810_v29  ;;  %v955_v57 = vadd.f32 %v3900_v10, %v916_v61 }
 0x146   : > { %v918_v0 = vadd.f32 %v886_v56, %v722_v47  ;;  %v987_v26 = vmax.f32 %v955_v57, 0.0  ;;  %v1368_v56 = vld [vmem:[%s4906_s5 + $0x1a0] sm:$0xff]  ;;  %v693_v57 = vmul.f32 %v3870_v51, %v4002_v63 }
 0x147   : > { %v814_v17 = vpop.permute.xlu1 %813  ;;  %v1376_v63 = vld [vmem:[%s4906_s5 + $0x1e0] sm:$0xff]  ;;  %v3298_v13 = vcombine.low %v1364_v52, %v1368_v56 }
 0x148   : > { %v887_v2 = vmul.f32 %v3877_v54, %v814_v17  ;;  %v1011_v4 = vpack.c.bf16 %v988_v35, %v987_v26  ;;  %v957_v28 = vadd.f32 %v3900_v10, %v918_v0  ;;  %v3290_v26 = vcombine.low %v1356_v34, %v1360_v36 }
 0x149   : > { %v3299_v17 = vcombine.high %v1364_v52, %v1368_v56 }
 0x14a   : > { %v919_v37 = vadd.f32 %v887_v2, %v723_v1  ;;  %3364 = vmatprep.mubr.msk.bf16.mxu1 %vm1058_vm0, %v1011_v4  ;;  %v989_v50 = vmax.f32 %v957_v28, 0.0  ;;  %v1372_v28 = vld [vmem:[%s4906_s5 + $0x1c0] sm:$0xff] }
 0x14c   : > { %v958_v31 = vadd.f32 %v3900_v10, %v919_v37  ;;  %v452_v11 = vpop.permute.xlu1 %451  ;;  %v694_v37 = vmul.f32 %v3870_v51, %v4012_v6 }
 0x14d   : > { %v529_v29 = vmul.f32 %v3881_v55, %v452_v11 }
 0x14e   : > { %v990_v14 = vmax.f32 %v958_v31, 0.0 }
 0x14f   : > { %v725_v1 = vadd.f32 %v693_v57, %v529_v29 }
 0x150   : > { %v1012_v15 = vpack.c.bf16 %v990_v14, %v989_v50  ;;  %v3307_v50 = vcombine.high %v1372_v28, %v1376_v63 }
 0x151   : > { %v622_v41 = vpop.permute.xlu1 %621 }
 0x152   : > { %3365 = vmatmul.mubr.msk.bf16.vlgmr.msra.gmra.mrb[0].mxu1 %vm1058_vm0, %v1012_v15  ;;  %v692_v27 = vmul.f32 %v3870_v51, %v622_v41 }
 0x153   : > { %1743 = vmatpush1.bf16.msra.mxu1 %v3250_v30 }
 0x154   : > { %1744 = vmatprep.subr.bf16.mxu1 %v3259_v58  ;;  %v724_v38 = vadd.f32 %v692_v27, %v528_v5  ;;  %v3306_v58 = vcombine.low %v1372_v28, %v1376_v63  ;;  %v487_v5 = vpop.permute.xlu0 %486  ;;  %v533_v27 = vmul.f32 %v3881_v55, %v472_v60 }
 0x156   : > { %v457_v22 = vpop.permute.xlu1 %456  ;;  %v920_v0 = vadd.f32 %v888_v43, %v724_v38  ;;  %v893_v43 = vmul.f32 %v3877_v54, %v4124_v59 }
 0x157   : > { %1745 = vmatpush1.bf16.msra.mxu1 %v3258_v44  ;;  %v530_v2 = vmul.f32 %v3881_v55, %v457_v22 }
 0x158   : > { %1746 = vmatprep.subr.bf16.mxu1 %v3267_v19  ;;  %v959_v31 = vadd.f32 %v3900_v10, %v920_v0  ;;  %v646_v36 = vpop.permute.xlu0 %645 }
 0x159   : > { %v726_v14 = vadd.f32 %v694_v37, %v530_v2 }
 0x15a   : > { %v462_v32 = vpop.permute.xlu1 %461  ;;  %v991_v41 = vmax.f32 %v959_v31, 0.0 }
 0x15b   : > { %1747 = vmatpush1.bf16.msra.mxu1 %v3266_v3  ;;  %v531_v47 = vmul.f32 %v3881_v55, %v462_v32 }
 0x15c   : > { %1748 = vmatprep.subr.bf16.mxu1 %v3275_v23 }
 0x15f   : > { %v634_v40 = vpop.permute.xlu1 %633  ;;  %1749 = vmatpush1.bf16.msra.mxu1 %v3274_v39 }
 0x160   : > { %v695_v61 = vmul.f32 %v3870_v51, %v634_v40  ;;  %1750 = vmatprep.subr.bf16.mxu1 %v3283_v33 }
 0x162   : > { %v727_v20 = vadd.f32 %v695_v61, %v531_v47  ;;  %v534_v61 = vmul.f32 %v3881_v55, %v477_v21  ;;  %v536_v21 = vmul.f32 %v3881_v55, %v487_v5 }
 0x163   : > { %1751 = vmatpush1.bf16.msra.mxu1 %v3282_v45 }
 0x164   : > { %v822_v35 = vpop.permute.xlu1 %821  ;;  %1752 = vmatprep.subr.bf16.mxu1 %v3291_v9  ;;  %v923_v7 = vadd.f32 %v891_v62, %v727_v20  ;;  %v698_v9 = vmul.f32 %v3870_v51, %v646_v36 }
 0x165   : > { %v889_v4 = vmul.f32 %v3877_v54, %v822_v35 }
 0x166   : > { %v962_v16 = vadd.f32 %v3900_v10, %v923_v7  ;;  %v730_v62 = vadd.f32 %v698_v9, %v534_v61 }
 0x167   : > { %v921_v11 = vadd.f32 %v889_v4, %v725_v1  ;;  %1753 = vmatpush1.bf16.msra.mxu1 %v3290_v26 }
 0x168   : > { %v826_v12 = vpop.permute.xlu1 %825  ;;  %1754 = vmatprep.subr.bf16.mxu1 %v3299_v17  ;;  %v994_v25 = vmax.f32 %v962_v16, 0.0  ;;  %v4199_v16 = vld [vmem:[%s4905_s4] ss:$0 sm:$0xff] }
 0x169   : > { %v960_v30 = vadd.f32 %v3900_v10, %v921_v11  ;;  %v890_v15 = vmul.f32 %v3877_v54, %v826_v12 }
 0x16b   : > { %v992_v18 = vmax.f32 %v960_v30, 0.0  ;;  %v922_v6 = vadd.f32 %v890_v15, %v726_v14  ;;  %1755 = vmatpush1.bf16.msra.mxu1 %v3298_v13  ;;  %v658_v14 = vpop.permute.xlu0 %657 }
 0x16c   : > { %1756 = vmatprep.subr.bf16.mxu1 %v3307_v50  ;;  %v701_v5 = vmul.f32 %v3870_v51, %v658_v14  ;;  %v1331_v14 = vld [vmem:[%s4906_s5 + $0x78] sm:$0xff] }
 0x16d   : > { %v1013_v44 = vpack.c.bf16 %v992_v18, %v991_v41  ;;  %v961_v19 = vadd.f32 %v3900_v10, %v922_v6  ;;  %v467_v53 = vpop.permute.xlu1 %466 }
 0x16e   : > { %v532_v40 = vmul.f32 %v3881_v55, %v467_v53 }
 0x16f   : > { %v993_v22 = vmax.f32 %v961_v19, 0.0  ;;  %3368 = vmatprep.mubr.msk.bf16.mxu1 %vm1058_vm0, %v1013_v44  ;;  %1757 = vmatpush1.bf16.msra.mxu1 %v3306_v58  ;;  %v662_v58 = vpop.permute.xlu0 %661 }
 0x171   : > { %v1014_v3 = vpack.c.bf16 %v994_v25, %v993_v22 }
 0x172   : > { %v638_v23 = vpop.permute.xlu1 %637 }
 0x173   : > { %3369 = vmatmul.mubr.msk.bf16.gmra.mrb[4].mxu1 %vm1058_vm0, %v1014_v3  ;;  %v696_v38 = vmul.f32 %v3870_v51, %v638_v23  ;;  %v850_v3 = vpop.permute.xlu0 %849 }
 0x175   : > { %v728_v47 = vadd.f32 %v696_v38, %v532_v40 }
 0x176   : > { %v642_v24 = vpop.permute.xlu1 %641 }
 0x177   : > { %v697_v39 = vmul.f32 %v3870_v51, %v642_v24  ;;  %v862_v40 = vpop.permute.xlu0 %861 }
 0x179   : > { %v729_v33 = vadd.f32 %v697_v39, %v533_v27 }
 0x17b   : > { %v482_v32 = vpop.permute.xlu1 %481  ;;  %v925_v45 = vadd.f32 %v893_v43, %v729_v33  ;;  %v896_v33 = vmul.f32 %v3877_v54, %v850_v3 }
 0x17c   : > { %v535_v17 = vmul.f32 %v3881_v55, %v482_v32 }
 0x17d   : > { %v964_v56 = vadd.f32 %v3900_v10, %v925_v45 }
 0x17f   : > { %v996_v35 = vmax.f32 %v964_v56, 0.0  ;;  %v899_v56 = vmul.f32 %v3877_v54, %v862_v40 }
 0x180   : > { %v650_v34 = vpop.permute.xlu1 %649 }
 0x181   : > { %v699_v59 = vmul.f32 %v3870_v51, %v650_v34 }
 0x183   : > { %v731_v28 = vadd.f32 %v699_v59, %v535_v17 }
 0x185   : > { %v834_v29 = vpop.permute.xlu1 %833 }
 0x186   : > { %v892_v52 = vmul.f32 %v3877_v54, %v834_v29 }
 0x188   : > { %v924_v57 = vadd.f32 %v892_v52, %v728_v47 }
 0x189   : > { %v842_v0 = vpop.permute.xlu1 %841 }
 0x18a   : > { %v963_v20 = vadd.f32 %v3900_v10, %v924_v57  ;;  %v894_v26 = vmul.f32 %v3877_v54, %v842_v0  ;;  %v4221_v57 = vld [vmem:[%s4906_s5 + $0x10] sm:$0xff]  ;;  %v1319_v0 = vld [vmem:[%s4906_s5 + $0x18] sm:$0xff] }
 0x18c   : > { %v995_v1 = vmax.f32 %v963_v20, 0.0  ;;  %v926_v2 = vadd.f32 %v894_v26, %v730_v62  ;;  %v4226_v62 = vld [vmem:[%s4906_s5 + $0x30] sm:$0xff]  ;;  %v1323_v20 = vld [vmem:[%s4906_s5 + $0x38] sm:$0xff] }
 0x18d   : > { %v846_v4 = vpop.permute.xlu1 %845  ;;  %v3255_v59 = vcombine.high %v4221_v57, %v4226_v62  ;;  %v3257_v17 = vcombine.high %v1319_v0, %v1323_v20 }
 0x18e   : > { %v1015_v63 = vpack.c.bf16 %v996_v35, %v995_v1  ;;  %v895_v37 = vmul.f32 %v3877_v54, %v846_v4  ;;  %v965_v31 = vadd.f32 %v3900_v10, %v926_v2  ;;  %v3256_v35 = vcombine.low %v1319_v0, %v1323_v20  ;;  %v1346_v20 = vld [vmem:[%s4906_s5 + $0xf0] sm:$0xff] }
 0x18f   : > { %v702_v2 = vmul.f32 %v3870_v51, %v662_v58  ;;  %2128 = vmatprep.subr.bf16.mxu1 %v3255_v59  ;;  %2321 = vmatprep.subr.bf16.mxu0 %v3257_v17  ;;  %v1342_v59 = vld [vmem:[%s4906_s5 + $0xd0] sm:$0xff] }
 0x190   : > { %v927_v7 = vadd.f32 %v895_v37, %v731_v28  ;;  %3372 = vmatprep.mubr.msk.bf16.mxu1 %vm1058_vm0, %v1015_v63  ;;  %v997_v12 = vmax.f32 %v965_v31, 0.0  ;;  %v3279_v17 = vcombine.high %v1342_v59, %v1346_v20 }
 0x192   : > { %v966_v11 = vadd.f32 %v3900_v10, %v927_v7  ;;  %v492_v13 = vpop.permute.xlu1 %491 }
 0x193   : > { %v537_v29 = vmul.f32 %v3881_v55, %v492_v13 }
 0x194   : > { %v998_v50 = vmax.f32 %v966_v11, 0.0 }
 0x195   : > { %v733_v1 = vadd.f32 %v701_v5, %v537_v29 }
 0x196   : > { %v1016_v30 = vpack.c.bf16 %v998_v50, %v997_v12 }
 0x197   : > { %v654_v15 = vpop.permute.xlu1 %653 }
 0x198   : > { %3373 = vmatmul.mubr.msk.bf16.gmra.mrb[8].mxu1 %vm1058_vm0, %v1016_v30  ;;  %v700_v19 = vmul.f32 %v3870_v51, %v654_v15 }
 0x19a   : > { %v732_v39 = vadd.f32 %v700_v19, %v536_v21 }
 0x19c   : > { %v497_v41 = vpop.permute.xlu1 %496  ;;  %v928_v47 = vadd.f32 %v896_v33, %v732_v39  ;;  %v1334_v39 = vld [vmem:[%s4906_s5 + $0x90] sm:$0xff] }
 0x19d   : > { %v538_v4 = vmul.f32 %v3881_v55, %v497_v41  ;;  %v1338_v33 = vld [vmem:[%s4906_s5 + $0xb0] sm:$0xff] }
 0x19e   : > { %v3350_v18 = vpop.f32.mrb[0].mxu0  ;;  %v967_v63 = vadd.f32 %v3900_v10, %v928_v47  ;;  %v3271_v5 = vcombine.high %v1334_v39, %v1338_v33  ;;  %v3270_v0 = vcombine.low %v1334_v39, %v1338_v33 }
 0x19f   : > { %v1150_v6 = vadd.f32 %v3350_v18, %v4199_v16  ;;  %v1141_v44 = vpop.f32.mrb[1].mxu0  ;;  %v734_v11 = vadd.f32 %v702_v2, %v538_v4 }
 0x1a0   : > { %v1142_v53 = vadd.f32 %v4199_v16, %v1141_v44  ;;  %v3351_v25 = vpop.f32.mrb[2].mxu0  ;;  %v502_v22 = vpop.permute.xlu1 %501 }
 0x1a1   : > { %v1153_v60 = vadd.f32 %v3351_v25, %v4199_v16  ;;  %v1144_v23 = vpop.f32.mrb[3].mxu0  ;;  %v1270_v32 = vmax.f32 %v1150_v6, 0.0  ;;  %v539_v45 = vmul.f32 %v3881_v55, %v502_v22  ;;  %v999_v55 = vmax.f32 %v967_v63, 0.0  ;;  %v1339_v25 = vld [vmem:[%s4906_s5 + $0xb8] sm:$0xff]  ;;  %v1354_v63 = vld [vmem:[%s4906_s5 + $0x130] sm:$0xff] }
 0x1a2   : > { %v1145_v24 = vadd.f32 %v4199_v16, %v1144_v23  ;;  %v1268_v34 = vmax.f32 %v1142_v53, 0.0  ;;  %v1335_v53 = vld [vmem:[%s4906_s5 + $0x98] sm:$0xff]  ;;  %v3254_v23 = vcombine.low %v4221_v57, %v4226_v62 }
 0x1a3   : > { %v1271_v27 = vmax.f32 %v1153_v60, 0.0  ;;  %v3272_v22 = vcombine.low %v1335_v53, %v1339_v25  ;;  %v3273_v3 = vcombine.high %v1335_v53, %v1339_v25  ;;  %v1330_v60 = vld [vmem:[%s4906_s5 + $0x70] sm:$0xff] }
 0x1a4   : > { %v1269_v36 = vmax.f32 %v1145_v24, 0.0  ;;  %v1358_v25 = vld [vmem:[%s4906_s5 + $0x150] sm:$0xff] }
 0x1a5   : > { %v4208_v43 = vpack.c.bf16 %v1271_v27, %v1270_v32  ;;  %v666_v38 = vpop.permute.xlu1 %665 }
 0x1a6   : > { %v4211_v61 = vpack.c.bf16 %v1269_v36, %v1268_v34  ;;  %v703_v9 = vmul.f32 %v3870_v51, %v666_v38  ;;  %v1327_v51 = vld [vmem:[%s4906_s5 + $0x58] sm:$0xff] }
 0x1a7   : > { %v3264_v58 = vcombine.low %v1327_v51, %v1331_v14  ;;  %v3265_v41 = vcombine.high %v1327_v51, %v1331_v14 }
 0x1a8   : > { %v735_v52 = vadd.f32 %v703_v9, %v539_v45  ;;  %1968 = vmatmul.mubr.bf16.vlgmr.msra.gmra.mrb[16].mxu0 %v4211_v61 }
 0x1a9   : > { %1977 = vmatprep.mubr.bf16.mxu0 %v3615_v8  ;;  %2322 = vmatpush1.bf16.msra.mxu0 %v3256_v35  ;;  %v3278_v35 = vcombine.low %v1342_v59, %v1346_v20  ;;  %v1367_v59 = vld [vmem:[%s4906_s5 + $0x198] sm:$0xff] }
 0x1aa   : > { %v854_v26 = vpop.permute.xlu1 %853  ;;  %v931_v37 = vadd.f32 %v899_v56, %v735_v52  ;;  %2323 = vmatprep.subr.bf16.mxu0 %v3265_v41 }
 0x1ab   : > { %v897_v28 = vmul.f32 %v3877_v54, %v854_v26  ;;  %v1343_v26 = vld [vmem:[%s4906_s5 + $0xd8] sm:$0xff] }
 0x1ac   : > { %v970_v50 = vadd.f32 %v3900_v10, %v931_v37  ;;  %v1351_v37 = vld [vmem:[%s4906_s5 + $0x118] sm:$0xff] }
 0x1ad   : > { %v929_v31 = vadd.f32 %v897_v28, %v733_v1  ;;  %2324 = vmatpush1.bf16.msra.mxu0 %v3264_v58  ;;  %v1347_v1 = vld [vmem:[%s4906_s5 + $0xf8] sm:$0xff]  ;;  %v1350_v28 = vld [vmem:[%s4906_s5 + $0x110] sm:$0xff] }
 0x1ae   : > { %v858_v7 = vpop.permute.xlu1 %857  ;;  %v1002_v6 = vmax.f32 %v970_v50, 0.0  ;;  %2325 = vmatprep.subr.bf16.mxu0 %v3273_v3  ;;  %v3280_v2 = vcombine.low %v1343_v26, %v1347_v1  ;;  %v3281_v4 = vcombine.high %v1343_v26, %v1347_v1  ;;  %v1359_v3 = vld [vmem:[%s4906_s5 + $0x158] sm:$0xff] }
 0x1af   : > { %v968_v13 = vadd.f32 %v3900_v10, %v929_v31  ;;  %v898_v12 = vmul.f32 %v3877_v54, %v858_v7  ;;  %v3286_v31 = vcombine.low %v1350_v28, %v1354_v63  ;;  %v3287_v7 = vcombine.high %v1350_v28, %v1354_v63  ;;  %v1375_v28 = vld [vmem:[%s4906_s5 + $0x1d8] sm:$0xff] }
 0x1b0   : > { %1978 = vmatmul.mubr.bf16.gmra.mrb[20].mxu0 %v4208_v43 }
 0x1b1   : > { %v1000_v30 = vmax.f32 %v968_v13, 0.0  ;;  %v930_v15 = vadd.f32 %v898_v12, %v734_v11  ;;  %1987 = vmatprep.mubr.bf16.mxu0 %v3615_v8  ;;  %2326 = vmatpush1.bf16.msra.mxu0 %v3272_v22  ;;  %v1355_v11 = vld [vmem:[%s4906_s5 + $0x138] sm:$0xff]  ;;  %v1362_v22 = vld [vmem:[%s4906_s5 + $0x170] sm:$0xff] }
 0x1b2   : > { %2327 = vmatprep.subr.bf16.mxu0 %v3281_v4  ;;  %v3288_v13 = vcombine.low %v1351_v37, %v1355_v11  ;;  %v3289_v12 = vcombine.high %v1351_v37, %v1355_v11  ;;  %v1378_v4 = vld [vmem:[%s4906_s5 + $0x1f0] sm:$0xff] }
 0x1b3   : > { %v1017_v54 = vpack.c.bf16 %v1000_v30, %v999_v55  ;;  %v969_v18 = vadd.f32 %v3900_v10, %v930_v15  ;;  %v1326_v10 = vld [vmem:[%s4906_s5 + $0x50] sm:$0xff] }
 0x1b4   : > { %v3263_v24 = vcombine.high %v1326_v10, %v1330_v60  ;;  %v3262_v45 = vcombine.low %v1326_v10, %v1330_v60  ;;  %v3294_v10 = vcombine.low %v1358_v25, %v1362_v22  ;;  %v3295_v60 = vcombine.high %v1358_v25, %v1362_v22 }
 0x1b5   : > { %v1001_v44 = vmax.f32 %v969_v18, 0.0  ;;  %3376 = vmatprep.mubr.msk.bf16.mxu1 %vm1058_vm0, %v1017_v54  ;;  %2328 = vmatpush1.bf16.msra.mxu0 %v3280_v2  ;;  %v1374_v2 = vld [vmem:[%s4906_s5 + $0x1d0] sm:$0xff] }
 0x1b6   : > { %2329 = vmatprep.subr.bf16.mxu0 %v3289_v12  ;;  %v3310_v63 = vcombine.low %v1374_v2, %v1378_v4  ;;  %v3311_v37 = vcombine.high %v1374_v2, %v1378_v4  ;;  %v1380_v2 = vld [vmem:[%s4907_s6] sm:$0xff]  ;;  %v1396_v4 = vsub.s32 3, %v3849_v42 }
 0x1b7   : > { %v1018_v19 = vpack.c.bf16 %v1002_v6, %v1001_v44 }
 0x1b9   : > { %3377 = vmatmul.mubr.msk.bf16.gmra.mrb[12].mxu1 %vm1058_vm0, %v1018_v19  ;;  %2330 = vmatpush1.bf16.msra.mxu0 %v3288_v13 }
 0x1ba   : > { %1774 = vmatprep.mubr.bf16.mxu1 %v3615_v8 }
 0x1bf   : > { %v3354_v21 = vpop.f32.mrb[4].mxu0 }
 0x1c0   : > { %v1166_v32 = vadd.f32 %v3354_v21, %v4199_v16  ;;  %v1157_v27 = vpop.f32.mrb[5].mxu0 }
 0x1c1   : > { %v1158_v34 = vadd.f32 %v4199_v16, %v1157_v27  ;;  %v3355_v36 = vpop.f32.mrb[6].mxu0  ;;  %1775 = vmatmul.mubr.bf16.vlgmr.msra.gmra.mrb[16].mxu1 %v4211_v61 }
 0x1c2   : > { %v1169_v38 = vadd.f32 %v3355_v36, %v4199_v16  ;;  %v1160_v40 = vpop.f32.mrb[7].mxu0  ;;  %1784 = vmatprep.mubr.bf16.mxu1 %v3615_v8  ;;  %2129 = vmatpush1.bf16.msra.mxu1 %v3254_v23  ;;  %v1274_v29 = vmax.f32 %v1166_v32, 0.0  ;;  %v1363_v23 = vld [vmem:[%s4906_s5 + $0x178] sm:$0xff] }
 0x1c3   : > { %v1161_v9 = vadd.f32 %v4199_v16, %v1160_v40  ;;  %2130 = vmatprep.subr.bf16.mxu1 %v3263_v24  ;;  %v1272_v52 = vmax.f32 %v1158_v34, 0.0  ;;  %v3296_v21 = vcombine.low %v1359_v3, %v1363_v23  ;;  %v3297_v24 = vcombine.high %v1359_v3, %v1363_v23 }
 0x1c4   : > { %v1275_v47 = vmax.f32 %v1169_v38, 0.0 }
 0x1c5   : > { %v1273_v56 = vmax.f32 %v1161_v9, 0.0  ;;  %2331 = vmatprep.subr.bf16.mxu0 %v3297_v24 }
 0x1c6   : > { %v4282_v57 = vpack.c.bf16 %v1275_v47, %v1274_v29  ;;  %2131 = vmatpush1.bf16.msra.mxu1 %v3262_v45  ;;  %2332 = vmatpush1.bf16.msra.mxu0 %v3296_v21 }
 0x1c7   : > { %v4284_v62 = vpack.c.bf16 %v1273_v56, %v1272_v52  ;;  %2132 = vmatprep.subr.bf16.mxu1 %v3271_v5  ;;  %v1366_v56 = vld [vmem:[%s4906_s5 + $0x190] sm:$0xff] }
 0x1c9   : > { %1785 = vmatmul.mubr.bf16.gmra.mrb[20].mxu1 %v4208_v43  ;;  %1988 = vmatmul.mubr.bf16.gmra.mrb[24].mxu0 %v4284_v62 }
 0x1ca   : > { %1794 = vmatprep.mubr.bf16.mxu1 %v3615_v8  ;;  %1997 = vmatprep.mubr.bf16.mxu0 %v3615_v8 }
 0x1cb   : > { %2133 = vmatpush1.bf16.msra.mxu1 %v3270_v0  ;;  %v1370_v0 = vld [vmem:[%s4906_s5 + $0x1b0] sm:$0xff] }
 0x1cc   : > { %2134 = vmatprep.subr.bf16.mxu1 %v3279_v17  ;;  %v3302_v20 = vcombine.low %v1366_v56, %v1370_v0  ;;  %v3303_v26 = vcombine.high %v1366_v56, %v1370_v0 }
 0x1cf   : > { %2135 = vmatpush1.bf16.msra.mxu1 %v3278_v35  ;;  %v1371_v35 = vld [vmem:[%s4906_s5 + $0x1b8] sm:$0xff] }
 0x1d0   : > { %2136 = vmatprep.subr.bf16.mxu1 %v3287_v7  ;;  %v3304_v17 = vcombine.low %v1367_v59, %v1371_v35  ;;  %v3305_v1 = vcombine.high %v1367_v59, %v1371_v35 }
 0x1d1   : > { %1795 = vmatmul.mubr.bf16.gmra.mrb[24].mxu1 %v4284_v62  ;;  %1998 = vmatmul.mubr.bf16.gmra.mrb[28].mxu0 %v4282_v57 }
 0x1d2   : > { %1804 = vmatprep.mubr.bf16.mxu1 %v3615_v8  ;;  %2007 = vmatprep.mubr.bf16.mxu0 %v3615_v8 }
 0x1d3   : > { %2137 = vmatpush1.bf16.msra.mxu1 %v3286_v31  ;;  %2333 = vmatprep.subr.bf16.mxu0 %v3305_v1  ;;  %v1379_v31 = vld [vmem:[%s4906_s5 + $0x1f8] sm:$0xff] }
 0x1d4   : > { %2138 = vmatprep.subr.bf16.mxu1 %v3295_v60  ;;  %2334 = vmatpush1.bf16.msra.mxu0 %v3304_v17  ;;  %v3312_v7 = vcombine.low %v1375_v28, %v1379_v31  ;;  %v3313_v11 = vcombine.high %v1375_v28, %v1379_v31  ;;  %v4438_v28 = vrot.slane %v1380_v2, %v866_v48 }
 0x1d6   : > { %2335 = vmatprep.subr.bf16.mxu0 %v3313_v11 }
 0x1d7   : > { %2139 = vmatpush1.bf16.msra.mxu1 %v3294_v10 }
 0x1d8   : > { %2140 = vmatprep.subr.bf16.mxu1 %v3303_v26  ;;  %2336 = vmatpush1.bf16.msra.mxu0 %v3312_v7 }
 0x1d9   : > { %1805 = vmatmul.mubr.bf16.gmra.mrb[28].mxu1 %v4282_v57 }
 0x1da   : > { %1814 = vmatprep.mubr.bf16.mxu1 %v3615_v8 }
 0x1db   : > { %2141 = vmatpush1.bf16.msra.mxu1 %v3302_v20 }
 0x1dc   : > { %2142 = vmatprep.subr.bf16.mxu1 %v3311_v37 }
 0x1df   : > { %v3358_v51 = vpop.f32.mrb[8].mxu0  ;;  %2143 = vmatpush1.bf16.msra.mxu1 %v3310_v63  ;;  %v4440_v63 = vrot.slane %v1380_v2, %v1396_v4 }
 0x1e0   : > { %v1182_v55 = vadd.f32 %v3358_v51, %v4199_v16  ;;  %v1173_v50 = vpop.f32.mrb[9].mxu0 }
 0x1e1   : > { %v1174_v14 = vadd.f32 %v4199_v16, %v1173_v50  ;;  %v3359_v30 = vpop.f32.mrb[10].mxu0 }
 0x1e2   : > { %v1185_v15 = vadd.f32 %v3359_v30, %v4199_v16  ;;  %v1176_v58 = vpop.f32.mrb[11].mxu0  ;;  %v1278_v54 = vmax.f32 %v1182_v55, 0.0 }
 0x1e3   : > { %v1177_v41 = vadd.f32 %v4199_v16, %v1176_v58  ;;  %v1276_v6 = vmax.f32 %v1174_v14, 0.0 }
 0x1e4   : > { %v1279_v18 = vmax.f32 %v1185_v15, 0.0 }
 0x1e5   : > { %v1277_v44 = vmax.f32 %v1177_v41, 0.0 }
 0x1e6   : > { %v4324_v19 = vpack.c.bf16 %v1279_v18, %v1278_v54 }
 0x1e7   : > { %v4326_v53 = vpack.c.bf16 %v1277_v44, %v1276_v6 }
 0x1e9   : > { %1815 = vmatmul.mubr.bf16.gmra.mrb[32].mxu1 %v4326_v53  ;;  %2008 = vmatmul.mubr.bf16.gmra.mrb[32].mxu0 %v4326_v53 }
 0x1ea   : > { %1824 = vmatprep.mubr.bf16.mxu1 %v3615_v8  ;;  %2017 = vmatprep.mubr.bf16.mxu0 %v3615_v8 }
 0x1f1   : > { %1825 = vmatmul.mubr.bf16.gmra.mrb[36].mxu1 %v4324_v19  ;;  %2018 = vmatmul.mubr.bf16.gmra.mrb[36].mxu0 %v4324_v19 }
 0x1f2   : > { %1834 = vmatprep.mubr.bf16.mxu1 %v3615_v8  ;;  %2027 = vmatprep.mubr.bf16.mxu0 %v3615_v8 }
 0x200   : > { %v3362_v32 = vpop.f32.mrb[12].mxu0 }
 0x201   : > { %v1198_v27 = vadd.f32 %v3362_v32, %v4199_v16  ;;  %v1189_v39 = vpop.f32.mrb[13].mxu0 }
 0x202   : > { %v1190_v33 = vadd.f32 %v4199_v16, %v1189_v39  ;;  %v3363_v34 = vpop.f32.mrb[14].mxu0 }
 0x203   : > { %v1201_v36 = vadd.f32 %v3363_v34, %v4199_v16  ;;  %v1192_v38 = vpop.f32.mrb[15].mxu0  ;;  %v1282_v45 = vmax.f32 %v1198_v27, 0.0 }
 0x204   : > { %v1193_v40 = vadd.f32 %v4199_v16, %v1192_v38  ;;  %v1280_v5 = vmax.f32 %v1190_v33, 0.0 }
 0x205   : > { %v1283_v9 = vmax.f32 %v1201_v36, 0.0 }
 0x206   : > { %v1281_v29 = vmax.f32 %v1193_v40, 0.0 }
 0x207   : > { %v4352_v47 = vpack.c.bf16 %v1283_v9, %v1282_v45 }
 0x208   : > { %v4354_v52 = vpack.c.bf16 %v1281_v29, %v1280_v5 }
 0x20a   : > { %1835 = vmatmul.mubr.bf16.gmra.mrb[40].mxu1 %v4354_v52  ;;  %2028 = vmatmul.mubr.bf16.gmra.mrb[40].mxu0 %v4354_v52 }
 0x20b   : > { %1844 = vmatprep.mubr.bf16.mxu1 %v3615_v8  ;;  %2037 = vmatprep.mubr.bf16.mxu0 %v3615_v8 }
 0x212   : > { %1845 = vmatmul.mubr.bf16.gmra.mrb[44].mxu1 %v4352_v47  ;;  %2038 = vmatmul.mubr.bf16.gmra.mrb[44].mxu0 %v4352_v47 }
 0x213   : > { %1854 = vmatprep.mubr.bf16.mxu1 %v3615_v8  ;;  %2047 = vmatprep.mubr.bf16.mxu0 %v3615_v8 }
 0x225   : > { %v3366_v13 = vpop.f32.mrb[0].mxu1 }
 0x226   : > { %v1214_v12 = vadd.f32 %v3366_v13, %v4199_v16  ;;  %v1205_v51 = vpop.f32.mrb[1].mxu1 }
 0x227   : > { %v1206_v55 = vadd.f32 %v4199_v16, %v1205_v51  ;;  %v3367_v50 = vpop.f32.mrb[2].mxu1 }
 0x228   : > { %v1217_v14 = vadd.f32 %v3367_v50, %v4199_v16  ;;  %v1208_v30 = vpop.f32.mrb[3].mxu1  ;;  %v1286_v58 = vmax.f32 %v1214_v12, 0.0 }
 0x229   : > { %v1209_v15 = vadd.f32 %v4199_v16, %v1208_v30  ;;  %v1284_v54 = vmax.f32 %v1206_v55, 0.0 }
 0x22a   : > { %v1287_v41 = vmax.f32 %v1217_v14, 0.0 }
 0x22b   : > { %v1285_v18 = vmax.f32 %v1209_v15, 0.0 }
 0x22c   : > { %v4392_v6 = vpack.c.bf16 %v1287_v41, %v1286_v58 }
 0x22d   : > { %v4394_v44 = vpack.c.bf16 %v1285_v18, %v1284_v54 }
 0x22f   : > { %1855 = vmatmul.mubr.bf16.gmra.mrb[48].mxu1 %v4394_v44  ;;  %2048 = vmatmul.mubr.bf16.gmra.mrb[48].mxu0 %v4394_v44 }
 0x230   : > { %1864 = vmatprep.mubr.bf16.mxu1 %v3615_v8  ;;  %2057 = vmatprep.mubr.bf16.mxu0 %v3615_v8 }
 0x237   : > { %1865 = vmatmul.mubr.bf16.gmra.mrb[52].mxu1 %v4392_v6  ;;  %2058 = vmatmul.mubr.bf16.gmra.mrb[52].mxu0 %v4392_v6 }
 0x238   : > { %1874 = vmatprep.mubr.bf16.mxu1 %v3615_v8  ;;  %2067 = vmatprep.mubr.bf16.mxu0 %v3615_v8 }
 0x246   : > { %v3370_v25 = vpop.f32.mrb[4].mxu1 }
 0x247   : > { %v1230_v22 = vadd.f32 %v3370_v25, %v4199_v16  ;;  %v1221_v3 = vpop.f32.mrb[5].mxu1 }
 0x248   : > { %v1222_v10 = vadd.f32 %v4199_v16, %v1221_v3  ;;  %v3371_v60 = vpop.f32.mrb[6].mxu1 }
 0x249   : > { %v1233_v23 = vadd.f32 %v3371_v60, %v4199_v16  ;;  %v1224_v21 = vpop.f32.mrb[7].mxu1  ;;  %v1290_v32 = vmax.f32 %v1230_v22, 0.0 }
 0x24a   : > { %v1225_v24 = vadd.f32 %v4199_v16, %v1224_v21  ;;  %v1288_v39 = vmax.f32 %v1222_v10, 0.0 }
 0x24b   : > { %v1291_v27 = vmax.f32 %v1233_v23, 0.0 }
 0x24c   : > { %v1289_v33 = vmax.f32 %v1225_v24, 0.0 }
 0x24d   : > { %v4408_v34 = vpack.c.bf16 %v1291_v27, %v1290_v32 }
 0x24e   : > { %v4410_v36 = vpack.c.bf16 %v1289_v33, %v1288_v39 }
 0x250   : > { %1875 = vmatmul.mubr.bf16.gmra.mrb[56].mxu1 %v4410_v36  ;;  %2068 = vmatmul.mubr.bf16.gmra.mrb[56].mxu0 %v4410_v36 }
 0x251   : > { %1884 = vmatprep.mubr.bf16.mxu1 %v3615_v8  ;;  %2077 = vmatprep.mubr.bf16.mxu0 %v3615_v8 }
 0x258   : > { %1885 = vmatmul.mubr.bf16.gmra.mrb[60].mxu1 %v4408_v34  ;;  %2078 = vmatmul.mubr.bf16.gmra.mrb[60].mxu0 %v4408_v34 }
 0x259   : > { %1894 = vmatprep.mubr.bf16.mxu1 %v3615_v8  ;;  %2087 = vmatprep.mubr.bf16.mxu0 %v3615_v8 }
 0x26b   : > { %v3374_v38 = vpop.f32.mrb[8].mxu1 }
 0x26c   : > { %v1246_v40 = vadd.f32 %v3374_v38, %v4199_v16  ;;  %v1237_v45 = vpop.f32.mrb[9].mxu1 }
 0x26d   : > { %v1238_v9 = vadd.f32 %v4199_v16, %v1237_v45  ;;  %v3375_v5 = vpop.f32.mrb[10].mxu1 }
 0x26e   : > { %v1249_v29 = vadd.f32 %v3375_v5, %v4199_v16  ;;  %v1240_v56 = vpop.f32.mrb[11].mxu1  ;;  %v1294_v59 = vmax.f32 %v1246_v40, 0.0 }
 0x26f   : > { %v1241_v0 = vadd.f32 %v4199_v16, %v1240_v56  ;;  %v1292_v26 = vmax.f32 %v1238_v9, 0.0 }
 0x270   : > { %v1295_v20 = vmax.f32 %v1249_v29, 0.0 }
 0x271   : > { %v1293_v35 = vmax.f32 %v1241_v0, 0.0 }
 0x272   : > { %v4424_v17 = vpack.c.bf16 %v1295_v20, %v1294_v59 }
 0x273   : > { %v4426_v1 = vpack.c.bf16 %v1293_v35, %v1292_v26  ;;  %v4462_v35 = vrot.slane %v1380_v2, %v506_v49 }
 0x275   : > { %1895 = vmatmul.mubr.bf16.gmra.mrb[64].mxu1 %v4426_v1  ;;  %2088 = vmatmul.mubr.bf16.gmra.mrb[64].mxu0 %v4426_v1 }
 0x276   : > { %1904 = vmatprep.mubr.bf16.mxu1 %v3615_v8  ;;  %2097 = vmatprep.mubr.bf16.mxu0 %v3615_v8 }
 0x27b   : > { %v1969_v37 = vpop.f32.mrb[16].mxu0 }
 0x27c   : > { %v1970_v31 = vadd.f32 %v1969_v37, %v4438_v28  ;;  %v1971_v7 = vpop.f32.mrb[17].mxu0 }
 0x27d   : > { %v1972_v11 = vadd.f32 %v1971_v7, %v4440_v63  ;;  %1905 = vmatmul.mubr.bf16.gmra.mrb[68].mxu1 %v4424_v17  ;;  %v1973_v13 = vpop.f32.mrb[18].mxu0  ;;  %2098 = vmatmul.mubr.bf16.gmra.mrb[68].mxu0 %v4424_v17 }
 0x27e   : > { %v1974_v12 = vadd.f32 %v1973_v13, %v4438_v28  ;;  %v1975_v51 = vpop.f32.mrb[19].mxu0  ;;  %1914 = vmatprep.mubr.bf16.mxu1 %v3615_v8  ;;  %2107 = vmatprep.mubr.bf16.mxu0 %v3615_v8  ;;  %v2516_v55 = vmax.f32 %v1970_v31, 0.0  ;;  %v4466_v31 = vrot.slane %v1380_v2, %v670_v46 }
 0x27f   : > { %v1976_v48 = vadd.f32 %v1975_v51, %v4440_v63  ;;  %v2517_v14 = vmax.f32 %v1972_v11, 0.0 }
 0x280   : > { %v2524_v50 = vmax.f32 %v1974_v12, 0.0 }
 0x281   : > { %v2525_v30 = vmax.f32 %v1976_v48, 0.0 }
 0x282   : > { %v2772_v15 = vmax.f32 %v2516_v55, %v2524_v50 }
 0x283   : > { %v2773_v58 = vmax.f32 %v2517_v14, %v2525_v30  ;;  %v1979_v41 = vpop.f32.mrb[20].mxu0 }
 0x284   : > { %v1980_v54 = vadd.f32 %v1979_v41, %v4438_v28  ;;  %v1981_v18 = vpop.f32.mrb[21].mxu0 }
 0x285   : > { %v1982_v25 = vadd.f32 %v1981_v18, %v4440_v63  ;;  %v1983_v22 = vpop.f32.mrb[22].mxu0 }
 0x286   : > { %v2532_v3 = vmax.f32 %v1980_v54, 0.0  ;;  %v1984_v10 = vadd.f32 %v1983_v22, %v4438_v28  ;;  %v1985_v60 = vpop.f32.mrb[23].mxu0 }
 0x287   : > { %v2533_v23 = vmax.f32 %v1982_v25, 0.0  ;;  %v1986_v21 = vadd.f32 %v1985_v60, %v4440_v63 }
 0x288   : > { %v2780_v24 = vmax.f32 %v2532_v3, %v2772_v15  ;;  %v2540_v32 = vmax.f32 %v1984_v10, 0.0 }
 0x289   : > { %v2781_v27 = vmax.f32 %v2533_v23, %v2773_v58  ;;  %v2541_v39 = vmax.f32 %v1986_v21, 0.0 }
 0x28a   : > { %v2788_v33 = vmax.f32 %v2540_v32, %v2780_v24 }
 0x28b   : > { %v4454_v38 = vmax.f32 %v2541_v39, %v2781_v27 }
 0x28c   : > { %v3378_v40 = vpop.f32.mrb[12].mxu1 }
 0x28d   : > { %v1262_v45 = vadd.f32 %v3378_v40, %v4199_v16  ;;  %v1253_v9 = vpop.f32.mrb[13].mxu1 }
 0x28e   : > { %v1254_v5 = vadd.f32 %v4199_v16, %v1253_v9  ;;  %v3379_v29 = vpop.f32.mrb[14].mxu1 }
 0x28f   : > { %v1265_v56 = vadd.f32 %v3379_v29, %v4199_v16  ;;  %v1256_v0 = vpop.f32.mrb[15].mxu1  ;;  %v1298_v20 = vmax.f32 %v1262_v45, 0.0 }
 0x290   : > { %v1257_v59 = vadd.f32 %v4199_v16, %v1256_v0  ;;  %v1296_v4 = vmax.f32 %v1254_v5, 0.0 }
 0x291   : > { %v1299_v26 = vmax.f32 %v1265_v56, 0.0 }
 0x292   : > { %v1297_v37 = vmax.f32 %v1257_v59, 0.0 }
 0x293   : > { %v4468_v7 = vpack.c.bf16 %v1299_v26, %v1298_v20 }
 0x294   : > { %v4470_v11 = vpack.c.bf16 %v1297_v37, %v1296_v4  ;;  %v1776_v13 = vpop.f32.mrb[16].mxu1 }
 0x295   : > { %v1777_v12 = vadd.f32 %v1776_v13, %v4462_v35  ;;  %v1778_v16 = vpop.f32.mrb[17].mxu1 }
 0x296   : > { %v1779_v51 = vadd.f32 %v1778_v16, %v4466_v31  ;;  %v1780_v48 = vpop.f32.mrb[18].mxu1  ;;  %1915 = vmatmul.mubr.bf16.gmra.mrb[72].mxu1 %v4470_v11  ;;  %2108 = vmatmul.mubr.bf16.gmra.mrb[72].mxu0 %v4470_v11 }
 0x297   : > { %v1781_v49 = vadd.f32 %v1780_v48, %v4462_v35  ;;  %v1782_v55 = vpop.f32.mrb[19].mxu1  ;;  %1924 = vmatprep.mubr.bf16.mxu1 %v3615_v8  ;;  %2117 = vmatprep.mubr.bf16.mxu0 %v3615_v8  ;;  %v2514_v2 = vmax.f32 %v1777_v12, 0.0 }
 0x298   : > { %v1783_v46 = vadd.f32 %v1782_v55, %v4466_v31  ;;  %v2515_v14 = vmax.f32 %v1779_v51, 0.0 }
 0x299   : > { %v2522_v50 = vmax.f32 %v1781_v49, 0.0 }
 0x29a   : > { %v2523_v30 = vmax.f32 %v1783_v46, 0.0 }
 0x29b   : > { %v2770_v15 = vmax.f32 %v2514_v2, %v2522_v50 }
 0x29c   : > { %v2771_v58 = vmax.f32 %v2515_v14, %v2523_v30  ;;  %v1786_v41 = vpop.f32.mrb[20].mxu1  ;;  %v1989_v54 = vpop.f32.mrb[24].mxu0 }
 0x29d   : > { %v1787_v18 = vadd.f32 %v1786_v41, %v4462_v35  ;;  %v1990_v25 = vadd.f32 %v1989_v54, %v4438_v28  ;;  %v1788_v22 = vpop.f32.mrb[21].mxu1  ;;  %v1991_v3 = vpop.f32.mrb[25].mxu0 }
 0x29e   : > { %v1789_v10 = vadd.f32 %v1788_v22, %v4466_v31  ;;  %v1992_v60 = vadd.f32 %v1991_v3, %v4440_v63  ;;  %v1790_v23 = vpop.f32.mrb[22].mxu1  ;;  %1925 = vmatmul.mubr.bf16.gmra.mrb[76].mxu1 %v4468_v7  ;;  %v1993_v21 = vpop.f32.mrb[26].mxu0  ;;  %2118 = vmatmul.mubr.bf16.gmra.mrb[76].mxu0 %v4468_v7 }
 0x29f   : > { %v2530_v24 = vmax.f32 %v1787_v18, 0.0  ;;  %v2548_v32 = vmax.f32 %v1990_v25, 0.0  ;;  %v1791_v27 = vadd.f32 %v1790_v23, %v4462_v35  ;;  %v1994_v39 = vadd.f32 %v1993_v21, %v4438_v28  ;;  %v1792_v40 = vpop.f32.mrb[23].mxu1  ;;  %v1995_v45 = vpop.f32.mrb[27].mxu0  ;;  %2160 = vmatprep.mubr.bf16.mxu1 %v3615_v8  ;;  %2353 = vmatprep.mubr.bf16.mxu0 %v3615_v8 }
 0x2a0   : > { %v2531_v9 = vmax.f32 %v1789_v10, 0.0  ;;  %v2549_v5 = vmax.f32 %v1992_v60, 0.0  ;;  %v1793_v29 = vadd.f32 %v1792_v40, %v4466_v31  ;;  %v1996_v56 = vadd.f32 %v1995_v45, %v4440_v63 }
 0x2a1   : > { %v2778_v0 = vmax.f32 %v2530_v24, %v2770_v15  ;;  %v2796_v59 = vmax.f32 %v2548_v32, %v2788_v33  ;;  %v2538_v20 = vmax.f32 %v1791_v27, 0.0  ;;  %v2556_v26 = vmax.f32 %v1994_v39, 0.0 }
 0x2a2   : > { %v2779_v4 = vmax.f32 %v2531_v9, %v2771_v58  ;;  %v2797_v37 = vmax.f32 %v2549_v5, %v4454_v38  ;;  %v2539_v13 = vmax.f32 %v1793_v29, 0.0  ;;  %v2557_v12 = vmax.f32 %v1996_v56, 0.0 }
 0x2a3   : > { %v2786_v16 = vmax.f32 %v2538_v20, %v2778_v0  ;;  %v2804_v51 = vmax.f32 %v2556_v26, %v2796_v59 }
 0x2a4   : > { %v2787_v48 = vmax.f32 %v2539_v13, %v2779_v4  ;;  %v2805_v49 = vmax.f32 %v2557_v12, %v2797_v37  ;;  %v1796_v55 = vpop.f32.mrb[24].mxu1  ;;  %v1999_v46 = vpop.f32.mrb[28].mxu0 }
 0x2a5   : > { %v1797_v2 = vadd.f32 %v1796_v55, %v4462_v35  ;;  %v2000_v50 = vadd.f32 %v1999_v46, %v4438_v28  ;;  %v1798_v14 = vpop.f32.mrb[25].mxu1  ;;  %v2001_v30 = vpop.f32.mrb[29].mxu0 }
 0x2a6   : > { %v1799_v33 = vadd.f32 %v1798_v14, %v4466_v31  ;;  %v2002_v15 = vadd.f32 %v2001_v30, %v4440_v63  ;;  %v1800_v58 = vpop.f32.mrb[26].mxu1  ;;  %v2003_v38 = vpop.f32.mrb[30].mxu0  ;;  %2161 = vmatmul.mubr.bf16.vlgmr.msra.gmra.mrb[80].mxu1 %v4211_v61  ;;  %2354 = vmatmul.mubr.bf16.vlgmr.msra.gmra.mrb[80].mxu0 %v4211_v61 }
 0x2a7   : > { %v2546_v41 = vmax.f32 %v1797_v2, 0.0  ;;  %v2564_v54 = vmax.f32 %v2000_v50, 0.0  ;;  %v1801_v18 = vadd.f32 %v1800_v58, %v4462_v35  ;;  %v2004_v25 = vadd.f32 %v2003_v38, %v4438_v28  ;;  %v1802_v22 = vpop.f32.mrb[27].mxu1  ;;  %v2005_v3 = vpop.f32.mrb[31].mxu0  ;;  %2170 = vmatprep.mubr.bf16.mxu1 %v3615_v8  ;;  %2363 = vmatprep.mubr.bf16.mxu0 %v3615_v8 }
 0x2a8   : > { %v2547_v10 = vmax.f32 %v1799_v33, 0.0  ;;  %v2565_v60 = vmax.f32 %v2002_v15, 0.0  ;;  %v1803_v23 = vadd.f32 %v1802_v22, %v4466_v31  ;;  %v2006_v21 = vadd.f32 %v2005_v3, %v4440_v63 }
 0x2a9   : > { %v2794_v24 = vmax.f32 %v2546_v41, %v2786_v16  ;;  %v2812_v61 = vmax.f32 %v2564_v54, %v2804_v51  ;;  %v2554_v32 = vmax.f32 %v1801_v18, 0.0  ;;  %v2572_v27 = vmax.f32 %v2004_v25, 0.0 }
 0x2aa   : > { %v2795_v39 = vmax.f32 %v2547_v10, %v2787_v48  ;;  %v2813_v40 = vmax.f32 %v2565_v60, %v2805_v49  ;;  %v2555_v45 = vmax.f32 %v1803_v23, 0.0  ;;  %v2573_v9 = vmax.f32 %v2006_v21, 0.0 }
 0x2ab   : > { %v2802_v5 = vmax.f32 %v2554_v32, %v2794_v24  ;;  %v2820_v29 = vmax.f32 %v2572_v27, %v2812_v61 }
 0x2ac   : > { %v2803_v56 = vmax.f32 %v2555_v45, %v2795_v39  ;;  %v2821_v0 = vmax.f32 %v2573_v9, %v2813_v40  ;;  %v1806_v59 = vpop.f32.mrb[28].mxu1 }
 0x2ad   : > { %v1807_v20 = vadd.f32 %v1806_v59, %v4462_v35  ;;  %v1808_v26 = vpop.f32.mrb[29].mxu1 }
 0x2ae   : > { %v1809_v4 = vadd.f32 %v1808_v26, %v4466_v31  ;;  %v1810_v37 = vpop.f32.mrb[30].mxu1  ;;  %2171 = vmatmul.mubr.bf16.gmra.mrb[84].mxu1 %v4208_v43  ;;  %2364 = vmatmul.mubr.bf16.gmra.mrb[84].mxu0 %v4208_v43 }
 0x2af   : > { %v2562_v13 = vmax.f32 %v1807_v20, 0.0  ;;  %v1811_v12 = vadd.f32 %v1810_v37, %v4462_v35  ;;  %v1812_v16 = vpop.f32.mrb[31].mxu1  ;;  %2180 = vmatprep.mubr.bf16.mxu1 %v3615_v8  ;;  %2373 = vmatprep.mubr.bf16.mxu0 %v3615_v8 }
 0x2b0   : > { %v2563_v51 = vmax.f32 %v1809_v4, 0.0  ;;  %v1813_v48 = vadd.f32 %v1812_v16, %v4466_v31 }
 0x2b1   : > { %v2810_v49 = vmax.f32 %v2562_v13, %v2802_v5  ;;  %v2570_v55 = vmax.f32 %v1811_v12, 0.0 }
 0x2b2   : > { %v2811_v46 = vmax.f32 %v2563_v51, %v2803_v56  ;;  %v2571_v2 = vmax.f32 %v1813_v48, 0.0 }
 0x2b3   : > { %v2818_v50 = vmax.f32 %v2570_v55, %v2810_v49 }
 0x2b4   : > { %v2819_v14 = vmax.f32 %v2571_v2, %v2811_v46 }
 0x2b6   : > { %2181 = vmatmul.mubr.bf16.gmra.mrb[88].mxu1 %v4284_v62  ;;  %2374 = vmatmul.mubr.bf16.gmra.mrb[88].mxu0 %v4284_v62 }
 0x2b7   : > { %2190 = vmatprep.mubr.bf16.mxu1 %v3615_v8  ;;  %2383 = vmatprep.mubr.bf16.mxu0 %v3615_v8 }
 0x2bc   : > { %v1816_v43 = vpop.f32.mrb[32].mxu1  ;;  %v2009_v30 = vpop.f32.mrb[32].mxu0 }
 0x2bd   : > { %v1817_v33 = vadd.f32 %v1816_v43, %v4462_v35  ;;  %v2010_v15 = vadd.f32 %v2009_v30, %v4438_v28  ;;  %v1818_v58 = vpop.f32.mrb[33].mxu1  ;;  %v2011_v38 = vpop.f32.mrb[33].mxu0 }
 0x2be   : > { %v1819_v41 = vadd.f32 %v1818_v58, %v4466_v31  ;;  %v2012_v54 = vadd.f32 %v2011_v38, %v4440_v63  ;;  %v1820_v18 = vpop.f32.mrb[34].mxu1  ;;  %v2013_v25 = vpop.f32.mrb[34].mxu0  ;;  %2191 = vmatmul.mubr.bf16.gmra.mrb[92].mxu1 %v4282_v57  ;;  %2384 = vmatmul.mubr.bf16.gmra.mrb[92].mxu0 %v4282_v57 }
 0x2bf   : > { %v2578_v62 = vmax.f32 %v1817_v33, 0.0  ;;  %v2580_v22 = vmax.f32 %v2010_v15, 0.0  ;;  %v1821_v3 = vadd.f32 %v1820_v18, %v4462_v35  ;;  %v2014_v10 = vadd.f32 %v2013_v25, %v4438_v28  ;;  %v1822_v60 = vpop.f32.mrb[35].mxu1  ;;  %v2015_v23 = vpop.f32.mrb[35].mxu0  ;;  %2200 = vmatprep.mubr.bf16.mxu1 %v3615_v8  ;;  %2393 = vmatprep.mubr.bf16.mxu0 %v3615_v8 }
 0x2c0   : > { %v2579_v21 = vmax.f32 %v1819_v41, 0.0  ;;  %v2581_v24 = vmax.f32 %v2012_v54, 0.0  ;;  %v1823_v61 = vadd.f32 %v1822_v60, %v4466_v31  ;;  %v2016_v32 = vadd.f32 %v2015_v23, %v4440_v63 }
 0x2c1   : > { %v2826_v27 = vmax.f32 %v2578_v62, %v2818_v50  ;;  %v2828_v57 = vmax.f32 %v2580_v22, %v2820_v29  ;;  %v2586_v39 = vmax.f32 %v1821_v3, 0.0  ;;  %v2588_v40 = vmax.f32 %v2014_v10, 0.0 }
 0x2c2   : > { %v2827_v45 = vmax.f32 %v2579_v21, %v2819_v14  ;;  %v2829_v9 = vmax.f32 %v2581_v24, %v2821_v0  ;;  %v2587_v5 = vmax.f32 %v1823_v61, 0.0  ;;  %v2589_v56 = vmax.f32 %v2016_v32, 0.0 }
 0x2c3   : > { %v2834_v59 = vmax.f32 %v2586_v39, %v2826_v27  ;;  %v2836_v20 = vmax.f32 %v2588_v40, %v2828_v57 }
 0x2c4   : > { %v2835_v26 = vmax.f32 %v2587_v5, %v2827_v45  ;;  %v2837_v4 = vmax.f32 %v2589_v56, %v2829_v9  ;;  %v1826_v37 = vpop.f32.mrb[36].mxu1  ;;  %v2019_v13 = vpop.f32.mrb[36].mxu0 }
 0x2c5   : > { %v1827_v12 = vadd.f32 %v1826_v37, %v4462_v35  ;;  %v2020_v16 = vadd.f32 %v2019_v13, %v4438_v28  ;;  %v1828_v51 = vpop.f32.mrb[37].mxu1  ;;  %v2021_v48 = vpop.f32.mrb[37].mxu0 }
 0x2c6   : > { %v1829_v29 = vadd.f32 %v1828_v51, %v4466_v31  ;;  %v2022_v49 = vadd.f32 %v2021_v48, %v4440_v63  ;;  %v1830_v55 = vpop.f32.mrb[38].mxu1  ;;  %v2023_v0 = vpop.f32.mrb[38].mxu0  ;;  %2201 = vmatmul.mubr.bf16.gmra.mrb[96].mxu1 %v4326_v53  ;;  %2394 = vmatmul.mubr.bf16.gmra.mrb[96].mxu0 %v4326_v53 }
 0x2c7   : > { %v2594_v46 = vmax.f32 %v1827_v12, 0.0  ;;  %v2596_v2 = vmax.f32 %v2020_v16, 0.0  ;;  %v1831_v50 = vadd.f32 %v1830_v55, %v4462_v35  ;;  %v2024_v14 = vadd.f32 %v2023_v0, %v4438_v28  ;;  %v1832_v43 = vpop.f32.mrb[39].mxu1  ;;  %v2025_v30 = vpop.f32.mrb[39].mxu0  ;;  %2210 = vmatprep.mubr.bf16.mxu1 %v3615_v8  ;;  %2403 = vmatprep.mubr.bf16.mxu0 %v3615_v8 }
 0x2c8   : > { %v2595_v33 = vmax.f32 %v1829_v29, 0.0  ;;  %v2597_v15 = vmax.f32 %v2022_v49, 0.0  ;;  %v1833_v58 = vadd.f32 %v1832_v43, %v4466_v31  ;;  %v2026_v38 = vadd.f32 %v2025_v30, %v4440_v63 }
 0x2c9   : > { %v2898_v41 = vmax.f32 %v2594_v46, %v2834_v59  ;;  %v2900_v53 = vmax.f32 %v2596_v2, %v2836_v20  ;;  %v2602_v54 = vmax.f32 %v1831_v50, 0.0  ;;  %v2604_v18 = vmax.f32 %v2024_v14, 0.0 }
 0x2ca   : > { %v2899_v25 = vmax.f32 %v2595_v33, %v2835_v26  ;;  %v2901_v62 = vmax.f32 %v2597_v15, %v2837_v4  ;;  %v2603_v22 = vmax.f32 %v1833_v58, 0.0  ;;  %v2605_v3 = vmax.f32 %v2026_v38, 0.0 }
 0x2cb   : > { %v2842_v10 = vmax.f32 %v2602_v54, %v2898_v41  ;;  %v2844_v60 = vmax.f32 %v2604_v18, %v2900_v53 }
 0x2cc   : > { %v2843_v23 = vmax.f32 %v2603_v22, %v2899_v25  ;;  %v2845_v21 = vmax.f32 %v2605_v3, %v2901_v62 }
 0x2ce   : > { %2211 = vmatmul.mubr.bf16.gmra.mrb[100].mxu1 %v4324_v19  ;;  %2404 = vmatmul.mubr.bf16.gmra.mrb[100].mxu0 %v4324_v19 }
 0x2cf   : > { %2220 = vmatprep.mubr.bf16.mxu1 %v3615_v8  ;;  %2413 = vmatprep.mubr.bf16.mxu0 %v3615_v8 }
 0x2d6   : > { %2221 = vmatmul.mubr.bf16.gmra.mrb[104].mxu1 %v4354_v52  ;;  %2414 = vmatmul.mubr.bf16.gmra.mrb[104].mxu0 %v4354_v52 }
 0x2d7   : > { %2230 = vmatprep.mubr.bf16.mxu1 %v3615_v8  ;;  %2423 = vmatprep.mubr.bf16.mxu0 %v3615_v8 }
 0x2dd   : > { %v1836_v24 = vpop.f32.mrb[40].mxu1  ;;  %v2029_v61 = vpop.f32.mrb[40].mxu0 }
 0x2de   : > { %v1837_v32 = vadd.f32 %v1836_v24, %v4462_v35  ;;  %v2030_v27 = vadd.f32 %v2029_v61, %v4438_v28  ;;  %v1838_v57 = vpop.f32.mrb[41].mxu1  ;;  %v2031_v19 = vpop.f32.mrb[41].mxu0  ;;  %2231 = vmatmul.mubr.bf16.gmra.mrb[108].mxu1 %v4352_v47  ;;  %2424 = vmatmul.mubr.bf16.gmra.mrb[108].mxu0 %v4352_v47 }
 0x2df   : > { %v1839_v39 = vadd.f32 %v1838_v57, %v4466_v31  ;;  %v2032_v52 = vadd.f32 %v2031_v19, %v4440_v63  ;;  %v1840_v40 = vpop.f32.mrb[42].mxu1  ;;  %v2033_v45 = vpop.f32.mrb[42].mxu0  ;;  %2240 = vmatprep.mubr.bf16.mxu1 %v3615_v8  ;;  %2433 = vmatprep.mubr.bf16.mxu0 %v3615_v8 }
 0x2e0   : > { %v2610_v9 = vmax.f32 %v1837_v32, 0.0  ;;  %v2612_v5 = vmax.f32 %v2030_v27, 0.0  ;;  %v1841_v56 = vadd.f32 %v1840_v40, %v4462_v35  ;;  %v2034_v59 = vadd.f32 %v2033_v45, %v4438_v28  ;;  %v1842_v20 = vpop.f32.mrb[43].mxu1  ;;  %v2035_v26 = vpop.f32.mrb[43].mxu0 }
 0x2e1   : > { %v2611_v4 = vmax.f32 %v1839_v39, 0.0  ;;  %v2613_v47 = vmax.f32 %v2032_v52, 0.0  ;;  %v1843_v37 = vadd.f32 %v1842_v20, %v4466_v31  ;;  %v2036_v13 = vadd.f32 %v2035_v26, %v4440_v63 }
 0x2e2   : > { %v2906_v12 = vmax.f32 %v2610_v9, %v2842_v10  ;;  %v2908_v16 = vmax.f32 %v2612_v5, %v2844_v60  ;;  %v2618_v51 = vmax.f32 %v1841_v56, 0.0  ;;  %v2620_v48 = vmax.f32 %v2034_v59, 0.0 }
 0x2e3   : > { %v2907_v29 = vmax.f32 %v2611_v4, %v2843_v23  ;;  %v2909_v49 = vmax.f32 %v2613_v47, %v2845_v21  ;;  %v2619_v55 = vmax.f32 %v1843_v37, 0.0  ;;  %v2621_v0 = vmax.f32 %v2036_v13, 0.0 }
 0x2e4   : > { %v2850_v46 = vmax.f32 %v2618_v51, %v2906_v12  ;;  %v2852_v2 = vmax.f32 %v2620_v48, %v2908_v16 }
 0x2e5   : > { %v2851_v50 = vmax.f32 %v2619_v55, %v2907_v29  ;;  %v2853_v14 = vmax.f32 %v2621_v0, %v2909_v49  ;;  %v1846_v43 = vpop.f32.mrb[44].mxu1  ;;  %v2039_v30 = vpop.f32.mrb[44].mxu0 }
 0x2e6   : > { %v1847_v33 = vadd.f32 %v1846_v43, %v4462_v35  ;;  %v2040_v15 = vadd.f32 %v2039_v30, %v4438_v28  ;;  %v1848_v58 = vpop.f32.mrb[45].mxu1  ;;  %v2041_v38 = vpop.f32.mrb[45].mxu0  ;;  %2241 = vmatmul.mubr.bf16.gmra.mrb[112].mxu1 %v4394_v44  ;;  %2434 = vmatmul.mubr.bf16.gmra.mrb[112].mxu0 %v4394_v44 }
 0x2e7   : > { %v1849_v41 = vadd.f32 %v1848_v58, %v4466_v31  ;;  %v2042_v53 = vadd.f32 %v2041_v38, %v4440_v63  ;;  %v1850_v54 = vpop.f32.mrb[46].mxu1  ;;  %v2043_v18 = vpop.f32.mrb[46].mxu0  ;;  %2250 = vmatprep.mubr.bf16.mxu1 %v3615_v8  ;;  %2443 = vmatprep.mubr.bf16.mxu0 %v3615_v8 }
 0x2e8   : > { %v2626_v25 = vmax.f32 %v1847_v33, 0.0  ;;  %v2628_v62 = vmax.f32 %v2040_v15, 0.0  ;;  %v1851_v22 = vadd.f32 %v1850_v54, %v4462_v35  ;;  %v2044_v3 = vadd.f32 %v2043_v18, %v4438_v28  ;;  %v1852_v10 = vpop.f32.mrb[47].mxu1  ;;  %v2045_v60 = vpop.f32.mrb[47].mxu0 }
 0x2e9   : > { %v2627_v23 = vmax.f32 %v1849_v41, 0.0  ;;  %v2629_v44 = vmax.f32 %v2042_v53, 0.0  ;;  %v1853_v21 = vadd.f32 %v1852_v10, %v4466_v31  ;;  %v2046_v24 = vadd.f32 %v2045_v60, %v4440_v63 }
 0x2ea   : > { %v2914_v61 = vmax.f32 %v2626_v25, %v2850_v46  ;;  %v2916_v32 = vmax.f32 %v2628_v62, %v2852_v2  ;;  %v2634_v27 = vmax.f32 %v1851_v22, 0.0  ;;  %v2636_v57 = vmax.f32 %v2044_v3, 0.0 }
 0x2eb   : > { %v2915_v19 = vmax.f32 %v2627_v23, %v2851_v50  ;;  %v2917_v39 = vmax.f32 %v2629_v44, %v2853_v14  ;;  %v2635_v52 = vmax.f32 %v1853_v21, 0.0  ;;  %v2637_v40 = vmax.f32 %v2046_v24, 0.0 }
 0x2ec   : > { %v2858_v45 = vmax.f32 %v2634_v27, %v2914_v61  ;;  %v2860_v9 = vmax.f32 %v2636_v57, %v2916_v32 }
 0x2ed   : > { %v2859_v5 = vmax.f32 %v2635_v52, %v2915_v19  ;;  %v2861_v56 = vmax.f32 %v2637_v40, %v2917_v39 }
 0x2ee   : > { %2251 = vmatmul.mubr.bf16.gmra.mrb[116].mxu1 %v4392_v6  ;;  %2444 = vmatmul.mubr.bf16.gmra.mrb[116].mxu0 %v4392_v6 }
 0x2ef   : > { %2260 = vmatprep.mubr.bf16.mxu1 %v3615_v8  ;;  %2453 = vmatprep.mubr.bf16.mxu0 %v3615_v8 }
 0x2f6   : > { %2261 = vmatmul.mubr.bf16.gmra.mrb[120].mxu1 %v4410_v36  ;;  %2454 = vmatmul.mubr.bf16.gmra.mrb[120].mxu0 %v4410_v36 }
 0x2f7   : > { %2270 = vmatprep.mubr.bf16.mxu1 %v3615_v8  ;;  %2463 = vmatprep.mubr.bf16.mxu0 %v3615_v8 }
 0x2fe   : > { %2271 = vmatmul.mubr.bf16.gmra.mrb[124].mxu1 %v4408_v34  ;;  %2464 = vmatmul.mubr.bf16.gmra.mrb[124].mxu0 %v4408_v34 }
 0x2ff   : > { %2280 = vmatprep.mubr.bf16.mxu1 %v3615_v8  ;;  %2473 = vmatprep.mubr.bf16.mxu0 %v3615_v8 }
 0x302   : > { %v1856_v6 = vpop.f32.mrb[48].mxu1  ;;  %v2049_v59 = vpop.f32.mrb[48].mxu0 }
 0x303   : > { %v1857_v20 = vadd.f32 %v1856_v6, %v4462_v35  ;;  %v2050_v26 = vadd.f32 %v2049_v59, %v4438_v28  ;;  %v1858_v4 = vpop.f32.mrb[49].mxu1  ;;  %v2051_v36 = vpop.f32.mrb[49].mxu0 }
 0x304   : > { %v1859_v47 = vadd.f32 %v1858_v4, %v4466_v31  ;;  %v2052_v37 = vadd.f32 %v2051_v36, %v4440_v63  ;;  %v1860_v13 = vpop.f32.mrb[50].mxu1  ;;  %v2053_v12 = vpop.f32.mrb[50].mxu0 }
 0x305   : > { %v2642_v16 = vmax.f32 %v1857_v20, 0.0  ;;  %v2644_v34 = vmax.f32 %v2050_v26, 0.0  ;;  %v1861_v51 = vadd.f32 %v1860_v13, %v4462_v35  ;;  %v2054_v48 = vadd.f32 %v2053_v12, %v4438_v28  ;;  %v1862_v29 = vpop.f32.mrb[51].mxu1  ;;  %v2055_v49 = vpop.f32.mrb[51].mxu0 }
 0x306   : > { %v2643_v55 = vmax.f32 %v1859_v47, 0.0  ;;  %v2645_v0 = vmax.f32 %v2052_v37, 0.0  ;;  %v1863_v46 = vadd.f32 %v1862_v29, %v4466_v31  ;;  %v2056_v2 = vadd.f32 %v2055_v49, %v4440_v63  ;;  %2281 = vmatmul.mubr.bf16.gmra.mrb[128].mxu1 %v4426_v1  ;;  %2474 = vmatmul.mubr.bf16.gmra.mrb[128].mxu0 %v4426_v1 }
 0x307   : > { %v2922_v50 = vmax.f32 %v2642_v16, %v2858_v45  ;;  %v2924_v14 = vmax.f32 %v2644_v34, %v2860_v9  ;;  %v2650_v43 = vmax.f32 %v1861_v51, 0.0  ;;  %v2652_v30 = vmax.f32 %v2054_v48, 0.0  ;;  %2290 = vmatprep.mubr.bf16.mxu1 %v3615_v8  ;;  %2483 = vmatprep.mubr.bf16.mxu0 %v3615_v8 }
 0x308   : > { %v2923_v33 = vmax.f32 %v2643_v55, %v2859_v5  ;;  %v2925_v15 = vmax.f32 %v2645_v0, %v2861_v56  ;;  %v2651_v58 = vmax.f32 %v1863_v46, 0.0  ;;  %v2653_v38 = vmax.f32 %v2056_v2, 0.0 }
 0x309   : > { %v2866_v41 = vmax.f32 %v2650_v43, %v2922_v50  ;;  %v2868_v53 = vmax.f32 %v2652_v30, %v2924_v14 }
 0x30a   : > { %v2867_v54 = vmax.f32 %v2651_v58, %v2923_v33  ;;  %v2869_v18 = vmax.f32 %v2653_v38, %v2925_v15  ;;  %v1866_v25 = vpop.f32.mrb[52].mxu1  ;;  %v2059_v62 = vpop.f32.mrb[52].mxu0 }
 0x30b   : > { %v1867_v1 = vadd.f32 %v1866_v25, %v4462_v35  ;;  %v2060_v22 = vadd.f32 %v2059_v62, %v4438_v28  ;;  %v1868_v3 = vpop.f32.mrb[53].mxu1  ;;  %v2061_v10 = vpop.f32.mrb[53].mxu0 }
 0x30c   : > { %v1869_v60 = vadd.f32 %v1868_v3, %v4466_v31  ;;  %v2062_v23 = vadd.f32 %v2061_v10, %v4440_v63  ;;  %v1870_v44 = vpop.f32.mrb[54].mxu1  ;;  %v2063_v21 = vpop.f32.mrb[54].mxu0 }
 0x30d   : > { %v2658_v24 = vmax.f32 %v1867_v1, 0.0  ;;  %v2660_v61 = vmax.f32 %v2060_v22, 0.0  ;;  %v1871_v32 = vadd.f32 %v1870_v44, %v4462_v35  ;;  %v2064_v27 = vadd.f32 %v2063_v21, %v4438_v28  ;;  %v1872_v57 = vpop.f32.mrb[55].mxu1  ;;  %v2065_v19 = vpop.f32.mrb[55].mxu0 }
 0x30e   : > { %v2659_v39 = vmax.f32 %v1869_v60, 0.0  ;;  %v2661_v52 = vmax.f32 %v2062_v23, 0.0  ;;  %v1873_v40 = vadd.f32 %v1872_v57, %v4466_v31  ;;  %v2066_v45 = vadd.f32 %v2065_v19, %v4440_v63  ;;  %2291 = vmatmul.mubr.bf16.gmra.mrb[132].mxu1 %v4424_v17  ;;  %2484 = vmatmul.mubr.bf16.gmra.mrb[132].mxu0 %v4424_v17 }
 0x30f   : > { %v2930_v9 = vmax.f32 %v2658_v24, %v2866_v41  ;;  %v2932_v5 = vmax.f32 %v2660_v61, %v2868_v53  ;;  %v2666_v56 = vmax.f32 %v1871_v32, 0.0  ;;  %v2668_v6 = vmax.f32 %v2064_v27, 0.0  ;;  %2300 = vmatprep.mubr.bf16.mxu1 %v3615_v8  ;;  %2493 = vmatprep.mubr.bf16.mxu0 %v3615_v8 }
 0x310   : > { %v2931_v59 = vmax.f32 %v2659_v39, %v2867_v54  ;;  %v2933_v20 = vmax.f32 %v2661_v52, %v2869_v18  ;;  %v2667_v26 = vmax.f32 %v1873_v40, 0.0  ;;  %v2669_v4 = vmax.f32 %v2066_v45, 0.0 }
 0x311   : > { %v2962_v36 = vmax.f32 %v2666_v56, %v2930_v9  ;;  %v2964_v47 = vmax.f32 %v2668_v6, %v2932_v5 }
 0x312   : > { %v2963_v37 = vmax.f32 %v2667_v26, %v2931_v59  ;;  %v2965_v13 = vmax.f32 %v2669_v4, %v2933_v20 }
 0x316   : > { %2301 = vmatmul.mubr.bf16.gmra.mrb[136].mxu1 %v4470_v11  ;;  %2494 = vmatmul.mubr.bf16.gmra.mrb[136].mxu0 %v4470_v11 }
 0x317   : > { %2310 = vmatprep.mubr.bf16.mxu1 %v3615_v8  ;;  %2503 = vmatprep.mubr.bf16.mxu0 %v3615_v8 }
 0x31e   : > { %2311 = vmatmul.mubr.bf16.gmra.mrb[140].mxu1 %v4468_v7  ;;  %2504 = vmatmul.mubr.bf16.gmra.mrb[140].mxu0 %v4468_v7 }
 0x323   : > { %v1876_v17 = vpop.f32.mrb[56].mxu1  ;;  %v2069_v12 = vpop.f32.mrb[56].mxu0 }
 0x324   : > { %v1877_v16 = vadd.f32 %v1876_v17, %v4462_v35  ;;  %v2070_v34 = vadd.f32 %v2069_v12, %v4438_v28  ;;  %v1878_v51 = vpop.f32.mrb[57].mxu1  ;;  %v2071_v48 = vpop.f32.mrb[57].mxu0 }
 0x325   : > { %v1879_v29 = vadd.f32 %v1878_v51, %v4466_v31  ;;  %v2072_v11 = vadd.f32 %v2071_v48, %v4440_v63  ;;  %v1880_v49 = vpop.f32.mrb[58].mxu1  ;;  %v2073_v55 = vpop.f32.mrb[58].mxu0 }
 0x326   : > { %v2674_v0 = vmax.f32 %v1877_v16, 0.0  ;;  %v2676_v8 = vmax.f32 %v2070_v34, 0.0  ;;  %v1881_v46 = vadd.f32 %v1880_v49, %v4462_v35  ;;  %v2074_v7 = vadd.f32 %v2073_v55, %v4438_v28  ;;  %v1882_v2 = vpop.f32.mrb[59].mxu1  ;;  %v2075_v50 = vpop.f32.mrb[59].mxu0 }
 0x327   : > { %v2675_v14 = vmax.f32 %v1879_v29, 0.0  ;;  %v2677_v43 = vmax.f32 %v2072_v11, 0.0  ;;  %v1883_v30 = vadd.f32 %v1882_v2, %v4466_v31  ;;  %v2076_v33 = vadd.f32 %v2075_v50, %v4440_v63 }
 0x328   : > { %v2874_v15 = vmax.f32 %v2674_v0, %v2962_v36  ;;  %v2876_v58 = vmax.f32 %v2676_v8, %v2964_v47  ;;  %v2682_v38 = vmax.f32 %v1881_v46, 0.0  ;;  %v2684_v41 = vmax.f32 %v2074_v7, 0.0 }
 0x329   : > { %v2875_v53 = vmax.f32 %v2675_v14, %v2963_v37  ;;  %v2877_v54 = vmax.f32 %v2677_v43, %v2965_v13  ;;  %v2683_v18 = vmax.f32 %v1883_v30, 0.0  ;;  %v2685_v25 = vmax.f32 %v2076_v33, 0.0 }
 0x32a   : > { %v2938_v62 = vmax.f32 %v2682_v38, %v2874_v15  ;;  %v2940_v1 = vmax.f32 %v2684_v41, %v2876_v58 }
 0x32b   : > { %v2939_v22 = vmax.f32 %v2683_v18, %v2875_v53  ;;  %v2941_v3 = vmax.f32 %v2685_v25, %v2877_v54  ;;  %v1886_v10 = vpop.f32.mrb[60].mxu1  ;;  %v2079_v60 = vpop.f32.mrb[60].mxu0 }
 0x32c   : > { %v1887_v23 = vadd.f32 %v1886_v10, %v4462_v35  ;;  %v2080_v44 = vadd.f32 %v2079_v60, %v4438_v28  ;;  %v1888_v21 = vpop.f32.mrb[61].mxu1  ;;  %v2081_v24 = vpop.f32.mrb[61].mxu0 }
 0x32d   : > { %v1889_v61 = vadd.f32 %v1888_v21, %v4466_v31  ;;  %v2082_v32 = vadd.f32 %v2081_v24, %v4440_v63  ;;  %v1890_v27 = vpop.f32.mrb[62].mxu1  ;;  %v2083_v57 = vpop.f32.mrb[62].mxu0 }
 0x32e   : > { %v2690_v19 = vmax.f32 %v1887_v23, 0.0  ;;  %v2692_v39 = vmax.f32 %v2080_v44, 0.0  ;;  %v1891_v52 = vadd.f32 %v1890_v27, %v4462_v35  ;;  %v2084_v40 = vadd.f32 %v2083_v57, %v4438_v28  ;;  %v1892_v45 = vpop.f32.mrb[63].mxu1  ;;  %v2085_v9 = vpop.f32.mrb[63].mxu0 }
 0x32f   : > { %v2691_v5 = vmax.f32 %v1889_v61, 0.0  ;;  %v2693_v56 = vmax.f32 %v2082_v32, 0.0  ;;  %v1893_v6 = vadd.f32 %v1892_v45, %v4466_v31  ;;  %v2086_v59 = vadd.f32 %v2085_v9, %v4440_v63 }
 0x330   : > { %v2970_v20 = vmax.f32 %v2690_v19, %v2938_v62  ;;  %v2972_v26 = vmax.f32 %v2692_v39, %v2940_v1  ;;  %v2698_v4 = vmax.f32 %v1891_v52, 0.0  ;;  %v2700_v36 = vmax.f32 %v2084_v40, 0.0 }
 0x331   : > { %v2971_v47 = vmax.f32 %v2691_v5, %v2939_v22  ;;  %v2973_v37 = vmax.f32 %v2693_v56, %v2941_v3  ;;  %v2699_v13 = vmax.f32 %v1893_v6, 0.0  ;;  %v2701_v17 = vmax.f32 %v2086_v59, 0.0 }
 0x332   : > { %v2882_v12 = vmax.f32 %v2698_v4, %v2970_v20  ;;  %v2884_v16 = vmax.f32 %v2700_v36, %v2972_v26 }
 0x333   : > { %v2883_v34 = vmax.f32 %v2699_v13, %v2971_v47  ;;  %v2885_v51 = vmax.f32 %v2701_v17, %v2973_v37 }
 0x348   : > { %v1896_v48 = vpop.f32.mrb[64].mxu1  ;;  %v2089_v29 = vpop.f32.mrb[64].mxu0 }
 0x349   : > { %v1897_v11 = vadd.f32 %v1896_v48, %v4462_v35  ;;  %v2090_v49 = vadd.f32 %v2089_v29, %v4438_v28  ;;  %v1898_v55 = vpop.f32.mrb[65].mxu1  ;;  %v2091_v0 = vpop.f32.mrb[65].mxu0 }
 0x34a   : > { %v1899_v8 = vadd.f32 %v1898_v55, %v4466_v31  ;;  %v2092_v46 = vadd.f32 %v2091_v0, %v4440_v63  ;;  %v1900_v7 = vpop.f32.mrb[66].mxu1  ;;  %v2093_v2 = vpop.f32.mrb[66].mxu0 }
 0x34b   : > { %v2706_v50 = vmax.f32 %v1897_v11, 0.0  ;;  %v2708_v14 = vmax.f32 %v2090_v49, 0.0  ;;  %v1901_v43 = vadd.f32 %v1900_v7, %v4462_v35  ;;  %v2094_v30 = vadd.f32 %v2093_v2, %v4438_v28  ;;  %v1902_v33 = vpop.f32.mrb[67].mxu1  ;;  %v2095_v15 = vpop.f32.mrb[67].mxu0 }
 0x34c   : > { %v2707_v58 = vmax.f32 %v1899_v8, 0.0  ;;  %v2709_v38 = vmax.f32 %v2092_v46, 0.0  ;;  %v1903_v41 = vadd.f32 %v1902_v33, %v4466_v31  ;;  %v2096_v53 = vadd.f32 %v2095_v15, %v4440_v63 }
 0x34d   : > { %v2946_v54 = vmax.f32 %v2706_v50, %v2882_v12  ;;  %v2948_v18 = vmax.f32 %v2708_v14, %v2884_v16  ;;  %v2714_v25 = vmax.f32 %v1901_v43, 0.0  ;;  %v2716_v62 = vmax.f32 %v2094_v30, 0.0 }
 0x34e   : > { %v2947_v1 = vmax.f32 %v2707_v58, %v2883_v34  ;;  %v2949_v22 = vmax.f32 %v2709_v38, %v2885_v51  ;;  %v2715_v3 = vmax.f32 %v1903_v41, 0.0  ;;  %v2717_v10 = vmax.f32 %v2096_v53, 0.0 }
 0x34f   : > { %v2978_v60 = vmax.f32 %v2714_v25, %v2946_v54  ;;  %v2980_v23 = vmax.f32 %v2716_v62, %v2948_v18  ;;  %v1400_v46 = vsub.s32 4, %v3849_v42  ;;  %v1408_v43 = vsub.s32 6, %v3849_v42 }
 0x350   : > { %v2979_v44 = vmax.f32 %v2715_v3, %v2947_v1  ;;  %v2981_v21 = vmax.f32 %v2717_v10, %v2949_v22  ;;  %v1906_v24 = vpop.f32.mrb[68].mxu1  ;;  %v2099_v61 = vpop.f32.mrb[68].mxu0  ;;  %v1404_v30 = vsub.s32 5, %v3849_v42  ;;  %v1412_v41 = vsub.s32 7, %v3849_v42 }
 0x351   : > { %v1907_v32 = vadd.f32 %v1906_v24, %v4462_v35  ;;  %v2100_v27 = vadd.f32 %v2099_v61, %v4438_v28  ;;  %v1908_v57 = vpop.f32.mrb[69].mxu1  ;;  %v2101_v19 = vpop.f32.mrb[69].mxu0  ;;  %v3616_v53 = vmov 1966171168  }
 0x352   : > { %v1909_v39 = vadd.f32 %v1908_v57, %v4466_v31  ;;  %v2102_v52 = vadd.f32 %v2101_v19, %v4440_v63  ;;  %v1910_v40 = vpop.f32.mrb[70].mxu1  ;;  %v2103_v45 = vpop.f32.mrb[70].mxu0  ;;  %v4655_v54 = vunpack.c.l.s4 %v3616_v53 }
 0x353   : > { %v2722_v9 = vmax.f32 %v1907_v32, 0.0  ;;  %v2724_v5 = vmax.f32 %v2100_v27, 0.0  ;;  %v1911_v56 = vadd.f32 %v1910_v40, %v4462_v35  ;;  %v2104_v6 = vadd.f32 %v2103_v45, %v4438_v28  ;;  %v1912_v59 = vpop.f32.mrb[71].mxu1  ;;  %v2105_v20 = vpop.f32.mrb[71].mxu0 }
 0x354   : > { %v2723_v26 = vmax.f32 %v1909_v39, 0.0  ;;  %v2725_v4 = vmax.f32 %v2102_v52, 0.0  ;;  %v1913_v36 = vadd.f32 %v1912_v59, %v4466_v31  ;;  %v2106_v47 = vadd.f32 %v2105_v20, %v4440_v63 }
 0x355   : > { %v2994_v37 = vmax.f32 %v2722_v9, %v2978_v60  ;;  %v2996_v13 = vmax.f32 %v2724_v5, %v2980_v23  ;;  %v2730_v17 = vmax.f32 %v1911_v56, 0.0  ;;  %v2732_v12 = vmax.f32 %v2104_v6, 0.0  ;;  %v3515_v6 = vld [vmem:[%s4907_s6] sm:$0xff] }
 0x356   : > { %v2995_v16 = vmax.f32 %v2723_v26, %v2979_v44  ;;  %v2997_v34 = vmax.f32 %v2725_v4, %v2981_v21  ;;  %v2731_v51 = vmax.f32 %v1913_v36, 0.0  ;;  %v2733_v48 = vmax.f32 %v2106_v47, 0.0 }
 0x357   : > { %v2890_v29 = vmax.f32 %v2730_v17, %v2994_v37  ;;  %v2892_v11 = vmax.f32 %v2732_v12, %v2996_v13  ;;  %v4664_v59 = vrot.slane %v3515_v6, %v1400_v46  ;;  %v4668_v47 = vrot.slane %v3515_v6, %v1408_v43 }
 0x358   : > { %v2891_v49 = vmax.f32 %v2731_v51, %v2995_v16  ;;  %v2893_v55 = vmax.f32 %v2733_v48, %v2997_v34  ;;  %v4670_v37 = vrot.slane %v3515_v6, %v1404_v30  ;;  %v4674_v34 = vrot.slane %v3515_v6, %v1412_v41 }
 0x359   : > { %v3081_v51 = vunpack.c.0.s8 %v4655_v54 }
 0x369   : > { %v1916_v0 = vpop.f32.mrb[72].mxu1  ;;  %v2109_v8 = vpop.f32.mrb[72].mxu0 }
 0x36a   : > { %v1917_v7 = vadd.f32 %v1916_v0, %v4462_v35  ;;  %v2110_v2 = vadd.f32 %v2109_v8, %v4438_v28  ;;  %v1918_v50 = vpop.f32.mrb[73].mxu1  ;;  %v2111_v14 = vpop.f32.mrb[73].mxu0 }
 0x36b   : > { %v1919_v33 = vadd.f32 %v1918_v50, %v4466_v31  ;;  %v2112_v15 = vadd.f32 %v2111_v14, %v4440_v63  ;;  %v1920_v58 = vpop.f32.mrb[74].mxu1  ;;  %v2113_v38 = vpop.f32.mrb[74].mxu0 }
 0x36c   : > { %v2738_v18 = vmax.f32 %v1917_v7, 0.0  ;;  %v2740_v25 = vmax.f32 %v2110_v2, 0.0  ;;  %v1921_v62 = vadd.f32 %v1920_v58, %v4462_v35  ;;  %v2114_v1 = vadd.f32 %v2113_v38, %v4438_v28  ;;  %v1922_v22 = vpop.f32.mrb[75].mxu1  ;;  %v2115_v3 = vpop.f32.mrb[75].mxu0 }
 0x36d   : > { %v2739_v10 = vmax.f32 %v1919_v33, 0.0  ;;  %v2741_v60 = vmax.f32 %v2112_v15, 0.0  ;;  %v1923_v23 = vadd.f32 %v1922_v22, %v4466_v31  ;;  %v2116_v44 = vadd.f32 %v2115_v3, %v4440_v63 }
 0x36e   : > { %v2954_v21 = vmax.f32 %v2738_v18, %v2890_v29  ;;  %v2956_v24 = vmax.f32 %v2740_v25, %v2892_v11  ;;  %v2746_v61 = vmax.f32 %v1921_v62, 0.0  ;;  %v2748_v32 = vmax.f32 %v2114_v1, 0.0 }
 0x36f   : > { %v2955_v27 = vmax.f32 %v2739_v10, %v2891_v49  ;;  %v2957_v57 = vmax.f32 %v2741_v60, %v2893_v55  ;;  %v2747_v19 = vmax.f32 %v1923_v23, 0.0  ;;  %v2749_v39 = vmax.f32 %v2116_v44, 0.0 }
 0x370   : > { %v2986_v52 = vmax.f32 %v2746_v61, %v2954_v21  ;;  %v2988_v40 = vmax.f32 %v2748_v32, %v2956_v24  ;;  %v4682_v25 = vsub.s32 %v3081_v51, %v3849_v42 }
 0x371   : > { %v2987_v45 = vmax.f32 %v2747_v19, %v2955_v27  ;;  %v2989_v9 = vmax.f32 %v2749_v39, %v2957_v57  ;;  %v1926_v5 = vpop.f32.mrb[76].mxu1  ;;  %v2119_v56 = vpop.f32.mrb[76].mxu0 }
 0x372   : > { %v1927_v20 = vadd.f32 %v1926_v5, %v4462_v35  ;;  %v2120_v26 = vadd.f32 %v2119_v56, %v4438_v28  ;;  %v1928_v4 = vpop.f32.mrb[77].mxu1  ;;  %v2121_v36 = vpop.f32.mrb[77].mxu0 }
 0x373   : > { %v1929_v13 = vadd.f32 %v1928_v4, %v4466_v31  ;;  %v2122_v17 = vadd.f32 %v2121_v36, %v4440_v63  ;;  %v1930_v12 = vpop.f32.mrb[78].mxu1  ;;  %v2123_v16 = vpop.f32.mrb[78].mxu0 }
 0x374   : > { %v2754_v48 = vmax.f32 %v1927_v20, 0.0  ;;  %v2756_v29 = vmax.f32 %v2120_v26, 0.0  ;;  %v1931_v11 = vadd.f32 %v1930_v12, %v4462_v35  ;;  %v2124_v49 = vadd.f32 %v2123_v16, %v4438_v28  ;;  %v1932_v55 = vpop.f32.mrb[79].mxu1  ;;  %v2125_v0 = vpop.f32.mrb[79].mxu0 }
 0x375   : > { %v2755_v8 = vmax.f32 %v1929_v13, 0.0  ;;  %v2757_v46 = vmax.f32 %v2122_v17, 0.0  ;;  %v1933_v7 = vadd.f32 %v1932_v55, %v4466_v31  ;;  %v2126_v2 = vadd.f32 %v2125_v0, %v4440_v63 }
 0x376   : > { %v3002_v50 = vmax.f32 %v2754_v48, %v2986_v52  ;;  %v3004_v14 = vmax.f32 %v2756_v29, %v2988_v40  ;;  %v2762_v43 = vmax.f32 %v1931_v11, 0.0  ;;  %v2764_v30 = vmax.f32 %v2124_v49, 0.0 }
 0x377   : > { %v3003_v33 = vmax.f32 %v2755_v8, %v2987_v45  ;;  %v3005_v15 = vmax.f32 %v2757_v46, %v2989_v9  ;;  %v2763_v58 = vmax.f32 %v1933_v7, 0.0  ;;  %v2765_v38 = vmax.f32 %v2126_v2, 0.0 }
 0x378   : > { %v3010_v41 = vmax.f32 %v2762_v43, %v3002_v50  ;;  %v3012_v35 = vmax.f32 %v2764_v30, %v3004_v14 }
 0x379   : > { %v3011_v53 = vmax.f32 %v2763_v58, %v3003_v33  ;;  %v3013_v28 = vmax.f32 %v2765_v38, %v3005_v15  ;;  %v2162_v54 = vpop.f32.mrb[80].mxu1  ;;  %v2355_v18 = vpop.f32.mrb[80].mxu0 }
 0x37a   : > { %v3018_v31 = vrot.slane %v3010_v41, 4  ;;  %v3030_v62 = vrot.slane %v3012_v35, 4  ;;  %v2163_v63 = vadd.f32 %v2162_v54, %v4664_v59  ;;  %v2356_v1 = vadd.f32 %v2355_v18, %v4668_v47  ;;  %v2164_v22 = vpop.f32.mrb[81].mxu1  ;;  %v2357_v3 = vpop.f32.mrb[81].mxu0 }
 0x37b   : > { %v3024_v10 = vrot.slane %v3011_v53, 4  ;;  %v3036_v60 = vrot.slane %v3013_v28, 4  ;;  %v2165_v23 = vadd.f32 %v2164_v22, %v4670_v37  ;;  %v2358_v44 = vadd.f32 %v2357_v3, %v4674_v34  ;;  %v2166_v21 = vpop.f32.mrb[82].mxu1  ;;  %v2359_v24 = vpop.f32.mrb[82].mxu0 }
 0x37c   : > { %v3019_v61 = vmax.f32 %v3010_v41, %v3018_v31  ;;  %v3031_v32 = vmax.f32 %v3012_v35, %v3030_v62  ;;  %v2518_v42 = vmax.f32 %v2163_v63, 0.0  ;;  %v2520_v27 = vmax.f32 %v2356_v1, 0.0  ;;  %v2168_v57 = vpop.f32.mrb[83].mxu1  ;;  %v2361_v19 = vpop.f32.mrb[83].mxu0 }
 0x37d   : > { %v3025_v39 = vmax.f32 %v3011_v53, %v3024_v10  ;;  %v3037_v52 = vmax.f32 %v3013_v28, %v3036_v60  ;;  %v2519_v40 = vmax.f32 %v2165_v23, 0.0  ;;  %v2521_v45 = vmax.f32 %v2358_v44, 0.0 }
 0x37e   : > { %v3020_v9 = vrot.slane %v3019_v61, 2  ;;  %v3032_v5 = vrot.slane %v3031_v32, 2  ;;  %v2167_v56 = vadd.f32 %v2166_v21, %v4664_v59  ;;  %v2360_v6 = vadd.f32 %v2359_v24, %v4668_v47 }
 0x37f   : > { %v3026_v20 = vrot.slane %v3025_v39, 2  ;;  %v3038_v26 = vrot.slane %v3037_v52, 2  ;;  %v2169_v4 = vadd.f32 %v2168_v57, %v4670_v37  ;;  %v2362_v36 = vadd.f32 %v2361_v19, %v4674_v34 }
 0x380   : > { %v3021_v13 = vmax.f32 %v3019_v61, %v3020_v9  ;;  %v3033_v17 = vmax.f32 %v3031_v32, %v3032_v5  ;;  %v2526_v12 = vmax.f32 %v2167_v56, 0.0  ;;  %v2528_v16 = vmax.f32 %v2360_v6, 0.0 }
 0x381   : > { %v3027_v51 = vmax.f32 %v3025_v39, %v3026_v20  ;;  %v3039_v48 = vmax.f32 %v3037_v52, %v3038_v26  ;;  %v2527_v29 = vmax.f32 %v2169_v4, 0.0  ;;  %v2529_v11 = vmax.f32 %v2362_v36, 0.0  ;;  %v2172_v49 = vpop.f32.mrb[84].mxu1  ;;  %v2365_v55 = vpop.f32.mrb[84].mxu0 }
 0x382   : > { %v3022_v0 = vrot.slane %v3021_v13, 1  ;;  %v3034_v8 = vrot.slane %v3033_v17, 1  ;;  %v2774_v46 = vmax.f32 %v2518_v42, %v2526_v12  ;;  %v2776_v7 = vmax.f32 %v2520_v27, %v2528_v16  ;;  %v2174_v2 = vpop.f32.mrb[85].mxu1  ;;  %v2367_v50 = vpop.f32.mrb[85].mxu0 }
 0x383   : > { %v3028_v14 = vrot.slane %v3027_v51, 1  ;;  %v3040_v43 = vrot.slane %v3039_v48, 1  ;;  %v2775_v30 = vmax.f32 %v2519_v40, %v2527_v29  ;;  %v2777_v33 = vmax.f32 %v2521_v45, %v2529_v11  ;;  %v2176_v15 = vpop.f32.mrb[86].mxu1  ;;  %v2369_v58 = vpop.f32.mrb[86].mxu0 }
 0x384   : > { %v4692_v38 = vmax.f32 %v3021_v13, %v3022_v0  ;;  %v4694_v41 = vmax.f32 %v3033_v17, %v3034_v8  ;;  %v2173_v35 = vadd.f32 %v2172_v49, %v4664_v59  ;;  %v2366_v53 = vadd.f32 %v2365_v55, %v4668_v47  ;;  %v2178_v28 = vpop.f32.mrb[87].mxu1  ;;  %v2371_v54 = vpop.f32.mrb[87].mxu0 }
 0x385   : > { %v4698_v18 = vmax.f32 %v3027_v51, %v3028_v14  ;;  %v4700_v31 = vmax.f32 %v3039_v48, %v3040_v43  ;;  %v2175_v62 = vadd.f32 %v2174_v2, %v4670_v37  ;;  %v2368_v63 = vadd.f32 %v2367_v50, %v4674_v34 }
 0x386   : > { %v2534_v1 = vmax.f32 %v2173_v35, 0.0  ;;  %v2536_v22 = vmax.f32 %v2366_v53, 0.0  ;;  %v2177_v3 = vadd.f32 %v2176_v15, %v4664_v59  ;;  %v2370_v10 = vadd.f32 %v2369_v58, %v4668_v47 }
 0x387   : > { %v2535_v60 = vmax.f32 %v2175_v62, 0.0  ;;  %v2537_v23 = vmax.f32 %v2368_v63, 0.0  ;;  %v2179_v44 = vadd.f32 %v2178_v28, %v4670_v37  ;;  %v2372_v21 = vadd.f32 %v2371_v54, %v4674_v34 }
 0x388   : > { %v2782_v24 = vmax.f32 %v2534_v1, %v2774_v46  ;;  %v2784_v61 = vmax.f32 %v2536_v22, %v2776_v7  ;;  %v2542_v32 = vmax.f32 %v2177_v3, 0.0  ;;  %v2544_v42 = vmax.f32 %v2370_v10, 0.0 }
 0x389   : > { %v2783_v27 = vmax.f32 %v2535_v60, %v2775_v30  ;;  %v2785_v57 = vmax.f32 %v2537_v23, %v2777_v33  ;;  %v2543_v19 = vmax.f32 %v2179_v44, 0.0  ;;  %v2545_v39 = vmax.f32 %v2372_v21, 0.0  ;;  %v2182_v52 = vpop.f32.mrb[88].mxu1  ;;  %v2375_v40 = vpop.f32.mrb[88].mxu0 }
 0x38a   : > { %v2790_v45 = vmax.f32 %v2542_v32, %v2782_v24  ;;  %v2792_v9 = vmax.f32 %v2544_v42, %v2784_v61  ;;  %v2183_v5 = vadd.f32 %v2182_v52, %v4664_v59  ;;  %v2376_v56 = vadd.f32 %v2375_v40, %v4668_v47  ;;  %v2184_v6 = vpop.f32.mrb[89].mxu1  ;;  %v2377_v20 = vpop.f32.mrb[89].mxu0 }
 0x38b   : > { %v2791_v26 = vmax.f32 %v2543_v19, %v2783_v27  ;;  %v2793_v4 = vmax.f32 %v2545_v39, %v2785_v57  ;;  %v2185_v36 = vadd.f32 %v2184_v6, %v4670_v37  ;;  %v2378_v13 = vadd.f32 %v2377_v20, %v4674_v34  ;;  %v2186_v17 = vpop.f32.mrb[90].mxu1  ;;  %v2379_v12 = vpop.f32.mrb[90].mxu0 }
 0x38c   : > { %v2550_v16 = vmax.f32 %v2183_v5, 0.0  ;;  %v2552_v51 = vmax.f32 %v2376_v56, 0.0  ;;  %v2187_v48 = vadd.f32 %v2186_v17, %v4664_v59  ;;  %v2380_v29 = vadd.f32 %v2379_v12, %v4668_v47  ;;  %v2188_v11 = vpop.f32.mrb[91].mxu1  ;;  %v2381_v49 = vpop.f32.mrb[91].mxu0 }
 0x38d   : > { %v2551_v55 = vmax.f32 %v2185_v36, 0.0  ;;  %v2553_v0 = vmax.f32 %v2378_v13, 0.0  ;;  %v2189_v8 = vadd.f32 %v2188_v11, %v4670_v37  ;;  %v2382_v46 = vadd.f32 %v2381_v49, %v4674_v34 }
 0x38e   : > { %v2798_v7 = vmax.f32 %v2550_v16, %v2790_v45  ;;  %v2800_v2 = vmax.f32 %v2552_v51, %v2792_v9  ;;  %v2558_v50 = vmax.f32 %v2187_v48, 0.0  ;;  %v2560_v14 = vmax.f32 %v2380_v29, 0.0 }
 0x38f   : > { %v2799_v43 = vmax.f32 %v2551_v55, %v2791_v26  ;;  %v2801_v30 = vmax.f32 %v2553_v0, %v2793_v4  ;;  %v2559_v33 = vmax.f32 %v2189_v8, 0.0  ;;  %v2561_v15 = vmax.f32 %v2382_v46, 0.0 }
 0x390   : > { %v2806_v58 = vmax.f32 %v2558_v50, %v2798_v7  ;;  %v2808_v35 = vmax.f32 %v2560_v14, %v2800_v2  ;;  %v3075_v53 = vcombine.low %v4692_v38, %v4698_v18  ;;  %v3076_v28 = vcombine.low %v4694_v41, %v4700_v31 }
 0x391   : > { %v2807_v54 = vmax.f32 %v2559_v33, %v2799_v43  ;;  %v2809_v62 = vmax.f32 %v2561_v15, %v2801_v30  ;;  %v2192_v63 = vpop.f32.mrb[92].mxu1  ;;  %v2385_v1 = vpop.f32.mrb[92].mxu0 }
 0x392   : > { %v2193_v22 = vadd.f32 %v2192_v63, %v4664_v59  ;;  %v2386_v3 = vadd.f32 %v2385_v1, %v4668_v47  ;;  %v2194_v10 = vpop.f32.mrb[93].mxu1  ;;  %v2387_v60 = vpop.f32.mrb[93].mxu0  ;;  %v4725_v38 = vrot.slane %v3075_v53, %v4682_v25  ;;  %v4728_v41 = vrot.slane %v3076_v28, %v4682_v25 }
 0x393   : > { %v2195_v23 = vadd.f32 %v2194_v10, %v4670_v37  ;;  %v2388_v44 = vadd.f32 %v2387_v60, %v4674_v34  ;;  %v2196_v21 = vpop.f32.mrb[94].mxu1  ;;  %v2389_v24 = vpop.f32.mrb[94].mxu0 }
 0x394   : > { %v2566_v18 = vmax.f32 %v2193_v22, 0.0  ;;  %v2568_v31 = vmax.f32 %v2386_v3, 0.0  ;;  %v2197_v61 = vadd.f32 %v2196_v21, %v4664_v59  ;;  %v2390_v32 = vadd.f32 %v2389_v24, %v4668_v47  ;;  %v2198_v42 = vpop.f32.mrb[95].mxu1  ;;  %v2391_v27 = vpop.f32.mrb[95].mxu0 }
 0x395   : > { %v2567_v57 = vmax.f32 %v2195_v23, 0.0  ;;  %v2569_v19 = vmax.f32 %v2388_v44, 0.0  ;;  %v2199_v39 = vadd.f32 %v2198_v42, %v4670_v37  ;;  %v2392_v52 = vadd.f32 %v2391_v27, %v4674_v34 }
 0x396   : > { %v2814_v40 = vmax.f32 %v2566_v18, %v2806_v58  ;;  %v2816_v45 = vmax.f32 %v2568_v31, %v2808_v35  ;;  %v2574_v9 = vmax.f32 %v2197_v61, 0.0  ;;  %v2576_v5 = vmax.f32 %v2390_v32, 0.0 }
 0x397   : > { %v2815_v56 = vmax.f32 %v2567_v57, %v2807_v54  ;;  %v2817_v6 = vmax.f32 %v2569_v19, %v2809_v62  ;;  %v2575_v20 = vmax.f32 %v2199_v39, 0.0  ;;  %v2577_v26 = vmax.f32 %v2392_v52, 0.0 }
 0x398   : > { %v2822_v4 = vmax.f32 %v2574_v9, %v2814_v40  ;;  %v2824_v36 = vmax.f32 %v2576_v5, %v2816_v45  ;;  %v3107_v13 = vcombine.low %v4725_v38, %v4728_v41 }
 0x399   : > { %v2823_v17 = vmax.f32 %v2575_v20, %v2815_v56  ;;  %v2825_v12 = vmax.f32 %v2577_v26, %v2817_v6  ;;  %v2202_v16 = vpop.f32.mrb[96].mxu1  ;;  %v2395_v51 = vpop.f32.mrb[96].mxu0 }
 0x39a   : > { %v2203_v48 = vadd.f32 %v2202_v16, %v4664_v59  ;;  %v2396_v29 = vadd.f32 %v2395_v51, %v4668_v47  ;;  %v2204_v11 = vpop.f32.mrb[97].mxu1  ;;  %v2397_v49 = vpop.f32.mrb[97].mxu0 }
 0x39b   : > { %v2205_v55 = vadd.f32 %v2204_v11, %v4670_v37  ;;  %v2398_v0 = vadd.f32 %v2397_v49, %v4674_v34  ;;  %v2206_v8 = vpop.f32.mrb[98].mxu1  ;;  %v2399_v46 = vpop.f32.mrb[98].mxu0 }
 0x39c   : > { %v2582_v7 = vmax.f32 %v2203_v48, 0.0  ;;  %v2584_v2 = vmax.f32 %v2396_v29, 0.0  ;;  %v2207_v50 = vadd.f32 %v2206_v8, %v4664_v59  ;;  %v2400_v14 = vadd.f32 %v2399_v46, %v4668_v47  ;;  %v2208_v43 = vpop.f32.mrb[99].mxu1  ;;  %v2401_v30 = vpop.f32.mrb[99].mxu0 }
 0x39d   : > { %v2583_v33 = vmax.f32 %v2205_v55, 0.0  ;;  %v2585_v15 = vmax.f32 %v2398_v0, 0.0  ;;  %v2209_v58 = vadd.f32 %v2208_v43, %v4670_v37  ;;  %v2402_v35 = vadd.f32 %v2401_v30, %v4674_v34 }
 0x39e   : > { %v2830_v53 = vmax.f32 %v2582_v7, %v2822_v4  ;;  %v2832_v28 = vmax.f32 %v2584_v2, %v2824_v36  ;;  %v2590_v54 = vmax.f32 %v2207_v50, 0.0  ;;  %v2592_v62 = vmax.f32 %v2400_v14, 0.0 }
 0x39f   : > { %v2831_v63 = vmax.f32 %v2583_v33, %v2823_v17  ;;  %v2833_v1 = vmax.f32 %v2585_v15, %v2825_v12  ;;  %v2591_v22 = vmax.f32 %v2209_v58, 0.0  ;;  %v2593_v3 = vmax.f32 %v2402_v35, 0.0 }
 0x3a0   : > { %v2838_v10 = vmax.f32 %v2590_v54, %v2830_v53  ;;  %v2840_v60 = vmax.f32 %v2592_v62, %v2832_v28 }
 0x3a1   : > { %v2839_v23 = vmax.f32 %v2591_v22, %v2831_v63  ;;  %v2841_v44 = vmax.f32 %v2593_v3, %v2833_v1  ;;  %v2212_v21 = vpop.f32.mrb[100].mxu1  ;;  %v2405_v24 = vpop.f32.mrb[100].mxu0 }
 0x3a2   : > { %v2213_v18 = vadd.f32 %v2212_v21, %v4664_v59  ;;  %v2406_v31 = vadd.f32 %v2405_v24, %v4668_v47  ;;  %v2214_v61 = vpop.f32.mrb[101].mxu1  ;;  %v2407_v32 = vpop.f32.mrb[101].mxu0 }
 0x3a3   : > { %v2215_v42 = vadd.f32 %v2214_v61, %v4670_v37  ;;  %v2408_v27 = vadd.f32 %v2407_v32, %v4674_v34  ;;  %v2216_v57 = vpop.f32.mrb[102].mxu1  ;;  %v2409_v19 = vpop.f32.mrb[102].mxu0 }
 0x3a4   : > { %v2598_v39 = vmax.f32 %v2213_v18, 0.0  ;;  %v2600_v52 = vmax.f32 %v2406_v31, 0.0  ;;  %v2217_v40 = vadd.f32 %v2216_v57, %v4664_v59  ;;  %v2410_v45 = vadd.f32 %v2409_v19, %v4668_v47  ;;  %v2218_v9 = vpop.f32.mrb[103].mxu1  ;;  %v2411_v5 = vpop.f32.mrb[103].mxu0 }
 0x3a5   : > { %v2599_v56 = vmax.f32 %v2215_v42, 0.0  ;;  %v2601_v6 = vmax.f32 %v2408_v27, 0.0  ;;  %v2219_v20 = vadd.f32 %v2218_v9, %v4670_v37  ;;  %v2412_v26 = vadd.f32 %v2411_v5, %v4674_v34 }
 0x3a6   : > { %v2902_v4 = vmax.f32 %v2598_v39, %v2838_v10  ;;  %v2904_v36 = vmax.f32 %v2600_v52, %v2840_v60  ;;  %v2606_v17 = vmax.f32 %v2217_v40, 0.0  ;;  %v2608_v12 = vmax.f32 %v2410_v45, 0.0 }
 0x3a7   : > { %v2903_v16 = vmax.f32 %v2599_v56, %v2839_v23  ;;  %v2905_v51 = vmax.f32 %v2601_v6, %v2841_v44  ;;  %v2607_v48 = vmax.f32 %v2219_v20, 0.0  ;;  %v2609_v29 = vmax.f32 %v2412_v26, 0.0 }
 0x3a8   : > { %v2846_v11 = vmax.f32 %v2606_v17, %v2902_v4  ;;  %v2848_v49 = vmax.f32 %v2608_v12, %v2904_v36 }
 0x3a9   : > { %v2847_v55 = vmax.f32 %v2607_v48, %v2903_v16  ;;  %v2849_v0 = vmax.f32 %v2609_v29, %v2905_v51  ;;  %v2222_v8 = vpop.f32.mrb[104].mxu1  ;;  %v2415_v46 = vpop.f32.mrb[104].mxu0 }
 0x3aa   : > { %v2223_v7 = vadd.f32 %v2222_v8, %v4664_v59  ;;  %v2416_v2 = vadd.f32 %v2415_v46, %v4668_v47  ;;  %v2224_v50 = vpop.f32.mrb[105].mxu1  ;;  %v2417_v14 = vpop.f32.mrb[105].mxu0 }
 0x3ab   : > { %v2225_v43 = vadd.f32 %v2224_v50, %v4670_v37  ;;  %v2418_v30 = vadd.f32 %v2417_v14, %v4674_v34  ;;  %v2226_v33 = vpop.f32.mrb[106].mxu1  ;;  %v2419_v15 = vpop.f32.mrb[106].mxu0 }
 0x3ac   : > { %v2614_v58 = vmax.f32 %v2223_v7, 0.0  ;;  %v2616_v35 = vmax.f32 %v2416_v2, 0.0  ;;  %v2227_v53 = vadd.f32 %v2226_v33, %v4664_v59  ;;  %v2420_v28 = vadd.f32 %v2419_v15, %v4668_v47  ;;  %v2228_v54 = vpop.f32.mrb[107].mxu1  ;;  %v2421_v62 = vpop.f32.mrb[107].mxu0 }
 0x3ad   : > { %v2615_v63 = vmax.f32 %v2225_v43, 0.0  ;;  %v2617_v1 = vmax.f32 %v2418_v30, 0.0  ;;  %v2229_v22 = vadd.f32 %v2228_v54, %v4670_v37  ;;  %v2422_v3 = vadd.f32 %v2421_v62, %v4674_v34 }
 0x3ae   : > { %v2910_v10 = vmax.f32 %v2614_v58, %v2846_v11  ;;  %v2912_v60 = vmax.f32 %v2616_v35, %v2848_v49  ;;  %v2622_v23 = vmax.f32 %v2227_v53, 0.0  ;;  %v2624_v44 = vmax.f32 %v2420_v28, 0.0 }
 0x3af   : > { %v2911_v21 = vmax.f32 %v2615_v63, %v2847_v55  ;;  %v2913_v24 = vmax.f32 %v2617_v1, %v2849_v0  ;;  %v2623_v18 = vmax.f32 %v2229_v22, 0.0  ;;  %v2625_v31 = vmax.f32 %v2422_v3, 0.0 }
 0x3b0   : > { %v2854_v61 = vmax.f32 %v2622_v23, %v2910_v10  ;;  %v2856_v32 = vmax.f32 %v2624_v44, %v2912_v60 }
 0x3b1   : > { %v2855_v42 = vmax.f32 %v2623_v18, %v2911_v21  ;;  %v2857_v27 = vmax.f32 %v2625_v31, %v2913_v24  ;;  %v2232_v57 = vpop.f32.mrb[108].mxu1  ;;  %v2425_v19 = vpop.f32.mrb[108].mxu0 }
 0x3b2   : > { %v2233_v39 = vadd.f32 %v2232_v57, %v4664_v59  ;;  %v2426_v52 = vadd.f32 %v2425_v19, %v4668_v47  ;;  %v2234_v40 = vpop.f32.mrb[109].mxu1  ;;  %v2427_v45 = vpop.f32.mrb[109].mxu0 }
 0x3b3   : > { %v2235_v9 = vadd.f32 %v2234_v40, %v4670_v37  ;;  %v2428_v5 = vadd.f32 %v2427_v45, %v4674_v34  ;;  %v2236_v56 = vpop.f32.mrb[110].mxu1  ;;  %v2429_v6 = vpop.f32.mrb[110].mxu0 }
 0x3b4   : > { %v2630_v20 = vmax.f32 %v2233_v39, 0.0  ;;  %v2632_v26 = vmax.f32 %v2426_v52, 0.0  ;;  %v2237_v4 = vadd.f32 %v2236_v56, %v4664_v59  ;;  %v2430_v36 = vadd.f32 %v2429_v6, %v4668_v47  ;;  %v2238_v17 = vpop.f32.mrb[111].mxu1  ;;  %v2431_v12 = vpop.f32.mrb[111].mxu0 }
 0x3b5   : > { %v2631_v16 = vmax.f32 %v2235_v9, 0.0  ;;  %v2633_v51 = vmax.f32 %v2428_v5, 0.0  ;;  %v2239_v48 = vadd.f32 %v2238_v17, %v4670_v37  ;;  %v2432_v29 = vadd.f32 %v2431_v12, %v4674_v34 }
 0x3b6   : > { %v2918_v11 = vmax.f32 %v2630_v20, %v2854_v61  ;;  %v2920_v49 = vmax.f32 %v2632_v26, %v2856_v32  ;;  %v2638_v55 = vmax.f32 %v2237_v4, 0.0  ;;  %v2640_v0 = vmax.f32 %v2430_v36, 0.0 }
 0x3b7   : > { %v2919_v8 = vmax.f32 %v2631_v16, %v2855_v42  ;;  %v2921_v46 = vmax.f32 %v2633_v51, %v2857_v27  ;;  %v2639_v7 = vmax.f32 %v2239_v48, 0.0  ;;  %v2641_v2 = vmax.f32 %v2432_v29, 0.0 }
 0x3b8   : > { %v2862_v50 = vmax.f32 %v2638_v55, %v2918_v11  ;;  %v2864_v14 = vmax.f32 %v2640_v0, %v2920_v49 }
 0x3b9   : > { %v2863_v43 = vmax.f32 %v2639_v7, %v2919_v8  ;;  %v2865_v30 = vmax.f32 %v2641_v2, %v2921_v46  ;;  %v2242_v33 = vpop.f32.mrb[112].mxu1  ;;  %v2435_v15 = vpop.f32.mrb[112].mxu0 }
 0x3ba   : > { %v2243_v58 = vadd.f32 %v2242_v33, %v4664_v59  ;;  %v2436_v35 = vadd.f32 %v2435_v15, %v4668_v47  ;;  %v2244_v53 = vpop.f32.mrb[113].mxu1  ;;  %v2437_v28 = vpop.f32.mrb[113].mxu0 }
 0x3bb   : > { %v2245_v54 = vadd.f32 %v2244_v53, %v4670_v37  ;;  %v2438_v62 = vadd.f32 %v2437_v28, %v4674_v34  ;;  %v2246_v63 = vpop.f32.mrb[114].mxu1  ;;  %v2439_v1 = vpop.f32.mrb[114].mxu0 }
 0x3bc   : > { %v2646_v22 = vmax.f32 %v2243_v58, 0.0  ;;  %v2648_v3 = vmax.f32 %v2436_v35, 0.0  ;;  %v2247_v10 = vadd.f32 %v2246_v63, %v4664_v59  ;;  %v2440_v60 = vadd.f32 %v2439_v1, %v4668_v47  ;;  %v2248_v23 = vpop.f32.mrb[115].mxu1  ;;  %v2441_v44 = vpop.f32.mrb[115].mxu0 }
 0x3bd   : > { %v2647_v21 = vmax.f32 %v2245_v54, 0.0  ;;  %v2649_v24 = vmax.f32 %v2438_v62, 0.0  ;;  %v2249_v18 = vadd.f32 %v2248_v23, %v4670_v37  ;;  %v2442_v31 = vadd.f32 %v2441_v44, %v4674_v34 }
 0x3be   : > { %v2926_v61 = vmax.f32 %v2646_v22, %v2862_v50  ;;  %v2928_v32 = vmax.f32 %v2648_v3, %v2864_v14  ;;  %v2654_v42 = vmax.f32 %v2247_v10, 0.0  ;;  %v2656_v27 = vmax.f32 %v2440_v60, 0.0 }
 0x3bf   : > { %v2927_v57 = vmax.f32 %v2647_v21, %v2863_v43  ;;  %v2929_v19 = vmax.f32 %v2649_v24, %v2865_v30  ;;  %v2655_v39 = vmax.f32 %v2249_v18, 0.0  ;;  %v2657_v52 = vmax.f32 %v2442_v31, 0.0 }
 0x3c0   : > { %v2870_v40 = vmax.f32 %v2654_v42, %v2926_v61  ;;  %v2872_v45 = vmax.f32 %v2656_v27, %v2928_v32 }
 0x3c1   : > { %v2871_v9 = vmax.f32 %v2655_v39, %v2927_v57  ;;  %v2873_v5 = vmax.f32 %v2657_v52, %v2929_v19  ;;  %v2252_v56 = vpop.f32.mrb[116].mxu1  ;;  %v2445_v6 = vpop.f32.mrb[116].mxu0 }
 0x3c2   : > { %v2253_v20 = vadd.f32 %v2252_v56, %v4664_v59  ;;  %v2446_v26 = vadd.f32 %v2445_v6, %v4668_v47  ;;  %v2254_v4 = vpop.f32.mrb[117].mxu1  ;;  %v2447_v36 = vpop.f32.mrb[117].mxu0 }
 0x3c3   : > { %v2255_v17 = vadd.f32 %v2254_v4, %v4670_v37  ;;  %v2448_v12 = vadd.f32 %v2447_v36, %v4674_v34  ;;  %v2256_v16 = vpop.f32.mrb[118].mxu1  ;;  %v2449_v51 = vpop.f32.mrb[118].mxu0 }
 0x3c4   : > { %v2662_v48 = vmax.f32 %v2253_v20, 0.0  ;;  %v2664_v29 = vmax.f32 %v2446_v26, 0.0  ;;  %v2257_v11 = vadd.f32 %v2256_v16, %v4664_v59  ;;  %v2450_v49 = vadd.f32 %v2449_v51, %v4668_v47  ;;  %v2258_v55 = vpop.f32.mrb[119].mxu1  ;;  %v2451_v0 = vpop.f32.mrb[119].mxu0 }
 0x3c5   : > { %v2663_v8 = vmax.f32 %v2255_v17, 0.0  ;;  %v2665_v46 = vmax.f32 %v2448_v12, 0.0  ;;  %v2259_v7 = vadd.f32 %v2258_v55, %v4670_v37  ;;  %v2452_v2 = vadd.f32 %v2451_v0, %v4674_v34 }
 0x3c6   : > { %v2934_v50 = vmax.f32 %v2662_v48, %v2870_v40  ;;  %v2936_v14 = vmax.f32 %v2664_v29, %v2872_v45  ;;  %v2670_v43 = vmax.f32 %v2257_v11, 0.0  ;;  %v2672_v30 = vmax.f32 %v2450_v49, 0.0 }
 0x3c7   : > { %v2935_v33 = vmax.f32 %v2663_v8, %v2871_v9  ;;  %v2937_v15 = vmax.f32 %v2665_v46, %v2873_v5  ;;  %v2671_v58 = vmax.f32 %v2259_v7, 0.0  ;;  %v2673_v35 = vmax.f32 %v2452_v2, 0.0 }
 0x3c8   : > { %v2966_v53 = vmax.f32 %v2670_v43, %v2934_v50  ;;  %v2968_v28 = vmax.f32 %v2672_v30, %v2936_v14 }
 0x3c9   : > { %v2967_v54 = vmax.f32 %v2671_v58, %v2935_v33  ;;  %v2969_v62 = vmax.f32 %v2673_v35, %v2937_v15  ;;  %v2262_v63 = vpop.f32.mrb[120].mxu1  ;;  %v2455_v1 = vpop.f32.mrb[120].mxu0 }
 0x3ca   : > { %v2263_v22 = vadd.f32 %v2262_v63, %v4664_v59  ;;  %v2456_v3 = vadd.f32 %v2455_v1, %v4668_v47  ;;  %v2264_v10 = vpop.f32.mrb[121].mxu1  ;;  %v2457_v60 = vpop.f32.mrb[121].mxu0 }
 0x3cb   : > { %v2265_v23 = vadd.f32 %v2264_v10, %v4670_v37  ;;  %v2458_v44 = vadd.f32 %v2457_v60, %v4674_v34  ;;  %v2266_v21 = vpop.f32.mrb[122].mxu1  ;;  %v2459_v24 = vpop.f32.mrb[122].mxu0 }
 0x3cc   : > { %v2678_v18 = vmax.f32 %v2263_v22, 0.0  ;;  %v2680_v31 = vmax.f32 %v2456_v3, 0.0  ;;  %v2267_v61 = vadd.f32 %v2266_v21, %v4664_v59  ;;  %v2460_v32 = vadd.f32 %v2459_v24, %v4668_v47  ;;  %v2268_v42 = vpop.f32.mrb[123].mxu1  ;;  %v2461_v27 = vpop.f32.mrb[123].mxu0 }
 0x3cd   : > { %v2679_v57 = vmax.f32 %v2265_v23, 0.0  ;;  %v2681_v19 = vmax.f32 %v2458_v44, 0.0  ;;  %v2269_v39 = vadd.f32 %v2268_v42, %v4670_v37  ;;  %v2462_v52 = vadd.f32 %v2461_v27, %v4674_v34 }
 0x3ce   : > { %v2878_v40 = vmax.f32 %v2678_v18, %v2966_v53  ;;  %v2880_v45 = vmax.f32 %v2680_v31, %v2968_v28  ;;  %v2686_v9 = vmax.f32 %v2267_v61, 0.0  ;;  %v2688_v5 = vmax.f32 %v2460_v32, 0.0 }
 0x3cf   : > { %v2879_v56 = vmax.f32 %v2679_v57, %v2967_v54  ;;  %v2881_v6 = vmax.f32 %v2681_v19, %v2969_v62  ;;  %v2687_v20 = vmax.f32 %v2269_v39, 0.0  ;;  %v2689_v26 = vmax.f32 %v2462_v52, 0.0 }
 0x3d0   : > { %v2942_v4 = vmax.f32 %v2686_v9, %v2878_v40  ;;  %v2944_v36 = vmax.f32 %v2688_v5, %v2880_v45 }
 0x3d1   : > { %v2943_v17 = vmax.f32 %v2687_v20, %v2879_v56  ;;  %v2945_v12 = vmax.f32 %v2689_v26, %v2881_v6  ;;  %v2272_v16 = vpop.f32.mrb[124].mxu1  ;;  %v2465_v51 = vpop.f32.mrb[124].mxu0 }
 0x3d2   : > { %v2273_v48 = vadd.f32 %v2272_v16, %v4664_v59  ;;  %v2466_v29 = vadd.f32 %v2465_v51, %v4668_v47  ;;  %v2274_v11 = vpop.f32.mrb[125].mxu1  ;;  %v2467_v49 = vpop.f32.mrb[125].mxu0 }
 0x3d3   : > { %v2275_v55 = vadd.f32 %v2274_v11, %v4670_v37  ;;  %v2468_v0 = vadd.f32 %v2467_v49, %v4674_v34  ;;  %v2276_v8 = vpop.f32.mrb[126].mxu1  ;;  %v2469_v46 = vpop.f32.mrb[126].mxu0 }
 0x3d4   : > { %v2694_v7 = vmax.f32 %v2273_v48, 0.0  ;;  %v2696_v2 = vmax.f32 %v2466_v29, 0.0  ;;  %v2277_v50 = vadd.f32 %v2276_v8, %v4664_v59  ;;  %v2470_v14 = vadd.f32 %v2469_v46, %v4668_v47  ;;  %v2278_v43 = vpop.f32.mrb[127].mxu1  ;;  %v2471_v30 = vpop.f32.mrb[127].mxu0 }
 0x3d5   : > { %v2695_v33 = vmax.f32 %v2275_v55, 0.0  ;;  %v2697_v15 = vmax.f32 %v2468_v0, 0.0  ;;  %v2279_v58 = vadd.f32 %v2278_v43, %v4670_v37  ;;  %v2472_v35 = vadd.f32 %v2471_v30, %v4674_v34 }
 0x3d6   : > { %v2974_v53 = vmax.f32 %v2694_v7, %v2942_v4  ;;  %v2976_v28 = vmax.f32 %v2696_v2, %v2944_v36  ;;  %v2702_v54 = vmax.f32 %v2277_v50, 0.0  ;;  %v2704_v62 = vmax.f32 %v2470_v14, 0.0 }
 0x3d7   : > { %v2975_v63 = vmax.f32 %v2695_v33, %v2943_v17  ;;  %v2977_v1 = vmax.f32 %v2697_v15, %v2945_v12  ;;  %v2703_v22 = vmax.f32 %v2279_v58, 0.0  ;;  %v2705_v3 = vmax.f32 %v2472_v35, 0.0 }
 0x3d8   : > { %v2886_v10 = vmax.f32 %v2702_v54, %v2974_v53  ;;  %v2888_v60 = vmax.f32 %v2704_v62, %v2976_v28 }
 0x3d9   : > { %v2887_v23 = vmax.f32 %v2703_v22, %v2975_v63  ;;  %v2889_v44 = vmax.f32 %v2705_v3, %v2977_v1  ;;  %v2282_v21 = vpop.f32.mrb[128].mxu1  ;;  %v2475_v24 = vpop.f32.mrb[128].mxu0 }
 0x3da   : > { %v2283_v18 = vadd.f32 %v2282_v21, %v4664_v59  ;;  %v2476_v31 = vadd.f32 %v2475_v24, %v4668_v47  ;;  %v2284_v61 = vpop.f32.mrb[129].mxu1  ;;  %v2477_v32 = vpop.f32.mrb[129].mxu0 }
 0x3db   : > { %v2285_v42 = vadd.f32 %v2284_v61, %v4670_v37  ;;  %v2478_v27 = vadd.f32 %v2477_v32, %v4674_v34  ;;  %v2286_v57 = vpop.f32.mrb[130].mxu1  ;;  %v2479_v19 = vpop.f32.mrb[130].mxu0 }
 0x3dc   : > { %v2710_v39 = vmax.f32 %v2283_v18, 0.0  ;;  %v2712_v52 = vmax.f32 %v2476_v31, 0.0  ;;  %v2287_v40 = vadd.f32 %v2286_v57, %v4664_v59  ;;  %v2480_v45 = vadd.f32 %v2479_v19, %v4668_v47  ;;  %v2288_v9 = vpop.f32.mrb[131].mxu1  ;;  %v2481_v5 = vpop.f32.mrb[131].mxu0 }
 0x3dd   : > { %v2711_v56 = vmax.f32 %v2285_v42, 0.0  ;;  %v2713_v6 = vmax.f32 %v2478_v27, 0.0  ;;  %v2289_v20 = vadd.f32 %v2288_v9, %v4670_v37  ;;  %v2482_v26 = vadd.f32 %v2481_v5, %v4674_v34 }
 0x3de   : > { %v2950_v4 = vmax.f32 %v2710_v39, %v2886_v10  ;;  %v2952_v36 = vmax.f32 %v2712_v52, %v2888_v60  ;;  %v2718_v17 = vmax.f32 %v2287_v40, 0.0  ;;  %v2720_v12 = vmax.f32 %v2480_v45, 0.0 }
 0x3df   : > { %v2951_v16 = vmax.f32 %v2711_v56, %v2887_v23  ;;  %v2953_v51 = vmax.f32 %v2713_v6, %v2889_v44  ;;  %v2719_v48 = vmax.f32 %v2289_v20, 0.0  ;;  %v2721_v29 = vmax.f32 %v2482_v26, 0.0 }
 0x3e0   : > { %v2982_v11 = vmax.f32 %v2718_v17, %v2950_v4  ;;  %v2984_v49 = vmax.f32 %v2720_v12, %v2952_v36 }
 0x3e1   : > { %v2983_v55 = vmax.f32 %v2719_v48, %v2951_v16  ;;  %v2985_v0 = vmax.f32 %v2721_v29, %v2953_v51  ;;  %v2292_v8 = vpop.f32.mrb[132].mxu1  ;;  %v2485_v46 = vpop.f32.mrb[132].mxu0 }
 0x3e2   : > { %v2293_v7 = vadd.f32 %v2292_v8, %v4664_v59  ;;  %v2486_v2 = vadd.f32 %v2485_v46, %v4668_v47  ;;  %v2294_v50 = vpop.f32.mrb[133].mxu1  ;;  %v2487_v14 = vpop.f32.mrb[133].mxu0 }
 0x3e3   : > { %v2295_v43 = vadd.f32 %v2294_v50, %v4670_v37  ;;  %v2488_v30 = vadd.f32 %v2487_v14, %v4674_v34  ;;  %v2296_v33 = vpop.f32.mrb[134].mxu1  ;;  %v2489_v15 = vpop.f32.mrb[134].mxu0 }
 0x3e4   : > { %v2726_v58 = vmax.f32 %v2293_v7, 0.0  ;;  %v2728_v35 = vmax.f32 %v2486_v2, 0.0  ;;  %v2297_v53 = vadd.f32 %v2296_v33, %v4664_v59  ;;  %v2490_v28 = vadd.f32 %v2489_v15, %v4668_v47  ;;  %v2298_v54 = vpop.f32.mrb[135].mxu1  ;;  %v2491_v62 = vpop.f32.mrb[135].mxu0 }
 0x3e5   : > { %v2727_v63 = vmax.f32 %v2295_v43, 0.0  ;;  %v2729_v1 = vmax.f32 %v2488_v30, 0.0  ;;  %v2299_v22 = vadd.f32 %v2298_v54, %v4670_v37  ;;  %v2492_v3 = vadd.f32 %v2491_v62, %v4674_v34 }
 0x3e6   : > { %v2998_v10 = vmax.f32 %v2726_v58, %v2982_v11  ;;  %v3000_v60 = vmax.f32 %v2728_v35, %v2984_v49  ;;  %v2734_v23 = vmax.f32 %v2297_v53, 0.0  ;;  %v2736_v44 = vmax.f32 %v2490_v28, 0.0 }
 0x3e7   : > { %v2999_v21 = vmax.f32 %v2727_v63, %v2983_v55  ;;  %v3001_v24 = vmax.f32 %v2729_v1, %v2985_v0  ;;  %v2735_v18 = vmax.f32 %v2299_v22, 0.0  ;;  %v2737_v31 = vmax.f32 %v2492_v3, 0.0 }
 0x3e8   : > { %v2894_v61 = vmax.f32 %v2734_v23, %v2998_v10  ;;  %v2896_v32 = vmax.f32 %v2736_v44, %v3000_v60 }
 0x3e9   : > { %v2895_v42 = vmax.f32 %v2735_v18, %v2999_v21  ;;  %v2897_v27 = vmax.f32 %v2737_v31, %v3001_v24  ;;  %v2302_v57 = vpop.f32.mrb[136].mxu1  ;;  %v2495_v19 = vpop.f32.mrb[136].mxu0 }
 0x3ea   : > { %v2303_v39 = vadd.f32 %v2302_v57, %v4664_v59  ;;  %v2496_v52 = vadd.f32 %v2495_v19, %v4668_v47  ;;  %v2304_v40 = vpop.f32.mrb[137].mxu1  ;;  %v2497_v45 = vpop.f32.mrb[137].mxu0 }
 0x3eb   : > { %v2305_v9 = vadd.f32 %v2304_v40, %v4670_v37  ;;  %v2498_v5 = vadd.f32 %v2497_v45, %v4674_v34  ;;  %v2306_v56 = vpop.f32.mrb[138].mxu1  ;;  %v2499_v6 = vpop.f32.mrb[138].mxu0 }
 0x3ec   : > { %v2742_v20 = vmax.f32 %v2303_v39, 0.0  ;;  %v2744_v26 = vmax.f32 %v2496_v52, 0.0  ;;  %v2307_v4 = vadd.f32 %v2306_v56, %v4664_v59  ;;  %v2500_v36 = vadd.f32 %v2499_v6, %v4668_v47  ;;  %v2308_v17 = vpop.f32.mrb[139].mxu1  ;;  %v2501_v12 = vpop.f32.mrb[139].mxu0 }
 0x3ed   : > { %v2743_v16 = vmax.f32 %v2305_v9, 0.0  ;;  %v2745_v51 = vmax.f32 %v2498_v5, 0.0  ;;  %v2309_v48 = vadd.f32 %v2308_v17, %v4670_v37  ;;  %v2502_v29 = vadd.f32 %v2501_v12, %v4674_v34 }
 0x3ee   : > { %v2958_v11 = vmax.f32 %v2742_v20, %v2894_v61  ;;  %v2960_v49 = vmax.f32 %v2744_v26, %v2896_v32  ;;  %v2750_v55 = vmax.f32 %v2307_v4, 0.0  ;;  %v2752_v0 = vmax.f32 %v2500_v36, 0.0 }
 0x3ef   : > { %v2959_v8 = vmax.f32 %v2743_v16, %v2895_v42  ;;  %v2961_v46 = vmax.f32 %v2745_v51, %v2897_v27  ;;  %v2751_v7 = vmax.f32 %v2309_v48, 0.0  ;;  %v2753_v2 = vmax.f32 %v2502_v29, 0.0 }
 0x3f0   : > { %v2990_v50 = vmax.f32 %v2750_v55, %v2958_v11  ;;  %v2992_v14 = vmax.f32 %v2752_v0, %v2960_v49 }
 0x3f1   : > { %v2991_v43 = vmax.f32 %v2751_v7, %v2959_v8  ;;  %v2993_v30 = vmax.f32 %v2753_v2, %v2961_v46  ;;  %v2312_v33 = vpop.f32.mrb[140].mxu1  ;;  %v2505_v15 = vpop.f32.mrb[140].mxu0 }
 0x3f2   : > { %v2313_v58 = vadd.f32 %v2312_v33, %v4664_v59  ;;  %v2506_v35 = vadd.f32 %v2505_v15, %v4668_v47  ;;  %v2314_v53 = vpop.f32.mrb[141].mxu1  ;;  %v2507_v28 = vpop.f32.mrb[141].mxu0  ;;  %v3115_v15 = vrot.slane %v3107_v13, %v4682_v25 }
 0x3f3   : > { %v2315_v54 = vadd.f32 %v2314_v53, %v4670_v37  ;;  %v2508_v62 = vadd.f32 %v2507_v28, %v4674_v34  ;;  %v2316_v63 = vpop.f32.mrb[142].mxu1  ;;  %v2509_v1 = vpop.f32.mrb[142].mxu0 }
 0x3f4   : > { %v2758_v22 = vmax.f32 %v2313_v58, 0.0  ;;  %v2760_v3 = vmax.f32 %v2506_v35, 0.0  ;;  %v2317_v10 = vadd.f32 %v2316_v63, %v4664_v59  ;;  %v2510_v60 = vadd.f32 %v2509_v1, %v4668_v47  ;;  %v2318_v23 = vpop.f32.mrb[143].mxu1  ;;  %v2511_v44 = vpop.f32.mrb[143].mxu0  ;;  %v3066_v35 = vld [vmem:[%s3738_s12] sm:$0xff] }
 0x3f5   : > { %v2759_v21 = vmax.f32 %v2315_v54, 0.0  ;;  %v2761_v24 = vmax.f32 %v2508_v62, 0.0  ;;  %v2319_v18 = vadd.f32 %v2318_v23, %v4670_v37  ;;  %v2512_v31 = vadd.f32 %v2511_v44, %v4674_v34 }
 0x3f6   : > { %v3006_v61 = vmax.f32 %v2758_v22, %v2990_v50  ;;  %v3008_v32 = vmax.f32 %v2760_v3, %v2992_v14  ;;  %v2766_v42 = vmax.f32 %v2317_v10, 0.0  ;;  %v2768_v27 = vmax.f32 %v2510_v60, 0.0 }
 0x3f7   : > { %v3007_v57 = vmax.f32 %v2759_v21, %v2991_v43  ;;  %v3009_v19 = vmax.f32 %v2761_v24, %v2993_v30  ;;  %v2767_v39 = vmax.f32 %v2319_v18, 0.0  ;;  %v2769_v52 = vmax.f32 %v2512_v31, 0.0 }
 0x3f8   : > { %v3014_v40 = vmax.f32 %v2766_v42, %v3006_v61  ;;  %v3016_v59 = vmax.f32 %v2768_v27, %v3008_v32 }
 0x3f9   : > { %v3015_v45 = vmax.f32 %v2767_v39, %v3007_v57  ;;  %v3017_v47 = vmax.f32 %v2769_v52, %v3009_v19 }
 0x3fa   : > { %v3042_v9 = vrot.slane %v3014_v40, 4  ;;  %v3054_v5 = vrot.slane %v3016_v59, 4 }
 0x3fb   : > { %v3048_v56 = vrot.slane %v3015_v45, 4  ;;  %v3060_v6 = vrot.slane %v3017_v47, 4 }
 0x3fc   : > { %v3043_v20 = vmax.f32 %v3014_v40, %v3042_v9  ;;  %v3055_v37 = vmax.f32 %v3016_v59, %v3054_v5 }
 0x3fd   : > { %v3049_v26 = vmax.f32 %v3015_v45, %v3048_v56  ;;  %v3061_v34 = vmax.f32 %v3017_v47, %v3060_v6 }
 0x3fe   : > { %v3044_v4 = vrot.slane %v3043_v20, 2  ;;  %v3056_v36 = vrot.slane %v3055_v37, 2 }
 0x3ff   : > { %v3050_v17 = vrot.slane %v3049_v26, 2  ;;  %v3062_v12 = vrot.slane %v3061_v34, 2 }
 0x400   : > { %v3045_v16 = vmax.f32 %v3043_v20, %v3044_v4  ;;  %v3057_v51 = vmax.f32 %v3055_v37, %v3056_v36 }
 0x401   : > { %v3051_v48 = vmax.f32 %v3049_v26, %v3050_v17  ;;  %v3063_v29 = vmax.f32 %v3061_v34, %v3062_v12 }
 0x402   : > { %v3046_v11 = vrot.slane %v3045_v16, 1  ;;  %v3058_v49 = vrot.slane %v3057_v51, 1 }
 0x403   : > { %v3052_v55 = vrot.slane %v3051_v48, 1  ;;  %v3064_v0 = vrot.slane %v3063_v29, 1 }
 0x404   : > { %v3047_v8 = vmax.f32 %v3045_v16, %v3046_v11  ;;  %v3059_v46 = vmax.f32 %v3057_v51, %v3058_v49 }
 0x405   : > { %v3053_v7 = vmax.f32 %v3051_v48, %v3052_v55  ;;  %v3065_v2 = vmax.f32 %v3063_v29, %v3064_v0 }
 0x407   : > { %v3077_v50 = vcombine.low %v3047_v8, %v3053_v7  ;;  %v3078_v14 = vcombine.low %v3059_v46, %v3065_v2 }
 0x409   : > { %v3099_v43 = vrot.slane %v3077_v50, %v4682_v25  ;;  %v3106_v30 = vrot.slane %v3078_v14, %v4682_v25 }
 0x40b   : > { %v3108_v33 = vcombine.low %v3099_v43, %v3106_v30 }
 0x40d   : > { %v3122_v58 = vrot.slane %v3108_v33, %v4682_v25 }
 0x40f   : > { %v3123_v53 = vcombine.low %v3115_v15, %v3122_v58 }
 0x411   : > { %v3125_v28 = vmax.f32 %v3066_v35, %v3123_v53 }
 0x413   : > { %3126 = vst [vmem:[%s3738_s12] sm:$0xff] %v3125_v28 }
 0x414   : > { %3529 = shalt.err (!%p3526_p8)
}
 0x415   : > { %s3530_s12 = scalar_lea.hbm %s4845_s19, 128  ;;  %s3534_s9 = scalar_lea.hbm %s4908_s7, 256 }
 0x416   : > { %p3531_p10 = scmp.ne.s32.totalorder %s4845_s19, %s3530_s12  ;;  %p3535_p13 = scmp.lt.u32.totalorder %s4845_s19, %s4908_s7 }
 0x417   : > { %p3536_p0 = scmp.lt.u32.totalorder %s3534_s9, %s3530_s12  ;;  %p3538_p2 = scmp.lt.u32.totalorder %s3530_s12, %s4845_s19 }
 0x418   : > { %p3532_p11 = pnand %p3531_p10, %p3707_p3 }
 0x419   : > { %p3537_p1 = por %p3536_p0, %p3535_p13 }
 0x41a   : > { %p3533_p12 = pneg %p3532_p11 }
 0x41b   : > { %p3539_p4 = por %p3538_p2, %p3537_p1 }
 0x41d   : > { %p3540_p5 = pnand %p3539_p4, %p3533_p12 }
 0x41f   : > { %3543 = shalt.err (!%p3540_p5)
}
 0x420   : > { %3388 = dma.vmem_to_hbm [thread:$0]  (%p3707_p3), %s4847_s10, 128, %s4845_s19, %s3128_s20  }
 0x421 PF: > { %p3394_p6 = scmp.ge.s32.totalorder %s3610_s8, 2  ;;  %s3154_s16 = sand.u32 1, %s3582_s24  }
 0x422   : > { %s3155_s28 = scalar_lea.sflag [#allocation3], %s3154_s16 }
 0x423   : > { %p3391_p7 = pnand %p3394_p6, %p3717_p9 }
 0x425   : > { %3577 = dma.done.wait (!%p3391_p7), %s3155_s28, 128  }
 0x426   : > { %3579 = vsyncadd (!%p3391_p7), %s3155_s28, 4294967168  ;;  %s20_s8 = sadd.s32 1, %s3610_s8   ;;  %s4913_s13 = sld [smem:[#allocation5_spill]] }
 0x427   : > { %p17_p8 = scmp.ge.s32.totalorder %s20_s8, 6   ;;  %s4914_s24 = smov %s3586_s25 }
 0x428   : > { %s4915_s25 = smov %s3590_s26  ;;  %s4916_s26 = smov %s3725_s17 }
 0x429   : > { %s4917_s27 = smov %s3602_s29  ;;  %s4918_s28 = smov %s3606_s30 }
 0x42a   : > { %s4919_s29 = smov %s4922_s11  ;;  %19 = sbr.rel (!%p17_p8) target bundleno = 5 (0x5), region = 87 }
 0x42c   : > { %s4920_s30 = smov %s4913_s13 }
 0x431   :  { %3160 = vsyncpa [#allocation3], 1 }
 0x432   :  { %3162 = vsyncpa [#allocation3 + $0x1], 1 }

</bundles_post_ra>
